<compile_context>
chip_gen: v5e
topology: v5e:2x2
jax: 0.10.0
libtpu: 0.0.40
codegen_flags: <defaults>
</compile_context>

<pallas_src>
import functools

import jax
import jax.numpy as jnp
import numpy as np
from jax import lax
from jax.experimental import pallas as pl
from jax.experimental.pallas import tpu as pltpu


# ----------------------------------------------------------------------------
# Fused kernel factory: num_layers bidirectional LSTM layers + fc, one pallas_call.
# Ref layout (positional):
#   x_ref (T,B,In),
#   per layer l: wih_ref, whh_blk_ref (2H,8H block-diag), b_ref (1,8H),
#   fc_w_ref (2H,O), fc_b_ref (1,O),
#   out_ref (B,O),
#   xw_sc (T,B,8H), actf_sc (T,B,H), actb_sc (T,B,H)
# Layer-0 wih is (In, 8H); layers>0 wih is (2, H, 8H): plane 0 multiplies the previous
# layer's forward hidden, plane 1 its backward hidden.
# Gate column order is PyTorch's [i, f, g, o] per direction, fwd block then bwd block.
# ----------------------------------------------------------------------------
def make_birnn_kernel(num_layers, T, B, H, In, O):
    G = 8 * H
    unroll = min(T, 8)  # cap unroll: full unroll only for small T

    def kernel(*refs):
        x_ref = refs[0]
        lrefs = [(refs[1 + 3 * l], refs[2 + 3 * l], refs[3 + 3 * l])
                 for l in range(num_layers)]
        fc_w_ref = refs[1 + 3 * num_layers]
        fc_b_ref = refs[2 + 3 * num_layers]
        out_ref = refs[3 + 3 * num_layers]
        xw_sc = refs[4 + 3 * num_layers]
        actf_sc = refs[5 + 3 * num_layers]
        actb_sc = refs[6 + 3 * num_layers]

        for l in range(num_layers):
            wih_ref, whh_ref, b_ref = lrefs[l]

            # ---- Hoisted input projection for BOTH directions (one MXU pass). ----
            if l == 0:
                x2d = x_ref[...].reshape(T * B, In)
                xw = jnp.dot(x2d, wih_ref[...], preferred_element_type=jnp.float32)
            else:
                w = wih_ref[...]                                  # (2, H, 8H)
                xw = (jnp.dot(actf_sc[...].reshape(T * B, H), w[0],
                              preferred_element_type=jnp.float32)
                      + jnp.dot(actb_sc[...].reshape(T * B, H), w[1],
                                preferred_element_type=jnp.float32))
            xw_sc[...] = (xw + b_ref[...]).reshape(T, B, G)

            whh = whh_ref[...]                                    # (2H, 8H) block-diag

            if l < num_layers - 1:
                # Bidirectional recurrence; h/c live in the fori_loop carry (registers).
                def step(t, carry):
                    h_cat, c_f, c_b = carry                       # (B,2H), (B,H), (B,H)
                    tb = T - 1 - t
                    # One 256-wide recurrent matmul for both directions.
                    hw = jnp.dot(h_cat, whh, preferred_element_type=jnp.float32)  # (B,8H)
                    gates = jnp.concatenate(
                        [xw_sc[t, :, pl.ds(0, 4 * H)],
                         xw_sc[tb, :, pl.ds(4 * H, 4 * H)]], axis=-1) + hw
                    sig = jax.nn.sigmoid(gates)   # single EUP pass over full gates
                    th = jnp.tanh(gates)          # single EUP pass over full gates
                    c_f = sig[:, H:2 * H] * c_f + sig[:, 0:H] * th[:, 2 * H:3 * H]
                    c_b = sig[:, 5 * H:6 * H] * c_b + sig[:, 4 * H:5 * H] * th[:, 6 * H:7 * H]
                    h_f = sig[:, 3 * H:4 * H] * jnp.tanh(c_f)
                    h_b = sig[:, 7 * H:8 * H] * jnp.tanh(c_b)
                    actf_sc[t] = h_f              # both planes stored at lane offset 0
                    actb_sc[tb] = h_b
                    return (jnp.concatenate([h_f, h_b], axis=-1), c_f, c_b)

                init = (jnp.zeros((B, 2 * H), jnp.float32),
                        jnp.zeros((B, H), jnp.float32),
                        jnp.zeros((B, H), jnp.float32))
                lax.fori_loop(0, T, step, init, unroll=unroll)
            else:
                # Last layer: fc only needs h_fwd(T-1) and the zero-state bwd step at T-1.
                whh_f = whh[:H, :4 * H]

                def fwd_step(t, carry):
                    h, c = carry
                    gates = xw_sc[t, :, pl.ds(0, 4 * H)] + jnp.dot(
                        h, whh_f, preferred_element_type=jnp.float32)
                    sig = jax.nn.sigmoid(gates)
                    th = jnp.tanh(gates)
                    c = sig[:, H:2 * H] * c + sig[:, 0:H] * th[:, 2 * H:3 * H]
                    h = sig[:, 3 * H:4 * H] * jnp.tanh(c)
                    return (h, c)

                init = (jnp.zeros((B, H), jnp.float32),
                        jnp.zeros((B, H), jnp.float32))
                h_f, _ = lax.fori_loop(0, T, fwd_step, init, unroll=unroll)

                # Backward hidden at the last timestep: single step from zero state.
                gates_b = xw_sc[T - 1, :, pl.ds(4 * H, 4 * H)]
                sig_b = jax.nn.sigmoid(gates_b)
                th_b = jnp.tanh(gates_b)
                c_b = sig_b[:, 0:H] * th_b[:, 2 * H:3 * H]        # f * 0 + i * g
                h_b = sig_b[:, 3 * H:4 * H] * jnp.tanh(c_b)

                # Fused fc: two dots avoid a lane concat of [h_f | h_b].
                fcw = fc_w_ref[...]                               # (2H, O)
                out_ref[...] = (
                    jnp.dot(h_f, fcw[:H, :], preferred_element_type=jnp.float32)
                    + jnp.dot(h_b, fcw[H:, :], preferred_element_type=jnp.float32)
                    + fc_b_ref[...])

    return kernel


# ----------------------------------------------------------------------------
# Wrapper: matches torch forward (batch_first input; fc on the last timestep).
# ----------------------------------------------------------------------------
def birnn_forward(x_bti, params, *, num_layers):
    B0, T, In = x_bti.shape
    pad = (-B0) % 8                                # pad batch to full f32 sublanes
    if pad:
        x_bti = jnp.pad(x_bti, ((0, pad), (0, 0), (0, 0)))
    B = B0 + pad
    x_tbi = jnp.transpose(x_bti, (1, 0, 2))        # (T, B, In) time-major

    H = params["lstm"][0]["whh_blk"].shape[0] // 2
    O = params["fc_w_t"].shape[1]
    G = 8 * H

    inputs = [x_tbi]
    for l in range(num_layers):
        p = params["lstm"][l]
        inputs += [p["wih"], p["whh_blk"], p["b_cat"]]
    inputs += [params["fc_w_t"], params["fc_b"]]

    # Everything is resident once in VMEM (no grid -> no double buffering).
    resident = sum(int(np.prod(a.shape)) * 4 for a in inputs) + B * O * 4
    scratch = 4 * (T * B * G + 2 * T * B * H)
    vmem_limit = int(min(128 * 1024 * 1024,
                         max(32 * 1024 * 1024, 2 * (resident + scratch))))

    flops = 0
    in_l = In
    for l in range(num_layers):
        flops += 2 * T * B * in_l * G                              # input projection
        if l < num_layers - 1:
            flops += 2 * T * B * (2 * H) * G                       # fused recurrent dot
        else:
            flops += 2 * T * B * H * (4 * H)                       # fwd-only recurrence
        in_l = 2 * H
    flops += 2 * B * (2 * H) * O
    cost = pl.CostEstimate(flops=int(flops),
                           transcendentals=int(num_layers * T * B * 2 * G),
                           bytes_accessed=int(resident))

    vmem = pl.BlockSpec(memory_space=pltpu.MemorySpace.VMEM)
    out = pl.pallas_call(
        make_birnn_kernel(num_layers, T, B, H, In, O),
        out_shape=jax.ShapeDtypeStruct((B, O), jnp.float32),
        in_specs=[vmem] * len(inputs),
        out_specs=vmem,
        scratch_shapes=[
            pltpu.VMEM((T, B, G), jnp.float32),   # hoisted input projection (both dirs)
            pltpu.VMEM((T, B, H), jnp.float32),   # inter-layer activation, fwd plane
            pltpu.VMEM((T, B, H), jnp.float32),   # inter-layer activation, bwd plane
        ],
        compiler_params=pltpu.CompilerParams(vmem_limit_bytes=vmem_limit),
        cost_estimate=cost,
    )(*inputs)
    return out[:B0]


# ----------------------------------------------------------------------------
# Pure-JAX reference (full bidirectional computation) for correctness check.
# ----------------------------------------------------------------------------
def lstm_dir_ref(x_tbi, wih_t, whh_t, b, reverse):
    T, B, _ = x_tbi.shape
    H = whh_t.shape[0]
    xs = x_tbi[::-1] if reverse else x_tbi

    def step(carry, xt):
        h, c = carry
        gates = xt @ wih_t + h @ whh_t + b
        i = jax.nn.sigmoid(gates[:, 0 * H:1 * H])
        f = jax.nn.sigmoid(gates[:, 1 * H:2 * H])
        g = jnp.tanh(gates[:, 2 * H:3 * H])
        o = jax.nn.sigmoid(gates[:, 3 * H:4 * H])
        c = f * c + i * g
        h = o * jnp.tanh(c)
        return (h, c), h

    init = (jnp.zeros((B, H), jnp.float32), jnp.zeros((B, H), jnp.float32))
    _, hs = lax.scan(step, init, xs)
    return hs[::-1] if reverse else hs


def birnn_ref(x_bti, params, *, num_layers):
    layer_in = jnp.transpose(x_bti, (1, 0, 2))
    for l in range(num_layers):
        p = params["lstm"][l]
        whh_blk = p["whh_blk"]
        H = whh_blk.shape[0] // 2
        wih = p["wih"]
        wih_cat = wih if l == 0 else jnp.concatenate([wih[0], wih[1]], axis=0)
        wih_f, wih_b = wih_cat[:, :4 * H], wih_cat[:, 4 * H:]
        whh_f, whh_b = whh_blk[:H, :4 * H], whh_blk[H:, 4 * H:]
        b_f, b_b = p["b_cat"][0, :4 * H], p["b_cat"][0, 4 * H:]
        fwd = lstm_dir_ref(layer_in, wih_f, whh_f, b_f, reverse=False)
        bwd = lstm_dir_ref(layer_in, wih_b, whh_b, b_b, reverse=True)
        layer_in = jnp.concatenate([fwd, bwd], axis=-1)
    last = layer_in[-1]
    return last @ params["fc_w_t"] + params["fc_b"]


# ----------------------------------------------------------------------------
# Deterministic parameter init (PyTorch-style U(-1/sqrt(H), 1/sqrt(H))).
# ----------------------------------------------------------------------------
def init_params(key, input_size, hidden_size, num_layers, output_size):
    H = hidden_size
    bound = 1.0 / np.sqrt(H)
    layers = []
    for l in range(num_layers):
        in_l = input_size if l == 0 else 2 * H
        dirs = {}
        for d in ("fwd", "bwd"):
            key, k1, k2, k3, k4 = jax.random.split(key, 5)
            w_ih = jax.random.uniform(k1, (4 * H, in_l), jnp.float32, -bound, bound)
            w_hh = jax.random.uniform(k2, (4 * H, H), jnp.float32, -bound, bound)
            b_ih = jax.random.uniform(k3, (4 * H,), jnp.float32, -bound, bound)
            b_hh = jax.random.uniform(k4, (4 * H,), jnp.float32, -bound, bound)
            dirs[d] = (w_ih, w_hh, b_ih + b_hh)
        wih_cat = jnp.concatenate([dirs["fwd"][0].T, dirs["bwd"][0].T], axis=1)  # (in_l, 8H)
        if l == 0:
            wih = wih_cat
        else:
            # Split by input-feature origin: rows 0:H feed from the previous layer's fwd
            # hidden, rows H:2H from its bwd hidden -> (2, H, 8H) for two half matmuls.
            wih = jnp.stack([wih_cat[:H], wih_cat[H:]], axis=0)
        # Block-diagonal recurrent weight: one (B,2H)@(2H,8H) dot serves both directions.
        whh_blk = jnp.zeros((2 * H, 8 * H), jnp.float32)
        whh_blk = whh_blk.at[:H, :4 * H].set(dirs["fwd"][1].T)
        whh_blk = whh_blk.at[H:, 4 * H:].set(dirs["bwd"][1].T)
        layers.append({
            "wih": wih,
            "whh_blk": whh_blk,
            "b_cat": jnp.concatenate([dirs["fwd"][2], dirs["bwd"][2]]).reshape(1, 8 * H),
        })
    key, kf1, kf2 = jax.random.split(key, 3)
    fb = 1.0 / np.sqrt(2 * H)
    fc_w = jax.random.uniform(kf1, (output_size, 2 * H), jnp.float32, -fb, fb)
    fc_b = jax.random.uniform(kf2, (output_size,), jnp.float32, -fb, fb)
    return {"lstm": layers,
            "fc_w_t": fc_w.T,                      # (2H, O)
            "fc_b": fc_b.reshape(1, output_size)}  # (1, O)


if __name__ == "__main__":
    # Small shapes consistent with the module's forward: x is (B, T, input_size).
    B, T = 2, 8
    input_size, hidden_size, num_layers, output_size = 16, 32, 2, 4

    key = jax.random.PRNGKey(0)
    key, kx = jax.random.split(key)
    x = jax.random.normal(kx, (B, T, input_size), jnp.float32)

    params = init_params(key, input_size, hidden_size, num_layers, output_size)

    fwd = jax.jit(functools.partial(birnn_forward, num_layers=num_layers))
    out = jax.block_until_ready(fwd(x, params))

    ref = birnn_ref(x, params, num_layers=num_layers)
    np.testing.assert_allclose(np.asarray(out), np.asarray(ref), rtol=1e-5, atol=1e-5)

    assert out.shape == (B, output_size)
    print("KERNEL_OK")
</pallas_src>

<mosaic_0001>
module attributes {stable_mosaic.version = 11 : i64} {
  func.func @kernel(%arg0: memref<8x8x16xf32, #tpu.memory_space<vmem>>, %arg1: memref<16x256xf32, #tpu.memory_space<vmem>>, %arg2: memref<64x256xf32, #tpu.memory_space<vmem>>, %arg3: memref<1x256xf32, #tpu.memory_space<vmem>>, %arg4: memref<2x32x256xf32, #tpu.memory_space<vmem>>, %arg5: memref<64x256xf32, #tpu.memory_space<vmem>>, %arg6: memref<1x256xf32, #tpu.memory_space<vmem>>, %arg7: memref<64x4xf32, #tpu.memory_space<vmem>>, %arg8: memref<1x4xf32, #tpu.memory_space<vmem>>, %arg9: memref<8x4xf32, #tpu.memory_space<vmem>>, %arg10: memref<8x8x256xf32, #tpu.memory_space<vmem>>, %arg11: memref<8x8x32xf32, #tpu.memory_space<vmem>>, %arg12: memref<8x8x32xf32, #tpu.memory_space<vmem>>) attributes {dimension_semantics = [], scalar_prefetch = 0 : i64, scratch_operands = 3 : i64, tpu.core_type = #tpu.core_type<tc>} {
    %c0 = arith.constant 0 : index
    %c0_0 = arith.constant 0 : index
    %c0_1 = arith.constant 0 : index
    %0 = vector.load %arg0[%c0, %c0_0, %c0_1] : memref<8x8x16xf32, #tpu.memory_space<vmem>>, vector<8x8x16xf32>
    %1 = vector.shape_cast %0 : vector<8x8x16xf32> to vector<64x16xf32>
    %c0_2 = arith.constant 0 : index
    %c0_3 = arith.constant 0 : index
    %2 = vector.load %arg1[%c0_2, %c0_3] : memref<16x256xf32, #tpu.memory_space<vmem>>, vector<16x256xf32>
    %cst = arith.constant dense<0.000000e+00> : vector<64x256xf32>
    %3 = tpu.matmul %1, %2, %cst {dimension_numbers = #tpu.dot_dimension_numbers<[1], [0], [0], [1], [0, 0, 1, 1], [], []>} : vector<64x16xf32>, vector<16x256xf32>, vector<64x256xf32> -> vector<64x256xf32>
    %c0_4 = arith.constant 0 : index
    %c0_5 = arith.constant 0 : index
    %4 = vector.load %arg3[%c0_4, %c0_5] : memref<1x256xf32, #tpu.memory_space<vmem>>, vector<1x256xf32>
    %5 = vector.broadcast %4 : vector<1x256xf32> to vector<64x256xf32>
    %6 = arith.addf %3, %5 : vector<64x256xf32>
    %7 = vector.shape_cast %6 : vector<64x256xf32> to vector<8x8x256xf32>
    %c0_6 = arith.constant 0 : index
    %c0_7 = arith.constant 0 : index
    %c0_8 = arith.constant 0 : index
    %8 = vector.load %arg10[%c0_6, %c0_7, %c0_8] : memref<8x8x256xf32, #tpu.memory_space<vmem>>, vector<8x8x256xf32>
    tpu.vector_store %arg10[%c0_6, %c0_7, %c0_8], %7 {strides = array<i32>} : memref<8x8x256xf32, #tpu.memory_space<vmem>>, vector<8x8x256xf32>,
    %c0_9 = arith.constant 0 : index
    %c0_10 = arith.constant 0 : index
    %9 = vector.load %arg2[%c0_9, %c0_10] : memref<64x256xf32, #tpu.memory_space<vmem>>, vector<64x256xf32>
    %cst_11 = arith.constant 0.000000e+00 : f32
    %10 = vector.broadcast %cst_11 : f32 to vector<8x64xf32>
    %cst_12 = arith.constant 0.000000e+00 : f32
    %11 = vector.broadcast %cst_12 : f32 to vector<8x32xf32>
    %cst_13 = arith.constant 0.000000e+00 : f32
    %12 = vector.broadcast %cst_13 : f32 to vector<8x32xf32>
    %c0_i32 = arith.constant 0 : i32
    %c7_i32 = arith.constant 7 : i32
    %13 = arith.subi %c7_i32, %c0_i32 : i32
    %cst_14 = arith.constant dense<0.000000e+00> : vector<8x256xf32>
    %14 = tpu.matmul %10, %9, %cst_14 {dimension_numbers = #tpu.dot_dimension_numbers<[1], [0], [0], [1], [0, 0, 1, 1], [], []>} : vector<8x64xf32>, vector<64x256xf32>, vector<8x256xf32> -> vector<8x256xf32>
    %15 = arith.index_cast %c0_i32 : i32 to index
    %c0_15 = arith.constant 0 : index
    %c0_16 = arith.constant 0 : index
    %16 = vector.load %arg10[%15, %c0_15, %c0_16] : memref<8x8x256xf32, #tpu.memory_space<vmem>>, vector<1x8x128xf32>
    %17 = vector.shape_cast %16 : vector<1x8x128xf32> to vector<8x128xf32>
    %18 = arith.index_cast %13 : i32 to index
    %c0_17 = arith.constant 0 : index
    %c128 = arith.constant 128 : index
    %19 = vector.load %arg10[%18, %c0_17, %c128] : memref<8x8x256xf32, #tpu.memory_space<vmem>>, vector<1x8x128xf32>
    %20 = vector.shape_cast %19 : vector<1x8x128xf32> to vector<8x128xf32>
    %21 = tpu.concatenate %17, %20 in 1 : vector<8x128xf32>, vector<8x128xf32> -> vector<8x256xf32>
    %22 = arith.addf %21, %14 : vector<8x256xf32>
    %23 = arith.negf %22 : vector<8x256xf32>
    %24 = math.exp %23 : vector<8x256xf32>
    %cst_18 = arith.constant 1.000000e+00 : f32
    %25 = vector.broadcast %cst_18 : f32 to vector<8x256xf32>
    %26 = arith.addf %25, %24 : vector<8x256xf32>
    %27 = arith.divf %25, %26 : vector<8x256xf32>
    %28 = math.tanh %22 : vector<8x256xf32>
    %29 = vector.extract_strided_slice %27 {offsets = [0, 32], sizes = [8, 32], strides = [1, 1]} : vector<8x256xf32> to vector<8x32xf32>
    %30 = arith.mulf %29, %11 : vector<8x32xf32>
    %31 = vector.extract_strided_slice %27 {offsets = [0, 0], sizes = [8, 32], strides = [1, 1]} : vector<8x256xf32> to vector<8x32xf32>
    %32 = vector.extract_strided_slice %28 {offsets = [0, 64], sizes = [8, 32], strides = [1, 1]} : vector<8x256xf32> to vector<8x32xf32>
    %33 = arith.mulf %31, %32 : vector<8x32xf32>
    %34 = arith.addf %30, %33 : vector<8x32xf32>
    %35 = vector.extract_strided_slice %27 {offsets = [0, 160], sizes = [8, 32], strides = [1, 1]} : vector<8x256xf32> to vector<8x32xf32>
    %36 = arith.mulf %35, %12 : vector<8x32xf32>
    %37 = vector.extract_strided_slice %27 {offsets = [0, 128], sizes = [8, 32], strides = [1, 1]} : vector<8x256xf32> to vector<8x32xf32>
    %38 = vector.extract_strided_slice %28 {offsets = [0, 192], sizes = [8, 32], strides = [1, 1]} : vector<8x256xf32> to vector<8x32xf32>
    %39 = arith.mulf %37, %38 : vector<8x32xf32>
    %40 = arith.addf %36, %39 : vector<8x32xf32>
    %41 = vector.extract_strided_slice %27 {offsets = [0, 96], sizes = [8, 32], strides = [1, 1]} : vector<8x256xf32> to vector<8x32xf32>
    %42 = math.tanh %34 : vector<8x32xf32>
    %43 = arith.mulf %41, %42 : vector<8x32xf32>
    %44 = vector.extract_strided_slice %27 {offsets = [0, 224], sizes = [8, 32], strides = [1, 1]} : vector<8x256xf32> to vector<8x32xf32>
    %45 = math.tanh %40 : vector<8x32xf32>
    %46 = arith.mulf %44, %45 : vector<8x32xf32>
    %47 = arith.index_cast %c0_i32 : i32 to index
    %c0_19 = arith.constant 0 : index
    %c0_20 = arith.constant 0 : index
    %48 = vector.load %arg11[%47, %c0_19, %c0_20] : memref<8x8x32xf32, #tpu.memory_space<vmem>>, vector<1x8x32xf32>
    %49 = vector.shape_cast %48 : vector<1x8x32xf32> to vector<8x32xf32>
    %50 = vector.shape_cast %43 : vector<8x32xf32> to vector<1x8x32xf32>
    tpu.vector_store %arg11[%47, %c0_19, %c0_20], %50 {strides = array<i32>} : memref<8x8x32xf32, #tpu.memory_space<vmem>>, vector<1x8x32xf32>,
    %51 = arith.index_cast %13 : i32 to index
    %c0_21 = arith.constant 0 : index
    %c0_22 = arith.constant 0 : index
    %52 = vector.load %arg12[%51, %c0_21, %c0_22] : memref<8x8x32xf32, #tpu.memory_space<vmem>>, vector<1x8x32xf32>
    %53 = vector.shape_cast %52 : vector<1x8x32xf32> to vector<8x32xf32>
    %54 = vector.shape_cast %46 : vector<8x32xf32> to vector<1x8x32xf32>
    tpu.vector_store %arg12[%51, %c0_21, %c0_22], %54 {strides = array<i32>} : memref<8x8x32xf32, #tpu.memory_space<vmem>>, vector<1x8x32xf32>,
    %55 = tpu.concatenate %43, %46 in 1 : vector<8x32xf32>, vector<8x32xf32> -> vector<8x64xf32>
    %c1_i32 = arith.constant 1 : i32
    %c7_i32_23 = arith.constant 7 : i32
    %56 = arith.subi %c7_i32_23, %c1_i32 : i32
    %cst_24 = arith.constant dense<0.000000e+00> : vector<8x256xf32>
    %57 = tpu.matmul %55, %9, %cst_24 {dimension_numbers = #tpu.dot_dimension_numbers<[1], [0], [0], [1], [0, 0, 1, 1], [], []>} : vector<8x64xf32>, vector<64x256xf32>, vector<8x256xf32> -> vector<8x256xf32>
    %58 = arith.index_cast %c1_i32 : i32 to index
    %c0_25 = arith.constant 0 : index
    %c0_26 = arith.constant 0 : index
    %59 = vector.load %arg10[%58, %c0_25, %c0_26] : memref<8x8x256xf32, #tpu.memory_space<vmem>>, vector<1x8x128xf32>
    %60 = vector.shape_cast %59 : vector<1x8x128xf32> to vector<8x128xf32>
    %61 = arith.index_cast %56 : i32 to index
    %c0_27 = arith.constant 0 : index
    %c128_28 = arith.constant 128 : index
    %62 = vector.load %arg10[%61, %c0_27, %c128_28] : memref<8x8x256xf32, #tpu.memory_space<vmem>>, vector<1x8x128xf32>
    %63 = vector.shape_cast %62 : vector<1x8x128xf32> to vector<8x128xf32>
    %64 = tpu.concatenate %60, %63 in 1 : vector<8x128xf32>, vector<8x128xf32> -> vector<8x256xf32>
    %65 = arith.addf %64, %57 : vector<8x256xf32>
    %66 = arith.negf %65 : vector<8x256xf32>
    %67 = math.exp %66 : vector<8x256xf32>
    %cst_29 = arith.constant 1.000000e+00 : f32
    %68 = vector.broadcast %cst_29 : f32 to vector<8x256xf32>
    %69 = arith.addf %68, %67 : vector<8x256xf32>
    %70 = arith.divf %68, %69 : vector<8x256xf32>
    %71 = math.tanh %65 : vector<8x256xf32>
    %72 = vector.extract_strided_slice %70 {offsets = [0, 32], sizes = [8, 32], strides = [1, 1]} : vector<8x256xf32> to vector<8x32xf32>
    %73 = arith.mulf %72, %34 : vector<8x32xf32>
    %74 = vector.extract_strided_slice %70 {offsets = [0, 0], sizes = [8, 32], strides = [1, 1]} : vector<8x256xf32> to vector<8x32xf32>
    %75 = vector.extract_strided_slice %71 {offsets = [0, 64], sizes = [8, 32], strides = [1, 1]} : vector<8x256xf32> to vector<8x32xf32>
    %76 = arith.mulf %74, %75 : vector<8x32xf32>
    %77 = arith.addf %73, %76 : vector<8x32xf32>
    %78 = vector.extract_strided_slice %70 {offsets = [0, 160], sizes = [8, 32], strides = [1, 1]} : vector<8x256xf32> to vector<8x32xf32>
    %79 = arith.mulf %78, %40 : vector<8x32xf32>
    %80 = vector.extract_strided_slice %70 {offsets = [0, 128], sizes = [8, 32], strides = [1, 1]} : vector<8x256xf32> to vector<8x32xf32>
    %81 = vector.extract_strided_slice %71 {offsets = [0, 192], sizes = [8, 32], strides = [1, 1]} : vector<8x256xf32> to vector<8x32xf32>
    %82 = arith.mulf %80, %81 : vector<8x32xf32>
    %83 = arith.addf %79, %82 : vector<8x32xf32>
    %84 = vector.extract_strided_slice %70 {offsets = [0, 96], sizes = [8, 32], strides = [1, 1]} : vector<8x256xf32> to vector<8x32xf32>
    %85 = math.tanh %77 : vector<8x32xf32>
    %86 = arith.mulf %84, %85 : vector<8x32xf32>
    %87 = vector.extract_strided_slice %70 {offsets = [0, 224], sizes = [8, 32], strides = [1, 1]} : vector<8x256xf32> to vector<8x32xf32>
    %88 = math.tanh %83 : vector<8x32xf32>
    %89 = arith.mulf %87, %88 : vector<8x32xf32>
    %90 = arith.index_cast %c1_i32 : i32 to index
    %c0_30 = arith.constant 0 : index
    %c0_31 = arith.constant 0 : index
    %91 = vector.load %arg11[%90, %c0_30, %c0_31] : memref<8x8x32xf32, #tpu.memory_space<vmem>>, vector<1x8x32xf32>
    %92 = vector.shape_cast %91 : vector<1x8x32xf32> to vector<8x32xf32>
    %93 = vector.shape_cast %86 : vector<8x32xf32> to vector<1x8x32xf32>
    tpu.vector_store %arg11[%90, %c0_30, %c0_31], %93 {strides = array<i32>} : memref<8x8x32xf32, #tpu.memory_space<vmem>>, vector<1x8x32xf32>,
    %94 = arith.index_cast %56 : i32 to index
    %c0_32 = arith.constant 0 : index
    %c0_33 = arith.constant 0 : index
    %95 = vector.load %arg12[%94, %c0_32, %c0_33] : memref<8x8x32xf32, #tpu.memory_space<vmem>>, vector<1x8x32xf32>
    %96 = vector.shape_cast %95 : vector<1x8x32xf32> to vector<8x32xf32>
    %97 = vector.shape_cast %89 : vector<8x32xf32> to vector<1x8x32xf32>
    tpu.vector_store %arg12[%94, %c0_32, %c0_33], %97 {strides = array<i32>} : memref<8x8x32xf32, #tpu.memory_space<vmem>>, vector<1x8x32xf32>,
    %98 = tpu.concatenate %86, %89 in 1 : vector<8x32xf32>, vector<8x32xf32> -> vector<8x64xf32>
    %c2_i32 = arith.constant 2 : i32
    %c7_i32_34 = arith.constant 7 : i32
    %99 = arith.subi %c7_i32_34, %c2_i32 : i32
    %cst_35 = arith.constant dense<0.000000e+00> : vector<8x256xf32>
    %100 = tpu.matmul %98, %9, %cst_35 {dimension_numbers = #tpu.dot_dimension_numbers<[1], [0], [0], [1], [0, 0, 1, 1], [], []>} : vector<8x64xf32>, vector<64x256xf32>, vector<8x256xf32> -> vector<8x256xf32>
    %101 = arith.index_cast %c2_i32 : i32 to index
    %c0_36 = arith.constant 0 : index
    %c0_37 = arith.constant 0 : index
    %102 = vector.load %arg10[%101, %c0_36, %c0_37] : memref<8x8x256xf32, #tpu.memory_space<vmem>>, vector<1x8x128xf32>
    %103 = vector.shape_cast %102 : vector<1x8x128xf32> to vector<8x128xf32>
    %104 = arith.index_cast %99 : i32 to index
    %c0_38 = arith.constant 0 : index
    %c128_39 = arith.constant 128 : index
    %105 = vector.load %arg10[%104, %c0_38, %c128_39] : memref<8x8x256xf32, #tpu.memory_space<vmem>>, vector<1x8x128xf32>
    %106 = vector.shape_cast %105 : vector<1x8x128xf32> to vector<8x128xf32>
    %107 = tpu.concatenate %103, %106 in 1 : vector<8x128xf32>, vector<8x128xf32> -> vector<8x256xf32>
    %108 = arith.addf %107, %100 : vector<8x256xf32>
    %109 = arith.negf %108 : vector<8x256xf32>
    %110 = math.exp %109 : vector<8x256xf32>
    %cst_40 = arith.constant 1.000000e+00 : f32
    %111 = vector.broadcast %cst_40 : f32 to vector<8x256xf32>
    %112 = arith.addf %111, %110 : vector<8x256xf32>
    %113 = arith.divf %111, %112 : vector<8x256xf32>
    %114 = math.tanh %108 : vector<8x256xf32>
    %115 = vector.extract_strided_slice %113 {offsets = [0, 32], sizes = [8, 32], strides = [1, 1]} : vector<8x256xf32> to vector<8x32xf32>
    %116 = arith.mulf %115, %77 : vector<8x32xf32>
    %117 = vector.extract_strided_slice %113 {offsets = [0, 0], sizes = [8, 32], strides = [1, 1]} : vector<8x256xf32> to vector<8x32xf32>
    %118 = vector.extract_strided_slice %114 {offsets = [0, 64], sizes = [8, 32], strides = [1, 1]} : vector<8x256xf32> to vector<8x32xf32>
    %119 = arith.mulf %117, %118 : vector<8x32xf32>
    %120 = arith.addf %116, %119 : vector<8x32xf32>
    %121 = vector.extract_strided_slice %113 {offsets = [0, 160], sizes = [8, 32], strides = [1, 1]} : vector<8x256xf32> to vector<8x32xf32>
    %122 = arith.mulf %121, %83 : vector<8x32xf32>
    %123 = vector.extract_strided_slice %113 {offsets = [0, 128], sizes = [8, 32], strides = [1, 1]} : vector<8x256xf32> to vector<8x32xf32>
    %124 = vector.extract_strided_slice %114 {offsets = [0, 192], sizes = [8, 32], strides = [1, 1]} : vector<8x256xf32> to vector<8x32xf32>
    %125 = arith.mulf %123, %124 : vector<8x32xf32>
    %126 = arith.addf %122, %125 : vector<8x32xf32>
    %127 = vector.extract_strided_slice %113 {offsets = [0, 96], sizes = [8, 32], strides = [1, 1]} : vector<8x256xf32> to vector<8x32xf32>
    %128 = math.tanh %120 : vector<8x32xf32>
    %129 = arith.mulf %127, %128 : vector<8x32xf32>
    %130 = vector.extract_strided_slice %113 {offsets = [0, 224], sizes = [8, 32], strides = [1, 1]} : vector<8x256xf32> to vector<8x32xf32>
    %131 = math.tanh %126 : vector<8x32xf32>
    %132 = arith.mulf %130, %131 : vector<8x32xf32>
    %133 = arith.index_cast %c2_i32 : i32 to index
    %c0_41 = arith.constant 0 : index
    %c0_42 = arith.constant 0 : index
    %134 = vector.load %arg11[%133, %c0_41, %c0_42] : memref<8x8x32xf32, #tpu.memory_space<vmem>>, vector<1x8x32xf32>
    %135 = vector.shape_cast %134 : vector<1x8x32xf32> to vector<8x32xf32>
    %136 = vector.shape_cast %129 : vector<8x32xf32> to vector<1x8x32xf32>
    tpu.vector_store %arg11[%133, %c0_41, %c0_42], %136 {strides = array<i32>} : memref<8x8x32xf32, #tpu.memory_space<vmem>>, vector<1x8x32xf32>,
    %137 = arith.index_cast %99 : i32 to index
    %c0_43 = arith.constant 0 : index
    %c0_44 = arith.constant 0 : index
    %138 = vector.load %arg12[%137, %c0_43, %c0_44] : memref<8x8x32xf32, #tpu.memory_space<vmem>>, vector<1x8x32xf32>
    %139 = vector.shape_cast %138 : vector<1x8x32xf32> to vector<8x32xf32>
    %140 = vector.shape_cast %132 : vector<8x32xf32> to vector<1x8x32xf32>
    tpu.vector_store %arg12[%137, %c0_43, %c0_44], %140 {strides = array<i32>} : memref<8x8x32xf32, #tpu.memory_space<vmem>>, vector<1x8x32xf32>,
    %141 = tpu.concatenate %129, %132 in 1 : vector<8x32xf32>, vector<8x32xf32> -> vector<8x64xf32>
    %c3_i32 = arith.constant 3 : i32
    %c7_i32_45 = arith.constant 7 : i32
    %142 = arith.subi %c7_i32_45, %c3_i32 : i32
    %cst_46 = arith.constant dense<0.000000e+00> : vector<8x256xf32>
    %143 = tpu.matmul %141, %9, %cst_46 {dimension_numbers = #tpu.dot_dimension_numbers<[1], [0], [0], [1], [0, 0, 1, 1], [], []>} : vector<8x64xf32>, vector<64x256xf32>, vector<8x256xf32> -> vector<8x256xf32>
    %144 = arith.index_cast %c3_i32 : i32 to index
    %c0_47 = arith.constant 0 : index
    %c0_48 = arith.constant 0 : index
    %145 = vector.load %arg10[%144, %c0_47, %c0_48] : memref<8x8x256xf32, #tpu.memory_space<vmem>>, vector<1x8x128xf32>
    %146 = vector.shape_cast %145 : vector<1x8x128xf32> to vector<8x128xf32>
    %147 = arith.index_cast %142 : i32 to index
    %c0_49 = arith.constant 0 : index
    %c128_50 = arith.constant 128 : index
    %148 = vector.load %arg10[%147, %c0_49, %c128_50] : memref<8x8x256xf32, #tpu.memory_space<vmem>>, vector<1x8x128xf32>
    %149 = vector.shape_cast %148 : vector<1x8x128xf32> to vector<8x128xf32>
    %150 = tpu.concatenate %146, %149 in 1 : vector<8x128xf32>, vector<8x128xf32> -> vector<8x256xf32>
    %151 = arith.addf %150, %143 : vector<8x256xf32>
    %152 = arith.negf %151 : vector<8x256xf32>
    %153 = math.exp %152 : vector<8x256xf32>
    %cst_51 = arith.constant 1.000000e+00 : f32
    %154 = vector.broadcast %cst_51 : f32 to vector<8x256xf32>
    %155 = arith.addf %154, %153 : vector<8x256xf32>
    %156 = arith.divf %154, %155 : vector<8x256xf32>
    %157 = math.tanh %151 : vector<8x256xf32>
    %158 = vector.extract_strided_slice %156 {offsets = [0, 32], sizes = [8, 32], strides = [1, 1]} : vector<8x256xf32> to vector<8x32xf32>
    %159 = arith.mulf %158, %120 : vector<8x32xf32>
    %160 = vector.extract_strided_slice %156 {offsets = [0, 0], sizes = [8, 32], strides = [1, 1]} : vector<8x256xf32> to vector<8x32xf32>
    %161 = vector.extract_strided_slice %157 {offsets = [0, 64], sizes = [8, 32], strides = [1, 1]} : vector<8x256xf32> to vector<8x32xf32>
    %162 = arith.mulf %160, %161 : vector<8x32xf32>
    %163 = arith.addf %159, %162 : vector<8x32xf32>
    %164 = vector.extract_strided_slice %156 {offsets = [0, 160], sizes = [8, 32], strides = [1, 1]} : vector<8x256xf32> to vector<8x32xf32>
    %165 = arith.mulf %164, %126 : vector<8x32xf32>
    %166 = vector.extract_strided_slice %156 {offsets = [0, 128], sizes = [8, 32], strides = [1, 1]} : vector<8x256xf32> to vector<8x32xf32>
    %167 = vector.extract_strided_slice %157 {offsets = [0, 192], sizes = [8, 32], strides = [1, 1]} : vector<8x256xf32> to vector<8x32xf32>
    %168 = arith.mulf %166, %167 : vector<8x32xf32>
    %169 = arith.addf %165, %168 : vector<8x32xf32>
    %170 = vector.extract_strided_slice %156 {offsets = [0, 96], sizes = [8, 32], strides = [1, 1]} : vector<8x256xf32> to vector<8x32xf32>
    %171 = math.tanh %163 : vector<8x32xf32>
    %172 = arith.mulf %170, %171 : vector<8x32xf32>
    %173 = vector.extract_strided_slice %156 {offsets = [0, 224], sizes = [8, 32], strides = [1, 1]} : vector<8x256xf32> to vector<8x32xf32>
    %174 = math.tanh %169 : vector<8x32xf32>
    %175 = arith.mulf %173, %174 : vector<8x32xf32>
    %176 = arith.index_cast %c3_i32 : i32 to index
    %c0_52 = arith.constant 0 : index
    %c0_53 = arith.constant 0 : index
    %177 = vector.load %arg11[%176, %c0_52, %c0_53] : memref<8x8x32xf32, #tpu.memory_space<vmem>>, vector<1x8x32xf32>
    %178 = vector.shape_cast %177 : vector<1x8x32xf32> to vector<8x32xf32>
    %179 = vector.shape_cast %172 : vector<8x32xf32> to vector<1x8x32xf32>
    tpu.vector_store %arg11[%176, %c0_52, %c0_53], %179 {strides = array<i32>} : memref<8x8x32xf32, #tpu.memory_space<vmem>>, vector<1x8x32xf32>,
    %180 = arith.index_cast %142 : i32 to index
    %c0_54 = arith.constant 0 : index
    %c0_55 = arith.constant 0 : index
    %181 = vector.load %arg12[%180, %c0_54, %c0_55] : memref<8x8x32xf32, #tpu.memory_space<vmem>>, vector<1x8x32xf32>
    %182 = vector.shape_cast %181 : vector<1x8x32xf32> to vector<8x32xf32>
    %183 = vector.shape_cast %175 : vector<8x32xf32> to vector<1x8x32xf32>
    tpu.vector_store %arg12[%180, %c0_54, %c0_55], %183 {strides = array<i32>} : memref<8x8x32xf32, #tpu.memory_space<vmem>>, vector<1x8x32xf32>,
    %184 = tpu.concatenate %172, %175 in 1 : vector<8x32xf32>, vector<8x32xf32> -> vector<8x64xf32>
    %c4_i32 = arith.constant 4 : i32
    %c7_i32_56 = arith.constant 7 : i32
    %185 = arith.subi %c7_i32_56, %c4_i32 : i32
    %cst_57 = arith.constant dense<0.000000e+00> : vector<8x256xf32>
    %186 = tpu.matmul %184, %9, %cst_57 {dimension_numbers = #tpu.dot_dimension_numbers<[1], [0], [0], [1], [0, 0, 1, 1], [], []>} : vector<8x64xf32>, vector<64x256xf32>, vector<8x256xf32> -> vector<8x256xf32>
    %187 = arith.index_cast %c4_i32 : i32 to index
    %c0_58 = arith.constant 0 : index
    %c0_59 = arith.constant 0 : index
    %188 = vector.load %arg10[%187, %c0_58, %c0_59] : memref<8x8x256xf32, #tpu.memory_space<vmem>>, vector<1x8x128xf32>
    %189 = vector.shape_cast %188 : vector<1x8x128xf32> to vector<8x128xf32>
    %190 = arith.index_cast %185 : i32 to index
    %c0_60 = arith.constant 0 : index
    %c128_61 = arith.constant 128 : index
    %191 = vector.load %arg10[%190, %c0_60, %c128_61] : memref<8x8x256xf32, #tpu.memory_space<vmem>>, vector<1x8x128xf32>
    %192 = vector.shape_cast %191 : vector<1x8x128xf32> to vector<8x128xf32>
    %193 = tpu.concatenate %189, %192 in 1 : vector<8x128xf32>, vector<8x128xf32> -> vector<8x256xf32>
    %194 = arith.addf %193, %186 : vector<8x256xf32>
    %195 = arith.negf %194 : vector<8x256xf32>
    %196 = math.exp %195 : vector<8x256xf32>
    %cst_62 = arith.constant 1.000000e+00 : f32
    %197 = vector.broadcast %cst_62 : f32 to vector<8x256xf32>
    %198 = arith.addf %197, %196 : vector<8x256xf32>
    %199 = arith.divf %197, %198 : vector<8x256xf32>
    %200 = math.tanh %194 : vector<8x256xf32>
    %201 = vector.extract_strided_slice %199 {offsets = [0, 32], sizes = [8, 32], strides = [1, 1]} : vector<8x256xf32> to vector<8x32xf32>
    %202 = arith.mulf %201, %163 : vector<8x32xf32>
    %203 = vector.extract_strided_slice %199 {offsets = [0, 0], sizes = [8, 32], strides = [1, 1]} : vector<8x256xf32> to vector<8x32xf32>
    %204 = vector.extract_strided_slice %200 {offsets = [0, 64], sizes = [8, 32], strides = [1, 1]} : vector<8x256xf32> to vector<8x32xf32>
    %205 = arith.mulf %203, %204 : vector<8x32xf32>
    %206 = arith.addf %202, %205 : vector<8x32xf32>
    %207 = vector.extract_strided_slice %199 {offsets = [0, 160], sizes = [8, 32], strides = [1, 1]} : vector<8x256xf32> to vector<8x32xf32>
    %208 = arith.mulf %207, %169 : vector<8x32xf32>
    %209 = vector.extract_strided_slice %199 {offsets = [0, 128], sizes = [8, 32], strides = [1, 1]} : vector<8x256xf32> to vector<8x32xf32>
    %210 = vector.extract_strided_slice %200 {offsets = [0, 192], sizes = [8, 32], strides = [1, 1]} : vector<8x256xf32> to vector<8x32xf32>
    %211 = arith.mulf %209, %210 : vector<8x32xf32>
    %212 = arith.addf %208, %211 : vector<8x32xf32>
    %213 = vector.extract_strided_slice %199 {offsets = [0, 96], sizes = [8, 32], strides = [1, 1]} : vector<8x256xf32> to vector<8x32xf32>
    %214 = math.tanh %206 : vector<8x32xf32>
    %215 = arith.mulf %213, %214 : vector<8x32xf32>
    %216 = vector.extract_strided_slice %199 {offsets = [0, 224], sizes = [8, 32], strides = [1, 1]} : vector<8x256xf32> to vector<8x32xf32>
    %217 = math.tanh %212 : vector<8x32xf32>
    %218 = arith.mulf %216, %217 : vector<8x32xf32>
    %219 = arith.index_cast %c4_i32 : i32 to index
    %c0_63 = arith.constant 0 : index
    %c0_64 = arith.constant 0 : index
    %220 = vector.load %arg11[%219, %c0_63, %c0_64] : memref<8x8x32xf32, #tpu.memory_space<vmem>>, vector<1x8x32xf32>
    %221 = vector.shape_cast %220 : vector<1x8x32xf32> to vector<8x32xf32>
    %222 = vector.shape_cast %215 : vector<8x32xf32> to vector<1x8x32xf32>
    tpu.vector_store %arg11[%219, %c0_63, %c0_64], %222 {strides = array<i32>} : memref<8x8x32xf32, #tpu.memory_space<vmem>>, vector<1x8x32xf32>,
    %223 = arith.index_cast %185 : i32 to index
    %c0_65 = arith.constant 0 : index
    %c0_66 = arith.constant 0 : index
    %224 = vector.load %arg12[%223, %c0_65, %c0_66] : memref<8x8x32xf32, #tpu.memory_space<vmem>>, vector<1x8x32xf32>
    %225 = vector.shape_cast %224 : vector<1x8x32xf32> to vector<8x32xf32>
    %226 = vector.shape_cast %218 : vector<8x32xf32> to vector<1x8x32xf32>
    tpu.vector_store %arg12[%223, %c0_65, %c0_66], %226 {strides = array<i32>} : memref<8x8x32xf32, #tpu.memory_space<vmem>>, vector<1x8x32xf32>,
    %227 = tpu.concatenate %215, %218 in 1 : vector<8x32xf32>, vector<8x32xf32> -> vector<8x64xf32>
    %c5_i32 = arith.constant 5 : i32
    %c7_i32_67 = arith.constant 7 : i32
    %228 = arith.subi %c7_i32_67, %c5_i32 : i32
    %cst_68 = arith.constant dense<0.000000e+00> : vector<8x256xf32>
    %229 = tpu.matmul %227, %9, %cst_68 {dimension_numbers = #tpu.dot_dimension_numbers<[1], [0], [0], [1], [0, 0, 1, 1], [], []>} : vector<8x64xf32>, vector<64x256xf32>, vector<8x256xf32> -> vector<8x256xf32>
    %230 = arith.index_cast %c5_i32 : i32 to index
    %c0_69 = arith.constant 0 : index
    %c0_70 = arith.constant 0 : index
    %231 = vector.load %arg10[%230, %c0_69, %c0_70] : memref<8x8x256xf32, #tpu.memory_space<vmem>>, vector<1x8x128xf32>
    %232 = vector.shape_cast %231 : vector<1x8x128xf32> to vector<8x128xf32>
    %233 = arith.index_cast %228 : i32 to index
    %c0_71 = arith.constant 0 : index
    %c128_72 = arith.constant 128 : index
    %234 = vector.load %arg10[%233, %c0_71, %c128_72] : memref<8x8x256xf32, #tpu.memory_space<vmem>>, vector<1x8x128xf32>
    %235 = vector.shape_cast %234 : vector<1x8x128xf32> to vector<8x128xf32>
    %236 = tpu.concatenate %232, %235 in 1 : vector<8x128xf32>, vector<8x128xf32> -> vector<8x256xf32>
    %237 = arith.addf %236, %229 : vector<8x256xf32>
    %238 = arith.negf %237 : vector<8x256xf32>
    %239 = math.exp %238 : vector<8x256xf32>
    %cst_73 = arith.constant 1.000000e+00 : f32
    %240 = vector.broadcast %cst_73 : f32 to vector<8x256xf32>
    %241 = arith.addf %240, %239 : vector<8x256xf32>
    %242 = arith.divf %240, %241 : vector<8x256xf32>
    %243 = math.tanh %237 : vector<8x256xf32>
    %244 = vector.extract_strided_slice %242 {offsets = [0, 32], sizes = [8, 32], strides = [1, 1]} : vector<8x256xf32> to vector<8x32xf32>
    %245 = arith.mulf %244, %206 : vector<8x32xf32>
    %246 = vector.extract_strided_slice %242 {offsets = [0, 0], sizes = [8, 32], strides = [1, 1]} : vector<8x256xf32> to vector<8x32xf32>
    %247 = vector.extract_strided_slice %243 {offsets = [0, 64], sizes = [8, 32], strides = [1, 1]} : vector<8x256xf32> to vector<8x32xf32>
    %248 = arith.mulf %246, %247 : vector<8x32xf32>
    %249 = arith.addf %245, %248 : vector<8x32xf32>
    %250 = vector.extract_strided_slice %242 {offsets = [0, 160], sizes = [8, 32], strides = [1, 1]} : vector<8x256xf32> to vector<8x32xf32>
    %251 = arith.mulf %250, %212 : vector<8x32xf32>
    %252 = vector.extract_strided_slice %242 {offsets = [0, 128], sizes = [8, 32], strides = [1, 1]} : vector<8x256xf32> to vector<8x32xf32>
    %253 = vector.extract_strided_slice %243 {offsets = [0, 192], sizes = [8, 32], strides = [1, 1]} : vector<8x256xf32> to vector<8x32xf32>
    %254 = arith.mulf %252, %253 : vector<8x32xf32>
    %255 = arith.addf %251, %254 : vector<8x32xf32>
    %256 = vector.extract_strided_slice %242 {offsets = [0, 96], sizes = [8, 32], strides = [1, 1]} : vector<8x256xf32> to vector<8x32xf32>
    %257 = math.tanh %249 : vector<8x32xf32>
    %258 = arith.mulf %256, %257 : vector<8x32xf32>
    %259 = vector.extract_strided_slice %242 {offsets = [0, 224], sizes = [8, 32], strides = [1, 1]} : vector<8x256xf32> to vector<8x32xf32>
    %260 = math.tanh %255 : vector<8x32xf32>
    %261 = arith.mulf %259, %260 : vector<8x32xf32>
    %262 = arith.index_cast %c5_i32 : i32 to index
    %c0_74 = arith.constant 0 : index
    %c0_75 = arith.constant 0 : index
    %263 = vector.load %arg11[%262, %c0_74, %c0_75] : memref<8x8x32xf32, #tpu.memory_space<vmem>>, vector<1x8x32xf32>
    %264 = vector.shape_cast %263 : vector<1x8x32xf32> to vector<8x32xf32>
    %265 = vector.shape_cast %258 : vector<8x32xf32> to vector<1x8x32xf32>
    tpu.vector_store %arg11[%262, %c0_74, %c0_75], %265 {strides = array<i32>} : memref<8x8x32xf32, #tpu.memory_space<vmem>>, vector<1x8x32xf32>,
    %266 = arith.index_cast %228 : i32 to index
    %c0_76 = arith.constant 0 : index
    %c0_77 = arith.constant 0 : index
    %267 = vector.load %arg12[%266, %c0_76, %c0_77] : memref<8x8x32xf32, #tpu.memory_space<vmem>>, vector<1x8x32xf32>
    %268 = vector.shape_cast %267 : vector<1x8x32xf32> to vector<8x32xf32>
    %269 = vector.shape_cast %261 : vector<8x32xf32> to vector<1x8x32xf32>
    tpu.vector_store %arg12[%266, %c0_76, %c0_77], %269 {strides = array<i32>} : memref<8x8x32xf32, #tpu.memory_space<vmem>>, vector<1x8x32xf32>,
    %270 = tpu.concatenate %258, %261 in 1 : vector<8x32xf32>, vector<8x32xf32> -> vector<8x64xf32>
    %c6_i32 = arith.constant 6 : i32
    %c7_i32_78 = arith.constant 7 : i32
    %271 = arith.subi %c7_i32_78, %c6_i32 : i32
    %cst_79 = arith.constant dense<0.000000e+00> : vector<8x256xf32>
    %272 = tpu.matmul %270, %9, %cst_79 {dimension_numbers = #tpu.dot_dimension_numbers<[1], [0], [0], [1], [0, 0, 1, 1], [], []>} : vector<8x64xf32>, vector<64x256xf32>, vector<8x256xf32> -> vector<8x256xf32>
    %273 = arith.index_cast %c6_i32 : i32 to index
    %c0_80 = arith.constant 0 : index
    %c0_81 = arith.constant 0 : index
    %274 = vector.load %arg10[%273, %c0_80, %c0_81] : memref<8x8x256xf32, #tpu.memory_space<vmem>>, vector<1x8x128xf32>
    %275 = vector.shape_cast %274 : vector<1x8x128xf32> to vector<8x128xf32>
    %276 = arith.index_cast %271 : i32 to index
    %c0_82 = arith.constant 0 : index
    %c128_83 = arith.constant 128 : index
    %277 = vector.load %arg10[%276, %c0_82, %c128_83] : memref<8x8x256xf32, #tpu.memory_space<vmem>>, vector<1x8x128xf32>
    %278 = vector.shape_cast %277 : vector<1x8x128xf32> to vector<8x128xf32>
    %279 = tpu.concatenate %275, %278 in 1 : vector<8x128xf32>, vector<8x128xf32> -> vector<8x256xf32>
    %280 = arith.addf %279, %272 : vector<8x256xf32>
    %281 = arith.negf %280 : vector<8x256xf32>
    %282 = math.exp %281 : vector<8x256xf32>
    %cst_84 = arith.constant 1.000000e+00 : f32
    %283 = vector.broadcast %cst_84 : f32 to vector<8x256xf32>
    %284 = arith.addf %283, %282 : vector<8x256xf32>
    %285 = arith.divf %283, %284 : vector<8x256xf32>
    %286 = math.tanh %280 : vector<8x256xf32>
    %287 = vector.extract_strided_slice %285 {offsets = [0, 32], sizes = [8, 32], strides = [1, 1]} : vector<8x256xf32> to vector<8x32xf32>
    %288 = arith.mulf %287, %249 : vector<8x32xf32>
    %289 = vector.extract_strided_slice %285 {offsets = [0, 0], sizes = [8, 32], strides = [1, 1]} : vector<8x256xf32> to vector<8x32xf32>
    %290 = vector.extract_strided_slice %286 {offsets = [0, 64], sizes = [8, 32], strides = [1, 1]} : vector<8x256xf32> to vector<8x32xf32>
    %291 = arith.mulf %289, %290 : vector<8x32xf32>
    %292 = arith.addf %288, %291 : vector<8x32xf32>
    %293 = vector.extract_strided_slice %285 {offsets = [0, 160], sizes = [8, 32], strides = [1, 1]} : vector<8x256xf32> to vector<8x32xf32>
    %294 = arith.mulf %293, %255 : vector<8x32xf32>
    %295 = vector.extract_strided_slice %285 {offsets = [0, 128], sizes = [8, 32], strides = [1, 1]} : vector<8x256xf32> to vector<8x32xf32>
    %296 = vector.extract_strided_slice %286 {offsets = [0, 192], sizes = [8, 32], strides = [1, 1]} : vector<8x256xf32> to vector<8x32xf32>
    %297 = arith.mulf %295, %296 : vector<8x32xf32>
    %298 = arith.addf %294, %297 : vector<8x32xf32>
    %299 = vector.extract_strided_slice %285 {offsets = [0, 96], sizes = [8, 32], strides = [1, 1]} : vector<8x256xf32> to vector<8x32xf32>
    %300 = math.tanh %292 : vector<8x32xf32>
    %301 = arith.mulf %299, %300 : vector<8x32xf32>
    %302 = vector.extract_strided_slice %285 {offsets = [0, 224], sizes = [8, 32], strides = [1, 1]} : vector<8x256xf32> to vector<8x32xf32>
    %303 = math.tanh %298 : vector<8x32xf32>
    %304 = arith.mulf %302, %303 : vector<8x32xf32>
    %305 = arith.index_cast %c6_i32 : i32 to index
    %c0_85 = arith.constant 0 : index
    %c0_86 = arith.constant 0 : index
    %306 = vector.load %arg11[%305, %c0_85, %c0_86] : memref<8x8x32xf32, #tpu.memory_space<vmem>>, vector<1x8x32xf32>
    %307 = vector.shape_cast %306 : vector<1x8x32xf32> to vector<8x32xf32>
    %308 = vector.shape_cast %301 : vector<8x32xf32> to vector<1x8x32xf32>
    tpu.vector_store %arg11[%305, %c0_85, %c0_86], %308 {strides = array<i32>} : memref<8x8x32xf32, #tpu.memory_space<vmem>>, vector<1x8x32xf32>,
    %309 = arith.index_cast %271 : i32 to index
    %c0_87 = arith.constant 0 : index
    %c0_88 = arith.constant 0 : index
    %310 = vector.load %arg12[%309, %c0_87, %c0_88] : memref<8x8x32xf32, #tpu.memory_space<vmem>>, vector<1x8x32xf32>
    %311 = vector.shape_cast %310 : vector<1x8x32xf32> to vector<8x32xf32>
    %312 = vector.shape_cast %304 : vector<8x32xf32> to vector<1x8x32xf32>
    tpu.vector_store %arg12[%309, %c0_87, %c0_88], %312 {strides = array<i32>} : memref<8x8x32xf32, #tpu.memory_space<vmem>>, vector<1x8x32xf32>,
    %313 = tpu.concatenate %301, %304 in 1 : vector<8x32xf32>, vector<8x32xf32> -> vector<8x64xf32>
    %c7_i32_89 = arith.constant 7 : i32
    %c7_i32_90 = arith.constant 7 : i32
    %314 = arith.subi %c7_i32_90, %c7_i32_89 : i32
    %cst_91 = arith.constant dense<0.000000e+00> : vector<8x256xf32>
    %315 = tpu.matmul %313, %9, %cst_91 {dimension_numbers = #tpu.dot_dimension_numbers<[1], [0], [0], [1], [0, 0, 1, 1], [], []>} : vector<8x64xf32>, vector<64x256xf32>, vector<8x256xf32> -> vector<8x256xf32>
    %316 = arith.index_cast %c7_i32_89 : i32 to index
    %c0_92 = arith.constant 0 : index
    %c0_93 = arith.constant 0 : index
    %317 = vector.load %arg10[%316, %c0_92, %c0_93] : memref<8x8x256xf32, #tpu.memory_space<vmem>>, vector<1x8x128xf32>
    %318 = vector.shape_cast %317 : vector<1x8x128xf32> to vector<8x128xf32>
    %319 = arith.index_cast %314 : i32 to index
    %c0_94 = arith.constant 0 : index
    %c128_95 = arith.constant 128 : index
    %320 = vector.load %arg10[%319, %c0_94, %c128_95] : memref<8x8x256xf32, #tpu.memory_space<vmem>>, vector<1x8x128xf32>
    %321 = vector.shape_cast %320 : vector<1x8x128xf32> to vector<8x128xf32>
    %322 = tpu.concatenate %318, %321 in 1 : vector<8x128xf32>, vector<8x128xf32> -> vector<8x256xf32>
    %323 = arith.addf %322, %315 : vector<8x256xf32>
    %324 = arith.negf %323 : vector<8x256xf32>
    %325 = math.exp %324 : vector<8x256xf32>
    %cst_96 = arith.constant 1.000000e+00 : f32
    %326 = vector.broadcast %cst_96 : f32 to vector<8x256xf32>
    %327 = arith.addf %326, %325 : vector<8x256xf32>
    %328 = arith.divf %326, %327 : vector<8x256xf32>
    %329 = math.tanh %323 : vector<8x256xf32>
    %330 = vector.extract_strided_slice %328 {offsets = [0, 32], sizes = [8, 32], strides = [1, 1]} : vector<8x256xf32> to vector<8x32xf32>
    %331 = arith.mulf %330, %292 : vector<8x32xf32>
    %332 = vector.extract_strided_slice %328 {offsets = [0, 0], sizes = [8, 32], strides = [1, 1]} : vector<8x256xf32> to vector<8x32xf32>
    %333 = vector.extract_strided_slice %329 {offsets = [0, 64], sizes = [8, 32], strides = [1, 1]} : vector<8x256xf32> to vector<8x32xf32>
    %334 = arith.mulf %332, %333 : vector<8x32xf32>
    %335 = arith.addf %331, %334 : vector<8x32xf32>
    %336 = vector.extract_strided_slice %328 {offsets = [0, 160], sizes = [8, 32], strides = [1, 1]} : vector<8x256xf32> to vector<8x32xf32>
    %337 = arith.mulf %336, %298 : vector<8x32xf32>
    %338 = vector.extract_strided_slice %328 {offsets = [0, 128], sizes = [8, 32], strides = [1, 1]} : vector<8x256xf32> to vector<8x32xf32>
    %339 = vector.extract_strided_slice %329 {offsets = [0, 192], sizes = [8, 32], strides = [1, 1]} : vector<8x256xf32> to vector<8x32xf32>
    %340 = arith.mulf %338, %339 : vector<8x32xf32>
    %341 = arith.addf %337, %340 : vector<8x32xf32>
    %342 = vector.extract_strided_slice %328 {offsets = [0, 96], sizes = [8, 32], strides = [1, 1]} : vector<8x256xf32> to vector<8x32xf32>
    %343 = math.tanh %335 : vector<8x32xf32>
    %344 = arith.mulf %342, %343 : vector<8x32xf32>
    %345 = vector.extract_strided_slice %328 {offsets = [0, 224], sizes = [8, 32], strides = [1, 1]} : vector<8x256xf32> to vector<8x32xf32>
    %346 = math.tanh %341 : vector<8x32xf32>
    %347 = arith.mulf %345, %346 : vector<8x32xf32>
    %348 = arith.index_cast %c7_i32_89 : i32 to index
    %c0_97 = arith.constant 0 : index
    %c0_98 = arith.constant 0 : index
    %349 = vector.load %arg11[%348, %c0_97, %c0_98] : memref<8x8x32xf32, #tpu.memory_space<vmem>>, vector<1x8x32xf32>
    %350 = vector.shape_cast %349 : vector<1x8x32xf32> to vector<8x32xf32>
    %351 = vector.shape_cast %344 : vector<8x32xf32> to vector<1x8x32xf32>
    tpu.vector_store %arg11[%348, %c0_97, %c0_98], %351 {strides = array<i32>} : memref<8x8x32xf32, #tpu.memory_space<vmem>>, vector<1x8x32xf32>,
    %352 = arith.index_cast %314 : i32 to index
    %c0_99 = arith.constant 0 : index
    %c0_100 = arith.constant 0 : index
    %353 = vector.load %arg12[%352, %c0_99, %c0_100] : memref<8x8x32xf32, #tpu.memory_space<vmem>>, vector<1x8x32xf32>
    %354 = vector.shape_cast %353 : vector<1x8x32xf32> to vector<8x32xf32>
    %355 = vector.shape_cast %347 : vector<8x32xf32> to vector<1x8x32xf32>
    tpu.vector_store %arg12[%352, %c0_99, %c0_100], %355 {strides = array<i32>} : memref<8x8x32xf32, #tpu.memory_space<vmem>>, vector<1x8x32xf32>,
    %356 = tpu.concatenate %344, %347 in 1 : vector<8x32xf32>, vector<8x32xf32> -> vector<8x64xf32>
    %c8_i32 = arith.constant 8 : i32
    %c0_101 = arith.constant 0 : index
    %c0_102 = arith.constant 0 : index
    %c0_103 = arith.constant 0 : index
    %357 = vector.load %arg4[%c0_101, %c0_102, %c0_103] : memref<2x32x256xf32, #tpu.memory_space<vmem>>, vector<2x32x256xf32>
    %c0_104 = arith.constant 0 : index
    %c0_105 = arith.constant 0 : index
    %c0_106 = arith.constant 0 : index
    %358 = vector.load %arg11[%c0_104, %c0_105, %c0_106] : memref<8x8x32xf32, #tpu.memory_space<vmem>>, vector<8x8x32xf32>
    %359 = vector.shape_cast %358 : vector<8x8x32xf32> to vector<64x32xf32>
    %360 = vector.extract_strided_slice %357 {offsets = [0, 0, 0], sizes = [1, 32, 256], strides = [1, 1, 1]} : vector<2x32x256xf32> to vector<1x32x256xf32>
    %361 = vector.shape_cast %360 : vector<1x32x256xf32> to vector<32x256xf32>
    %cst_107 = arith.constant dense<0.000000e+00> : vector<64x256xf32>
    %362 = tpu.matmul %359, %361, %cst_107 {dimension_numbers = #tpu.dot_dimension_numbers<[1], [0], [0], [1], [0, 0, 1, 1], [], []>} : vector<64x32xf32>, vector<32x256xf32>, vector<64x256xf32> -> vector<64x256xf32>
    %c0_108 = arith.constant 0 : index
    %c0_109 = arith.constant 0 : index
    %c0_110 = arith.constant 0 : index
    %363 = vector.load %arg12[%c0_108, %c0_109, %c0_110] : memref<8x8x32xf32, #tpu.memory_space<vmem>>, vector<8x8x32xf32>
    %364 = vector.shape_cast %363 : vector<8x8x32xf32> to vector<64x32xf32>
    %365 = vector.extract_strided_slice %357 {offsets = [1, 0, 0], sizes = [1, 32, 256], strides = [1, 1, 1]} : vector<2x32x256xf32> to vector<1x32x256xf32>
    %366 = vector.shape_cast %365 : vector<1x32x256xf32> to vector<32x256xf32>
    %cst_111 = arith.constant dense<0.000000e+00> : vector<64x256xf32>
    %367 = tpu.matmul %364, %366, %cst_111 {dimension_numbers = #tpu.dot_dimension_numbers<[1], [0], [0], [1], [0, 0, 1, 1], [], []>} : vector<64x32xf32>, vector<32x256xf32>, vector<64x256xf32> -> vector<64x256xf32>
    %368 = arith.addf %362, %367 : vector<64x256xf32>
    %c0_112 = arith.constant 0 : index
    %c0_113 = arith.constant 0 : index
    %369 = vector.load %arg6[%c0_112, %c0_113] : memref<1x256xf32, #tpu.memory_space<vmem>>, vector<1x256xf32>
    %370 = vector.broadcast %369 : vector<1x256xf32> to vector<64x256xf32>
    %371 = arith.addf %368, %370 : vector<64x256xf32>
    %372 = vector.shape_cast %371 : vector<64x256xf32> to vector<8x8x256xf32>
    %c0_114 = arith.constant 0 : index
    %c0_115 = arith.constant 0 : index
    %c0_116 = arith.constant 0 : index
    %373 = vector.load %arg10[%c0_114, %c0_115, %c0_116] : memref<8x8x256xf32, #tpu.memory_space<vmem>>, vector<8x8x256xf32>
    tpu.vector_store %arg10[%c0_114, %c0_115, %c0_116], %372 {strides = array<i32>} : memref<8x8x256xf32, #tpu.memory_space<vmem>>, vector<8x8x256xf32>,
    %c0_117 = arith.constant 0 : index
    %c0_118 = arith.constant 0 : index
    %374 = vector.load %arg5[%c0_117, %c0_118] : memref<64x256xf32, #tpu.memory_space<vmem>>, vector<64x256xf32>
    %375 = vector.extract_strided_slice %374 {offsets = [0, 0], sizes = [32, 128], strides = [1, 1]} : vector<64x256xf32> to vector<32x128xf32>
    %cst_119 = arith.constant 0.000000e+00 : f32
    %376 = vector.broadcast %cst_119 : f32 to vector<8x32xf32>
    %cst_120 = arith.constant 0.000000e+00 : f32
    %377 = vector.broadcast %cst_120 : f32 to vector<8x32xf32>
    %c0_i32_121 = arith.constant 0 : i32
    %378 = arith.index_cast %c0_i32_121 : i32 to index
    %c0_122 = arith.constant 0 : index
    %c0_123 = arith.constant 0 : index
    %379 = vector.load %arg10[%378, %c0_122, %c0_123] : memref<8x8x256xf32, #tpu.memory_space<vmem>>, vector<1x8x128xf32>
    %380 = vector.shape_cast %379 : vector<1x8x128xf32> to vector<8x128xf32>
    %cst_124 = arith.constant dense<0.000000e+00> : vector<8x128xf32>
    %381 = tpu.matmul %376, %375, %cst_124 {dimension_numbers = #tpu.dot_dimension_numbers<[1], [0], [0], [1], [0, 0, 1, 1], [], []>} : vector<8x32xf32>, vector<32x128xf32>, vector<8x128xf32> -> vector<8x128xf32>
    %382 = arith.addf %380, %381 : vector<8x128xf32>
    %383 = arith.negf %382 : vector<8x128xf32>
    %384 = math.exp %383 : vector<8x128xf32>
    %cst_125 = arith.constant 1.000000e+00 : f32
    %385 = vector.broadcast %cst_125 : f32 to vector<8x128xf32>
    %386 = arith.addf %385, %384 : vector<8x128xf32>
    %387 = arith.divf %385, %386 : vector<8x128xf32>
    %388 = math.tanh %382 : vector<8x128xf32>
    %389 = vector.extract_strided_slice %387 {offsets = [0, 32], sizes = [8, 32], strides = [1, 1]} : vector<8x128xf32> to vector<8x32xf32>
    %390 = arith.mulf %389, %377 : vector<8x32xf32>
    %391 = vector.extract_strided_slice %387 {offsets = [0, 0], sizes = [8, 32], strides = [1, 1]} : vector<8x128xf32> to vector<8x32xf32>
    %392 = vector.extract_strided_slice %388 {offsets = [0, 64], sizes = [8, 32], strides = [1, 1]} : vector<8x128xf32> to vector<8x32xf32>
    %393 = arith.mulf %391, %392 : vector<8x32xf32>
    %394 = arith.addf %390, %393 : vector<8x32xf32>
    %395 = vector.extract_strided_slice %387 {offsets = [0, 96], sizes = [8, 32], strides = [1, 1]} : vector<8x128xf32> to vector<8x32xf32>
    %396 = math.tanh %394 : vector<8x32xf32>
    %397 = arith.mulf %395, %396 : vector<8x32xf32>
    %c1_i32_126 = arith.constant 1 : i32
    %398 = arith.index_cast %c1_i32_126 : i32 to index
    %c0_127 = arith.constant 0 : index
    %c0_128 = arith.constant 0 : index
    %399 = vector.load %arg10[%398, %c0_127, %c0_128] : memref<8x8x256xf32, #tpu.memory_space<vmem>>, vector<1x8x128xf32>
    %400 = vector.shape_cast %399 : vector<1x8x128xf32> to vector<8x128xf32>
    %cst_129 = arith.constant dense<0.000000e+00> : vector<8x128xf32>
    %401 = tpu.matmul %397, %375, %cst_129 {dimension_numbers = #tpu.dot_dimension_numbers<[1], [0], [0], [1], [0, 0, 1, 1], [], []>} : vector<8x32xf32>, vector<32x128xf32>, vector<8x128xf32> -> vector<8x128xf32>
    %402 = arith.addf %400, %401 : vector<8x128xf32>
    %403 = arith.negf %402 : vector<8x128xf32>
    %404 = math.exp %403 : vector<8x128xf32>
    %cst_130 = arith.constant 1.000000e+00 : f32
    %405 = vector.broadcast %cst_130 : f32 to vector<8x128xf32>
    %406 = arith.addf %405, %404 : vector<8x128xf32>
    %407 = arith.divf %405, %406 : vector<8x128xf32>
    %408 = math.tanh %402 : vector<8x128xf32>
    %409 = vector.extract_strided_slice %407 {offsets = [0, 32], sizes = [8, 32], strides = [1, 1]} : vector<8x128xf32> to vector<8x32xf32>
    %410 = arith.mulf %409, %394 : vector<8x32xf32>
    %411 = vector.extract_strided_slice %407 {offsets = [0, 0], sizes = [8, 32], strides = [1, 1]} : vector<8x128xf32> to vector<8x32xf32>
    %412 = vector.extract_strided_slice %408 {offsets = [0, 64], sizes = [8, 32], strides = [1, 1]} : vector<8x128xf32> to vector<8x32xf32>
    %413 = arith.mulf %411, %412 : vector<8x32xf32>
    %414 = arith.addf %410, %413 : vector<8x32xf32>
    %415 = vector.extract_strided_slice %407 {offsets = [0, 96], sizes = [8, 32], strides = [1, 1]} : vector<8x128xf32> to vector<8x32xf32>
    %416 = math.tanh %414 : vector<8x32xf32>
    %417 = arith.mulf %415, %416 : vector<8x32xf32>
    %c2_i32_131 = arith.constant 2 : i32
    %418 = arith.index_cast %c2_i32_131 : i32 to index
    %c0_132 = arith.constant 0 : index
    %c0_133 = arith.constant 0 : index
    %419 = vector.load %arg10[%418, %c0_132, %c0_133] : memref<8x8x256xf32, #tpu.memory_space<vmem>>, vector<1x8x128xf32>
    %420 = vector.shape_cast %419 : vector<1x8x128xf32> to vector<8x128xf32>
    %cst_134 = arith.constant dense<0.000000e+00> : vector<8x128xf32>
    %421 = tpu.matmul %417, %375, %cst_134 {dimension_numbers = #tpu.dot_dimension_numbers<[1], [0], [0], [1], [0, 0, 1, 1], [], []>} : vector<8x32xf32>, vector<32x128xf32>, vector<8x128xf32> -> vector<8x128xf32>
    %422 = arith.addf %420, %421 : vector<8x128xf32>
    %423 = arith.negf %422 : vector<8x128xf32>
    %424 = math.exp %423 : vector<8x128xf32>
    %cst_135 = arith.constant 1.000000e+00 : f32
    %425 = vector.broadcast %cst_135 : f32 to vector<8x128xf32>
    %426 = arith.addf %425, %424 : vector<8x128xf32>
    %427 = arith.divf %425, %426 : vector<8x128xf32>
    %428 = math.tanh %422 : vector<8x128xf32>
    %429 = vector.extract_strided_slice %427 {offsets = [0, 32], sizes = [8, 32], strides = [1, 1]} : vector<8x128xf32> to vector<8x32xf32>
    %430 = arith.mulf %429, %414 : vector<8x32xf32>
    %431 = vector.extract_strided_slice %427 {offsets = [0, 0], sizes = [8, 32], strides = [1, 1]} : vector<8x128xf32> to vector<8x32xf32>
    %432 = vector.extract_strided_slice %428 {offsets = [0, 64], sizes = [8, 32], strides = [1, 1]} : vector<8x128xf32> to vector<8x32xf32>
    %433 = arith.mulf %431, %432 : vector<8x32xf32>
    %434 = arith.addf %430, %433 : vector<8x32xf32>
    %435 = vector.extract_strided_slice %427 {offsets = [0, 96], sizes = [8, 32], strides = [1, 1]} : vector<8x128xf32> to vector<8x32xf32>
    %436 = math.tanh %434 : vector<8x32xf32>
    %437 = arith.mulf %435, %436 : vector<8x32xf32>
    %c3_i32_136 = arith.constant 3 : i32
    %438 = arith.index_cast %c3_i32_136 : i32 to index
    %c0_137 = arith.constant 0 : index
    %c0_138 = arith.constant 0 : index
    %439 = vector.load %arg10[%438, %c0_137, %c0_138] : memref<8x8x256xf32, #tpu.memory_space<vmem>>, vector<1x8x128xf32>
    %440 = vector.shape_cast %439 : vector<1x8x128xf32> to vector<8x128xf32>
    %cst_139 = arith.constant dense<0.000000e+00> : vector<8x128xf32>
    %441 = tpu.matmul %437, %375, %cst_139 {dimension_numbers = #tpu.dot_dimension_numbers<[1], [0], [0], [1], [0, 0, 1, 1], [], []>} : vector<8x32xf32>, vector<32x128xf32>, vector<8x128xf32> -> vector<8x128xf32>
    %442 = arith.addf %440, %441 : vector<8x128xf32>
    %443 = arith.negf %442 : vector<8x128xf32>
    %444 = math.exp %443 : vector<8x128xf32>
    %cst_140 = arith.constant 1.000000e+00 : f32
    %445 = vector.broadcast %cst_140 : f32 to vector<8x128xf32>
    %446 = arith.addf %445, %444 : vector<8x128xf32>
    %447 = arith.divf %445, %446 : vector<8x128xf32>
    %448 = math.tanh %442 : vector<8x128xf32>
    %449 = vector.extract_strided_slice %447 {offsets = [0, 32], sizes = [8, 32], strides = [1, 1]} : vector<8x128xf32> to vector<8x32xf32>
    %450 = arith.mulf %449, %434 : vector<8x32xf32>
    %451 = vector.extract_strided_slice %447 {offsets = [0, 0], sizes = [8, 32], strides = [1, 1]} : vector<8x128xf32> to vector<8x32xf32>
    %452 = vector.extract_strided_slice %448 {offsets = [0, 64], sizes = [8, 32], strides = [1, 1]} : vector<8x128xf32> to vector<8x32xf32>
    %453 = arith.mulf %451, %452 : vector<8x32xf32>
    %454 = arith.addf %450, %453 : vector<8x32xf32>
    %455 = vector.extract_strided_slice %447 {offsets = [0, 96], sizes = [8, 32], strides = [1, 1]} : vector<8x128xf32> to vector<8x32xf32>
    %456 = math.tanh %454 : vector<8x32xf32>
    %457 = arith.mulf %455, %456 : vector<8x32xf32>
    %c4_i32_141 = arith.constant 4 : i32
    %458 = arith.index_cast %c4_i32_141 : i32 to index
    %c0_142 = arith.constant 0 : index
    %c0_143 = arith.constant 0 : index
    %459 = vector.load %arg10[%458, %c0_142, %c0_143] : memref<8x8x256xf32, #tpu.memory_space<vmem>>, vector<1x8x128xf32>
    %460 = vector.shape_cast %459 : vector<1x8x128xf32> to vector<8x128xf32>
    %cst_144 = arith.constant dense<0.000000e+00> : vector<8x128xf32>
    %461 = tpu.matmul %457, %375, %cst_144 {dimension_numbers = #tpu.dot_dimension_numbers<[1], [0], [0], [1], [0, 0, 1, 1], [], []>} : vector<8x32xf32>, vector<32x128xf32>, vector<8x128xf32> -> vector<8x128xf32>
    %462 = arith.addf %460, %461 : vector<8x128xf32>
    %463 = arith.negf %462 : vector<8x128xf32>
    %464 = math.exp %463 : vector<8x128xf32>
    %cst_145 = arith.constant 1.000000e+00 : f32
    %465 = vector.broadcast %cst_145 : f32 to vector<8x128xf32>
    %466 = arith.addf %465, %464 : vector<8x128xf32>
    %467 = arith.divf %465, %466 : vector<8x128xf32>
    %468 = math.tanh %462 : vector<8x128xf32>
    %469 = vector.extract_strided_slice %467 {offsets = [0, 32], sizes = [8, 32], strides = [1, 1]} : vector<8x128xf32> to vector<8x32xf32>
    %470 = arith.mulf %469, %454 : vector<8x32xf32>
    %471 = vector.extract_strided_slice %467 {offsets = [0, 0], sizes = [8, 32], strides = [1, 1]} : vector<8x128xf32> to vector<8x32xf32>
    %472 = vector.extract_strided_slice %468 {offsets = [0, 64], sizes = [8, 32], strides = [1, 1]} : vector<8x128xf32> to vector<8x32xf32>
    %473 = arith.mulf %471, %472 : vector<8x32xf32>
    %474 = arith.addf %470, %473 : vector<8x32xf32>
    %475 = vector.extract_strided_slice %467 {offsets = [0, 96], sizes = [8, 32], strides = [1, 1]} : vector<8x128xf32> to vector<8x32xf32>
    %476 = math.tanh %474 : vector<8x32xf32>
    %477 = arith.mulf %475, %476 : vector<8x32xf32>
    %c5_i32_146 = arith.constant 5 : i32
    %478 = arith.index_cast %c5_i32_146 : i32 to index
    %c0_147 = arith.constant 0 : index
    %c0_148 = arith.constant 0 : index
    %479 = vector.load %arg10[%478, %c0_147, %c0_148] : memref<8x8x256xf32, #tpu.memory_space<vmem>>, vector<1x8x128xf32>
    %480 = vector.shape_cast %479 : vector<1x8x128xf32> to vector<8x128xf32>
    %cst_149 = arith.constant dense<0.000000e+00> : vector<8x128xf32>
    %481 = tpu.matmul %477, %375, %cst_149 {dimension_numbers = #tpu.dot_dimension_numbers<[1], [0], [0], [1], [0, 0, 1, 1], [], []>} : vector<8x32xf32>, vector<32x128xf32>, vector<8x128xf32> -> vector<8x128xf32>
    %482 = arith.addf %480, %481 : vector<8x128xf32>
    %483 = arith.negf %482 : vector<8x128xf32>
    %484 = math.exp %483 : vector<8x128xf32>
    %cst_150 = arith.constant 1.000000e+00 : f32
    %485 = vector.broadcast %cst_150 : f32 to vector<8x128xf32>
    %486 = arith.addf %485, %484 : vector<8x128xf32>
    %487 = arith.divf %485, %486 : vector<8x128xf32>
    %488 = math.tanh %482 : vector<8x128xf32>
    %489 = vector.extract_strided_slice %487 {offsets = [0, 32], sizes = [8, 32], strides = [1, 1]} : vector<8x128xf32> to vector<8x32xf32>
    %490 = arith.mulf %489, %474 : vector<8x32xf32>
    %491 = vector.extract_strided_slice %487 {offsets = [0, 0], sizes = [8, 32], strides = [1, 1]} : vector<8x128xf32> to vector<8x32xf32>
    %492 = vector.extract_strided_slice %488 {offsets = [0, 64], sizes = [8, 32], strides = [1, 1]} : vector<8x128xf32> to vector<8x32xf32>
    %493 = arith.mulf %491, %492 : vector<8x32xf32>
    %494 = arith.addf %490, %493 : vector<8x32xf32>
    %495 = vector.extract_strided_slice %487 {offsets = [0, 96], sizes = [8, 32], strides = [1, 1]} : vector<8x128xf32> to vector<8x32xf32>
    %496 = math.tanh %494 : vector<8x32xf32>
    %497 = arith.mulf %495, %496 : vector<8x32xf32>
    %c6_i32_151 = arith.constant 6 : i32
    %498 = arith.index_cast %c6_i32_151 : i32 to index
    %c0_152 = arith.constant 0 : index
    %c0_153 = arith.constant 0 : index
    %499 = vector.load %arg10[%498, %c0_152, %c0_153] : memref<8x8x256xf32, #tpu.memory_space<vmem>>, vector<1x8x128xf32>
    %500 = vector.shape_cast %499 : vector<1x8x128xf32> to vector<8x128xf32>
    %cst_154 = arith.constant dense<0.000000e+00> : vector<8x128xf32>
    %501 = tpu.matmul %497, %375, %cst_154 {dimension_numbers = #tpu.dot_dimension_numbers<[1], [0], [0], [1], [0, 0, 1, 1], [], []>} : vector<8x32xf32>, vector<32x128xf32>, vector<8x128xf32> -> vector<8x128xf32>
    %502 = arith.addf %500, %501 : vector<8x128xf32>
    %503 = arith.negf %502 : vector<8x128xf32>
    %504 = math.exp %503 : vector<8x128xf32>
    %cst_155 = arith.constant 1.000000e+00 : f32
    %505 = vector.broadcast %cst_155 : f32 to vector<8x128xf32>
    %506 = arith.addf %505, %504 : vector<8x128xf32>
    %507 = arith.divf %505, %506 : vector<8x128xf32>
    %508 = math.tanh %502 : vector<8x128xf32>
    %509 = vector.extract_strided_slice %507 {offsets = [0, 32], sizes = [8, 32], strides = [1, 1]} : vector<8x128xf32> to vector<8x32xf32>
    %510 = arith.mulf %509, %494 : vector<8x32xf32>
    %511 = vector.extract_strided_slice %507 {offsets = [0, 0], sizes = [8, 32], strides = [1, 1]} : vector<8x128xf32> to vector<8x32xf32>
    %512 = vector.extract_strided_slice %508 {offsets = [0, 64], sizes = [8, 32], strides = [1, 1]} : vector<8x128xf32> to vector<8x32xf32>
    %513 = arith.mulf %511, %512 : vector<8x32xf32>
    %514 = arith.addf %510, %513 : vector<8x32xf32>
    %515 = vector.extract_strided_slice %507 {offsets = [0, 96], sizes = [8, 32], strides = [1, 1]} : vector<8x128xf32> to vector<8x32xf32>
    %516 = math.tanh %514 : vector<8x32xf32>
    %517 = arith.mulf %515, %516 : vector<8x32xf32>
    %c7_i32_156 = arith.constant 7 : i32
    %518 = arith.index_cast %c7_i32_156 : i32 to index
    %c0_157 = arith.constant 0 : index
    %c0_158 = arith.constant 0 : index
    %519 = vector.load %arg10[%518, %c0_157, %c0_158] : memref<8x8x256xf32, #tpu.memory_space<vmem>>, vector<1x8x128xf32>
    %520 = vector.shape_cast %519 : vector<1x8x128xf32> to vector<8x128xf32>
    %cst_159 = arith.constant dense<0.000000e+00> : vector<8x128xf32>
    %521 = tpu.matmul %517, %375, %cst_159 {dimension_numbers = #tpu.dot_dimension_numbers<[1], [0], [0], [1], [0, 0, 1, 1], [], []>} : vector<8x32xf32>, vector<32x128xf32>, vector<8x128xf32> -> vector<8x128xf32>
    %522 = arith.addf %520, %521 : vector<8x128xf32>
    %523 = arith.negf %522 : vector<8x128xf32>
    %524 = math.exp %523 : vector<8x128xf32>
    %cst_160 = arith.constant 1.000000e+00 : f32
    %525 = vector.broadcast %cst_160 : f32 to vector<8x128xf32>
    %526 = arith.addf %525, %524 : vector<8x128xf32>
    %527 = arith.divf %525, %526 : vector<8x128xf32>
    %528 = math.tanh %522 : vector<8x128xf32>
    %529 = vector.extract_strided_slice %527 {offsets = [0, 32], sizes = [8, 32], strides = [1, 1]} : vector<8x128xf32> to vector<8x32xf32>
    %530 = arith.mulf %529, %514 : vector<8x32xf32>
    %531 = vector.extract_strided_slice %527 {offsets = [0, 0], sizes = [8, 32], strides = [1, 1]} : vector<8x128xf32> to vector<8x32xf32>
    %532 = vector.extract_strided_slice %528 {offsets = [0, 64], sizes = [8, 32], strides = [1, 1]} : vector<8x128xf32> to vector<8x32xf32>
    %533 = arith.mulf %531, %532 : vector<8x32xf32>
    %534 = arith.addf %530, %533 : vector<8x32xf32>
    %535 = vector.extract_strided_slice %527 {offsets = [0, 96], sizes = [8, 32], strides = [1, 1]} : vector<8x128xf32> to vector<8x32xf32>
    %536 = math.tanh %534 : vector<8x32xf32>
    %537 = arith.mulf %535, %536 : vector<8x32xf32>
    %c8_i32_161 = arith.constant 8 : i32
    %c7 = arith.constant 7 : index
    %c0_162 = arith.constant 0 : index
    %c128_163 = arith.constant 128 : index
    %538 = vector.load %arg10[%c7, %c0_162, %c128_163] : memref<8x8x256xf32, #tpu.memory_space<vmem>>, vector<1x8x128xf32>
    %539 = vector.shape_cast %538 : vector<1x8x128xf32> to vector<8x128xf32>
    %540 = arith.negf %539 : vector<8x128xf32>
    %541 = math.exp %540 : vector<8x128xf32>
    %cst_164 = arith.constant 1.000000e+00 : f32
    %542 = vector.broadcast %cst_164 : f32 to vector<8x128xf32>
    %543 = arith.addf %542, %541 : vector<8x128xf32>
    %544 = arith.divf %542, %543 : vector<8x128xf32>
    %545 = math.tanh %539 : vector<8x128xf32>
    %546 = vector.extract_strided_slice %544 {offsets = [0, 0], sizes = [8, 32], strides = [1, 1]} : vector<8x128xf32> to vector<8x32xf32>
    %547 = vector.extract_strided_slice %545 {offsets = [0, 64], sizes = [8, 32], strides = [1, 1]} : vector<8x128xf32> to vector<8x32xf32>
    %548 = arith.mulf %546, %547 : vector<8x32xf32>
    %549 = vector.extract_strided_slice %544 {offsets = [0, 96], sizes = [8, 32], strides = [1, 1]} : vector<8x128xf32> to vector<8x32xf32>
    %550 = math.tanh %548 : vector<8x32xf32>
    %551 = arith.mulf %549, %550 : vector<8x32xf32>
    %c0_165 = arith.constant 0 : index
    %c0_166 = arith.constant 0 : index
    %552 = vector.load %arg7[%c0_165, %c0_166] : memref<64x4xf32, #tpu.memory_space<vmem>>, vector<64x4xf32>
    %553 = vector.extract_strided_slice %552 {offsets = [0, 0], sizes = [32, 4], strides = [1, 1]} : vector<64x4xf32> to vector<32x4xf32>
    %cst_167 = arith.constant dense<0.000000e+00> : vector<8x4xf32>
    %554 = tpu.matmul %537, %553, %cst_167 {dimension_numbers = #tpu.dot_dimension_numbers<[1], [0], [0], [1], [0, 0, 1, 1], [], []>} : vector<8x32xf32>, vector<32x4xf32>, vector<8x4xf32> -> vector<8x4xf32>
    %555 = vector.extract_strided_slice %552 {offsets = [32, 0], sizes = [32, 4], strides = [1, 1]} : vector<64x4xf32> to vector<32x4xf32>
    %cst_168 = arith.constant dense<0.000000e+00> : vector<8x4xf32>
    %556 = tpu.matmul %551, %555, %cst_168 {dimension_numbers = #tpu.dot_dimension_numbers<[1], [0], [0], [1], [0, 0, 1, 1], [], []>} : vector<8x32xf32>, vector<32x4xf32>, vector<8x4xf32> -> vector<8x4xf32>
    %557 = arith.addf %554, %556 : vector<8x4xf32>
    %c0_169 = arith.constant 0 : index
    %c0_170 = arith.constant 0 : index
    %558 = vector.load %arg8[%c0_169, %c0_170] : memref<1x4xf32, #tpu.memory_space<vmem>>, vector<1x4xf32>
    %559 = vector.broadcast %558 : vector<1x4xf32> to vector<8x4xf32>
    %560 = arith.addf %557, %559 : vector<8x4xf32>
    %c0_171 = arith.constant 0 : index
    %c0_172 = arith.constant 0 : index
    %561 = vector.load %arg9[%c0_171, %c0_172] : memref<8x4xf32, #tpu.memory_space<vmem>>, vector<8x4xf32>
    tpu.vector_store %arg9[%c0_171, %c0_172], %560 {strides = array<i32>} : memref<8x4xf32, #tpu.memory_space<vmem>>, vector<8x4xf32>,
    return
  }
}

</mosaic_0001>

<bundles_post_ra>
// kernel: birnn_forward.1
= control target key start
LH: loop header
LB: loop body
LE: loop exit
PB: predicated region body
PF: predicated region fallthrough
CT: control target
= control target key end

     0   :  { %14 = vsyncpa [#allocation6], 0  ;;  %s3343_s0 = inlined_call_operand.vmem [shape: f32[8,8,16], index: 0, kind: input, shape index: {}]   ;;  %s3344_s1 = inlined_call_operand.vmem [shape: f32[16,256], index: 1, kind: input, shape index: {}]   ;;  %s3345_s2 = inlined_call_operand.vmem [shape: f32[64,256], index: 2, kind: input, shape index: {}]   ;;  %s3346_s3 = inlined_call_operand.vmem [shape: f32[1,256], index: 3, kind: input, shape index: {}]   ;;  %s3347_s4 = inlined_call_operand.hbm [shape: f32[2,32,256], index: 4, kind: input, shape index: {}]   ;;  %s3348_s5 = inlined_call_operand.hbm [shape: f32[64,256], index: 5, kind: input, shape index: {}]   ;;  %s3349_s6 = inlined_call_operand.vmem [shape: f32[1,256], index: 6, kind: input, shape index: {}]   ;;  %s3350_s7 = inlined_call_operand.vmem [shape: f32[64,4], index: 7, kind: input, shape index: {}]   ;;  %s3351_s8 = inlined_call_operand.vmem [shape: f32[1,4], index: 8, kind: input, shape index: {}]   ;;  %s3352_s9 = inlined_call_operand.vmem [shape: f32[8,4], index: 9, kind: output, shape index: {}]  }
   0x1   :  { %s28_s11 = sshll.u32 %s3347_s4, 4  ;;  %s29_s11 = int_to_ptr.hbm [resolvable:$true] %s28_s11 }
   0x2   :  { %15 = vsyncpa [#allocation8], 0  ;;  %s2575_s12 = smov [#allocation5]   ;;  %s41_s16 = sshll.u32 %s3348_s5, 4  ;;  %s42_s16 = int_to_ptr.hbm [resolvable:$true] %s41_s16 }
   0x3   :  { %s30_s13 = sshll.u32 %s2575_s12, 4  ;;  %s2576_s17 = smov 256   ;;  %s31_s13 = int_to_ptr.vmem [resolvable:$true] %s30_s13 }
   0x4   :  { %s2577_s18 = smov 16   ;;  %s2578_s19 = smov [#allocation7]  }
   0x5   :  { %36 = dma.hbm_to_vmem [thread:$0]  %s29_s11, 2048, %s31_s13, [#allocation6], %s2576_s17, %s2576_s17, %s2577_s18  }
   0x6   :  { %s43_s20 = sshll.u32 %s2578_s19, 4  ;;  %s44_s20 = int_to_ptr.vmem [resolvable:$true] %s43_s20 }
   0x7   :  { %49 = dma.hbm_to_vmem [thread:$0]  %s42_s16, 2048, %s44_s20, [#allocation8], %s2576_s17, %s2576_s17, %s2577_s18  }
   0x8   :  { %2571 = dma.done.wait [#allocation6], 2048  }
   0x9   :  { %2572 = vsyncadd [#allocation6], 4294965248 }
   0xa   :  { %2573 = dma.done.wait [#allocation8], 2048  }
   0xb   :  { %2574 = vsyncadd [#allocation8], 4294965248  ;;  %v75_v0 = vld [vmem:[%s3344_s1 + $0x18] sm:$0xff]  ;;  %v2645_v1 = vld [vmem:[%s3345_s2 + $0x70] sm:$0xff]  ;;  %vm82_vm0 = vcmask 130048   ;;  %v2579_v19 = vmov 0.0  }
   0xc   :  { %v73_v2 = vld [vmem:[%s3344_s1 + $0x8] sm:$0xff]  ;;  %162 = vmatpush.msra.mxu1 %v75_v0  ;;  %233 = vmatpush.msra.mxu2 %v2645_v1  ;;  %v2654_v3 = vld [vmem:[%s3345_s2 + $0x60] sm:$0xff]  ;;  %v2662_v5 = vld [vmem:[%s3345_s2 + $0x50] sm:$0xff]  ;;  %vm348_vm9 = vcmask 261120   ;;  %vm221_vm10 = vcmask 523264  }
   0xd   :  { %v64_v4 = vld [vmem:[%s3343_s0] sm:$0xff]  ;;  %v74_v7 = vld [vmem:[%s3344_s1 + $0x10] sm:$0xff]  ;;  %v2681_v9 = vld [vmem:[%s3345_s2 + $0x78] sm:$0xff] }
   0xe   :  { %163 = vmatpush.msra.mxu1 %v73_v2  ;;  %234 = vmatpush.msra.mxu2 %v2654_v3  ;;  %v2669_v6 = vld [vmem:[%s3345_s2 + $0x40] sm:$0xff]  ;;  %v2686_v10 = vld [vmem:[%s3345_s2 + $0x30] sm:$0xff]  ;;  %v2692_v11 = vld [vmem:[%s3345_s2 + $0x68] sm:$0xff] }
   0xf   :  { %2226 = vmatmul.msk.f32.vlgmr.msra.gmra.mxu1 %vm82_vm0, %v64_v4  ;;  %v72_v8 = vld [vmem:[%s3344_s1] sm:$0xff]  ;;  %121 = vmatpush.msra.mxu0 %v74_v7  ;;  %v65_v13 = vld [vmem:[%s3343_s0 + $0x8] sm:$0xff]  ;;  %v2711_v14 = vld [vmem:[%s3345_s2 + $0x10] sm:$0xff] }
  0x10   :  { %235 = vmatpush.msra.mxu2 %v2662_v5  ;;  %253 = vmatpush.msra.mxu3 %v2681_v9  ;;  %v2699_v12 = vld [vmem:[%s3345_s2 + $0x20] sm:$0xff]  ;;  %v2724_v16 = vld [vmem:[%s3345_s2 + $0x58] sm:$0xff]  ;;  %v2729_v17 = vld [vmem:[%s3345_s2 + $0x48] sm:$0xff] }
  0x11   :  { %808 = vmatpush.msrb.mxu1 %v2681_v9  ;;  %122 = vmatpush.msra.mxu0 %v72_v8  ;;  %v2719_v15 = vld [vmem:[%s3345_s2] sm:$0xff]  ;;  %v2737_v18 = vld [vmem:[%s3345_s2 + $0x38] sm:$0xff]  ;;  %v2747_v20 = vld [vmem:[%s3345_s2 + $0x28] sm:$0xff] }
  0x12   :  { %236 = vmatpush.msra.mxu2 %v2669_v6  ;;  %2218 = vmatmul.msk.f32.vlgmr.msra.gmra.mxu0 %vm82_vm0, %v64_v4  ;;  %v66_v21 = vld [vmem:[%s3343_s0 + $0x10] sm:$0xff]  ;;  %v2763_v22 = vld [vmem:[%s3345_s2 + $0x18] sm:$0xff]  ;;  %v2768_v23 = vld [vmem:[%s3345_s2 + $0x8] sm:$0xff] }
  0x13   :  { %254 = vmatpush.msra.mxu3 %v2692_v11  ;;  %809 = vmatpush.msrb.mxu1 %v2692_v11  ;;  %v67_v24 = vld [vmem:[%s3343_s0 + $0x18] sm:$0xff]  ;;  %v68_v25 = vld [vmem:[%s3343_s0 + $0x20] sm:$0xff]  ;;  %v69_v26 = vld [vmem:[%s3343_s0 + $0x28] sm:$0xff] }
  0x14   :  { %237 = vmatpush.msra.mxu2 %v2686_v10  ;;  %788 = vmatpush.msrb.mxu0 %v2645_v1  ;;  %v70_v27 = vld [vmem:[%s3343_s0 + $0x30] sm:$0xff]  ;;  %v71_v28 = vld [vmem:[%s3343_s0 + $0x38] sm:$0xff]  ;;  %v76_v29 = vld [vmem:[%s3346_s3] sm:$0x3]  ;;  %s2580_s0 = smov 64   ;;  %s2581_s3 = smov 32  }
  0x15   :  { %255 = vmatpush.msra.mxu3 %v2724_v16  ;;  %810 = vmatpush.msrb.mxu1 %v2724_v16  ;;  %v79_v30 = vperm.slane %v76_v29, 1  ;;  %v2860_v35 = vperm.slane %v76_v29, 0 }
  0x16   :  { %238 = vmatpush.msra.mxu2 %v2699_v12  ;;  %789 = vmatpush.msrb.mxu0 %v2654_v3 }
  0x17   :  { %2227 = vmatmul.msk.f32.gmra.mxu1 %vm82_vm0, %v65_v13  ;;  %256 = vmatpush.msra.mxu3 %v2729_v17 }
  0x18   :  { %239 = vmatpush.msra.mxu2 %v2711_v14  ;;  %790 = vmatpush.msrb.mxu0 %v2662_v5 }
  0x19   :  { %257 = vmatpush.msra.mxu3 %v2737_v18  ;;  %811 = vmatpush.msrb.mxu1 %v2729_v17 }
  0x1a   :  { %240 = vmatpush.msra.mxu2 %v2719_v15  ;;  %2219 = vmatmul.msk.f32.gmra.mxu0 %vm82_vm0, %v65_v13 }
  0x1b   :  { %241 = vmatmul.f32.vlgmr.msra.gmra.mxu2 %v2579_v19  ;;  %791 = vmatpush.msrb.mxu0 %v2669_v6 }
  0x1c   :  { %371 = vmatpush.msrb.mxu2 %v2645_v1  ;;  %258 = vmatpush.msra.mxu3 %v2747_v20 }
  0x1d   :  { %792 = vmatpush.msrb.mxu0 %v2686_v10  ;;  %812 = vmatpush.msrb.mxu1 %v2737_v18 }
  0x1e   :  { %372 = vmatpush.msrb.mxu2 %v2654_v3  ;;  %259 = vmatpush.msra.mxu3 %v2763_v22 }
  0x1f   :  { %2228 = vmatmul.msk.f32.gmra.mxu1 %vm82_vm0, %v66_v21  ;;  %793 = vmatpush.msrb.mxu0 %v2699_v12 }
  0x20   :  { %373 = vmatpush.msrb.mxu2 %v2662_v5  ;;  %260 = vmatpush.msra.mxu3 %v2768_v23 }
  0x21   :  { %261 = vmatmul.f32.vlgmr.msra.gmra.mxu3 %v2579_v19  ;;  %813 = vmatpush.msrb.mxu1 %v2747_v20 }
  0x22   :  { %374 = vmatpush.msrb.mxu2 %v2669_v6  ;;  %2220 = vmatmul.msk.f32.gmra.mxu0 %vm82_vm0, %v66_v21 }
  0x23   :  { %391 = vmatpush.msrb.mxu3 %v2681_v9  ;;  %794 = vmatpush.msrb.mxu0 %v2711_v14 }
  0x24   :  { %375 = vmatpush.msrb.mxu2 %v2686_v10  ;;  %814 = vmatpush.msrb.mxu1 %v2763_v22 }
  0x25   :  { %392 = vmatpush.msrb.mxu3 %v2692_v11  ;;  %795 = vmatpush.msrb.mxu0 %v2719_v15 }
  0x26   :  { %376 = vmatpush.msrb.mxu2 %v2699_v12  ;;  %815 = vmatpush.msrb.mxu1 %v2768_v23 }
  0x27   :  { %2229 = vmatmul.msk.f32.gmra.mxu1 %vm82_vm0, %v67_v24  ;;  %393 = vmatpush.msrb.mxu3 %v2724_v16 }
  0x28   :  { %377 = vmatpush.msrb.mxu2 %v2711_v14  ;;  %1062 = vmatpush.msra.mxu0 %v2645_v1 }
  0x29   :  { %394 = vmatpush.msrb.mxu3 %v2729_v17  ;;  %1082 = vmatpush.msra.mxu1 %v2681_v9 }
  0x2a   :  { %378 = vmatpush.msrb.mxu2 %v2719_v15  ;;  %2221 = vmatmul.msk.f32.gmra.mxu0 %vm82_vm0, %v67_v24 }
  0x2b   :  { %395 = vmatpush.msrb.mxu3 %v2737_v18  ;;  %1063 = vmatpush.msra.mxu0 %v2654_v3 }
  0x2c   :  { %510 = vmatpush.msra.mxu2 %v2645_v1  ;;  %1083 = vmatpush.msra.mxu1 %v2692_v11 }
  0x2d   :  { %396 = vmatpush.msrb.mxu3 %v2747_v20  ;;  %1064 = vmatpush.msra.mxu0 %v2662_v5 }
  0x2e   :  { %511 = vmatpush.msra.mxu2 %v2654_v3  ;;  %1084 = vmatpush.msra.mxu1 %v2724_v16 }
  0x2f   :  { %2230 = vmatmul.msk.f32.gmra.mxu1 %vm82_vm0, %v68_v25  ;;  %397 = vmatpush.msrb.mxu3 %v2763_v22 }
  0x30   :  { %512 = vmatpush.msra.mxu2 %v2662_v5  ;;  %1085 = vmatpush.msra.mxu1 %v2729_v17 }
  0x31   :  { %398 = vmatpush.msrb.mxu3 %v2768_v23  ;;  %1065 = vmatpush.msra.mxu0 %v2669_v6 }
  0x32   :  { %513 = vmatpush.msra.mxu2 %v2669_v6  ;;  %2222 = vmatmul.msk.f32.gmra.mxu0 %vm82_vm0, %v68_v25 }
  0x33   :  { %530 = vmatpush.msra.mxu3 %v2681_v9  ;;  %1086 = vmatpush.msra.mxu1 %v2737_v18 }
  0x34   :  { %514 = vmatpush.msra.mxu2 %v2686_v10  ;;  %1066 = vmatpush.msra.mxu0 %v2686_v10 }
  0x35   :  { %531 = vmatpush.msra.mxu3 %v2692_v11  ;;  %1087 = vmatpush.msra.mxu1 %v2747_v20 }
  0x36   :  { %515 = vmatpush.msra.mxu2 %v2699_v12  ;;  %1067 = vmatpush.msra.mxu0 %v2699_v12 }
  0x37   :  { %2231 = vmatmul.msk.f32.gmra.mxu1 %vm82_vm0, %v69_v26  ;;  %532 = vmatpush.msra.mxu3 %v2724_v16 }
  0x38   :  { %516 = vmatpush.msra.mxu2 %v2711_v14  ;;  %1088 = vmatpush.msra.mxu1 %v2763_v22 }
  0x39   :  { %533 = vmatpush.msra.mxu3 %v2729_v17  ;;  %1068 = vmatpush.msra.mxu0 %v2711_v14 }
  0x3a   :  { %517 = vmatpush.msra.mxu2 %v2719_v15  ;;  %2223 = vmatmul.msk.f32.gmra.mxu0 %vm82_vm0, %v69_v26 }
  0x3b   :  { %534 = vmatpush.msra.mxu3 %v2737_v18  ;;  %1089 = vmatpush.msra.mxu1 %v2768_v23 }
  0x3c   :  { %1069 = vmatpush.msra.mxu0 %v2719_v15 }
  0x3d   :  { %535 = vmatpush.msra.mxu3 %v2747_v20 }
  0x3f   :  { %2232 = vmatmul.msk.f32.gmra.mxu1 %vm82_vm0, %v70_v27  ;;  %536 = vmatpush.msra.mxu3 %v2763_v22 }
  0x41   :  { %537 = vmatpush.msra.mxu3 %v2768_v23 }
  0x42   :  { %2224 = vmatmul.msk.f32.gmra.mxu0 %vm82_vm0, %v70_v27 }
  0x47   :  { %2233 = vmatmul.msk.f32.gmra.mxu1 %vm82_vm0, %v71_v28 }
  0x4a   :  { %2225 = vmatmul.msk.f32.gmra.mxu0 %vm82_vm0, %v71_v28 }
  0x8c   :  { %v165_v31 = vpop.f32.mrf.mxu1 }
  0x8d   :  { %v2856_v32 = vadd.f32 %v165_v31, %v79_v30 }
  0x8f   :  { %v124_v36 = vpop.f32.mrf.mxu0 }
  0x90   :  { %v125_v37 = vadd.f32 %v124_v36, %v2860_v35 }
  0x94   :  { %v168_v33 = vpop.f32.mrf.mxu1 }
  0x95   :  { %v2858_v34 = vadd.f32 %v168_v33, %v79_v30 }
  0x9c   :  { %v171_v38 = vpop.f32.mrf.mxu1 }
  0x9d   :  { %v2863_v39 = vadd.f32 %v171_v38, %v79_v30 }
  0x9e   :  { %v242_v40 = vpop.f32.mrf.mxu2 }
  0x9f   :  { %v268_v41 = vadd.f32 %v242_v40, %v125_v37 }
  0xa1   :  { %2323 = vtanh.f32 %v268_v41  ;;  %v2234_v56 = vmul.f32 -1.442695, %v268_v41 }
  0xa4   :  { %v174_v42 = vpop.f32.mrf.mxu1  ;;  %v262_v52 = vpop.f32.mrf.mxu3 }
  0xa5   :  { %v2865_v43 = vadd.f32 %v174_v42, %v79_v30 }
  0xa7   :  { %v2324_v44 = vpop.eup %2323 }
  0xa8   :  { %312 = vrot.lane.b32.xlu0 %v2324_v44, %s2580_s0 }
  0xac   :  { %v177_v45 = vpop.f32.mrf.mxu1 }
  0xad   :  { %v2868_v46 = vadd.f32 %v177_v45, %v79_v30 }
  0xb4   :  { %v180_v47 = vpop.f32.mrf.mxu1 }
  0xb5   :  { %v2870_v48 = vadd.f32 %v180_v47, %v79_v30 }
  0xbc   :  { %v183_v49 = vpop.f32.mrf.mxu1 }
  0xbd   :  { %v2872_v50 = vadd.f32 %v183_v49, %v79_v30 }
  0xc4   :  { %v186_v51 = vpop.f32.mrf.mxu1 }
  0xc5   :  { %v187_v53 = vadd.f32 %v186_v51, %v79_v30 }
  0xc7   :  { %v269_v54 = vadd.f32 %v262_v52, %v187_v53 }
  0xc9   :  { %2325 = vtanh.f32 %v269_v54  ;;  %v2235_v4 = vmul.f32 -1.442695, %v269_v54 }
  0xca   :  { %2327 = vpow2.f32 %v2234_v56 }
  0xcf   :  { %v2326_v55 = vpop.eup %2325 }
  0xd0   :  { %323 = vrot.lane.b32.xlu0 %v2326_v55, %s2580_s0  ;;  %v2328_v57 = vpop.eup %2327 }
  0xd1   :  { %v276_v58 = vadd.f32 1.0, %v2328_v57 }
  0xd3   :  { %2329 = vrcp.f32 %v276_v58  ;;  %vm283_vm1 = vweird.f32 %v276_v58  ;;  %v289_v63 = vand.u32 2147483648, %v276_v58  ;;  %v287_v2 = vand.u32 2147483647, %v276_v58 }
  0xd4   :  { %2331 = vpow2.f32 %v2235_v4 }
  0xd5   :  { %v290_v7 = vor.u32 1.1754944e-38, %v289_v63  ;;  %vm288_vm4 = vcmp.eq.f32.partialorder %v287_v2, 8.507059e+37 }
  0xd9   :  { %v2330_v59 = vpop.eup %2329 }
  0xda   :  { %v279_v60 = vmul.f32 %v2330_v59, %v276_v58  ;;  %vm284_vm2 = vweird.f32 %v2330_v59  ;;  %v2332_v25 = vpop.eup %2331 }
  0xdb   :  { %vm285_vm3 = vmor %vm283_vm1, %vm284_vm2  ;;  %v277_v26 = vadd.f32 1.0, %v2332_v25 }
  0xdc   :  { %v280_v61 = vsub.f32 1.0, %v279_v60 }
  0xdd   :  { %2333 = vrcp.f32 %v277_v26  ;;  %v304_v33 = vand.u32 2147483648, %v277_v26  ;;  %vm298_vm6 = vweird.f32 %v277_v26  ;;  %v302_v36 = vand.u32 2147483647, %v277_v26 }
  0xde   :  { %v281_v62 = vmul.f32 %v2330_v59, %v280_v61 }
  0xdf   :  { %v305_v38 = vor.u32 1.1754944e-38, %v304_v33  ;;  %vm303_vm8 = vcmp.eq.f32.partialorder %v302_v36, 8.507059e+37 }
  0xe0   :  { %v282_v0 = vadd.f32 %v2330_v59, %v281_v62  ;;  %v127_v62 = vpop.f32.mrf.mxu0 }
  0xe1   :  { %v128_v63 = vadd.f32 %v127_v62, %v2860_v35 }
  0xe2   :  { %v286_v8 = vsel %vm285_vm3, %v2330_v59, %v282_v0 }
  0xe3   :  { %v291_v21 = vsel %vm288_vm4, %v290_v7, %v286_v8  ;;  %v2334_v27 = vpop.eup %2333 }
  0xe4   :  { %v294_v28 = vmul.f32 %v2334_v27, %v277_v26  ;;  %vm299_vm5 = vweird.f32 %v2334_v27  ;;  %v310_v44 = vmul.f32 0.0, %v291_v21 }
  0xe5   :  { %vm300_vm7 = vmor %vm298_vm6, %vm299_vm5 }
  0xe6   :  { %v295_v29 = vsub.f32 1.0, %v294_v28 }
  0xe8   :  { %v296_v30 = vmul.f32 %v2334_v27, %v295_v29 }
  0xea   :  { %v297_v31 = vadd.f32 %v2334_v27, %v296_v30 }
  0xec   :  { %v301_v37 = vsel %vm300_vm7, %v2334_v27, %v297_v31 }
  0xed   :  { %v306_v40 = vsel %vm303_vm8, %v305_v38, %v301_v37 }
  0xee   :  { %v321_v51 = vmul.f32 0.0, %v306_v40 }
 0x11a   :  { %v313_v13 = vpop.permute.xlu0 %312 }
 0x11b   :  { %v315_v24 = vmul.f32 %v313_v13, %v291_v21 }
 0x11d   :  { %317 = vrot.lane.b32.xlu1 %v315_v24, %s2581_s3 }
 0x142   :  { %v324_v41 = vpop.permute.xlu0 %323 }
 0x143   :  { %v326_v42 = vmul.f32 %v324_v41, %v306_v40 }
 0x145   :  { %328 = vrot.lane.b32.xlu1 %v326_v42, %s2581_s3 }
 0x18f   :  { %v318_v45 = vpop.permute.xlu1 %317 }
 0x190   :  { %v2877_v47 = vadd.f32 %v318_v45, %v310_v44 }
 0x192   :  { %2335 = vtanh.f32 %v2877_v47 }
 0x198   :  { %v2336_v49 = vpop.eup %2335 }
 0x199   :  { %334 = vrot.lane.b32.xlu2 %v2336_v49, %s2580_s0 }
 0x1b7   :  { %v329_v52 = vpop.permute.xlu1 %328 }
 0x1b8   :  { %v2881_v53 = vadd.f32 %v329_v52, %v321_v51 }
 0x1ba   :  { %2337 = vtanh.f32 %v2881_v53 }
 0x1c0   :  { %v2338_v54 = vpop.eup %2337 }
 0x1c1   :  { %340 = vrot.lane.b32.xlu2 %v2338_v54, %s2580_s0 }
 0x1f3   :  { %v335_v55 = vpop.permute.xlu2 %334 }
 0x1f4   :  { %v337_v56 = vmul.f32 %v335_v55, %v291_v21 }
 0x1f6   :  { %345 = vrot.lane.b32.xlu0 %v337_v56, %s2581_s3 }
 0x21b   :  { %v341_v57 = vpop.permute.xlu2 %340 }
 0x21c   :  { %v2886_v58 = vmul.f32 %v341_v57, %v306_v40 }
 0x21e   :  { %356 = vrot.lane.b32.xlu1 %v2886_v58, %s2580_s0 }
 0x268   :  { %v346_v59 = vpop.permute.xlu0 %345 }
 0x269   :  { %349 = vst.msk [vmem:[#allocation3] sm:$0xff] %vm348_vm9, %v346_v59 }
 0x290   :  { %v357_v60 = vpop.permute.xlu1 %356 }
 0x291   :  { %v359_v61 = vsel %vm348_vm9, %v346_v59, %v357_v60 }
 0x292   :  { %2236 = vmatmul.msk.f32.vlgmr.msrb.gmra.mxu2 %vm221_vm10, %v359_v61  ;;  %2237 = vmatmul.msk.f32.vlgmr.msrb.gmra.mxu3 %vm221_vm10, %v359_v61 }
 0x293   :  { %649 = vmatpush.msrb.mxu2 %v2645_v1  ;;  %669 = vmatpush.msrb.mxu3 %v2681_v9 }
 0x295   :  { %650 = vmatpush.msrb.mxu2 %v2654_v3  ;;  %670 = vmatpush.msrb.mxu3 %v2692_v11 }
 0x297   :  { %651 = vmatpush.msrb.mxu2 %v2662_v5  ;;  %671 = vmatpush.msrb.mxu3 %v2724_v16 }
 0x299   :  { %652 = vmatpush.msrb.mxu2 %v2669_v6  ;;  %672 = vmatpush.msrb.mxu3 %v2729_v17 }
 0x29b   :  { %653 = vmatpush.msrb.mxu2 %v2686_v10  ;;  %673 = vmatpush.msrb.mxu3 %v2737_v18 }
 0x29d   :  { %654 = vmatpush.msrb.mxu2 %v2699_v12  ;;  %674 = vmatpush.msrb.mxu3 %v2747_v20 }
 0x29f   :  { %655 = vmatpush.msrb.mxu2 %v2711_v14  ;;  %675 = vmatpush.msrb.mxu3 %v2763_v22 }
 0x2a1   :  { %656 = vmatpush.msrb.mxu2 %v2719_v15  ;;  %676 = vmatpush.msrb.mxu3 %v2768_v23 }
 0x315   :  { %v380_v0 = vpop.f32.mrf.mxu2  ;;  %v400_v2 = vpop.f32.mrf.mxu3 }
 0x316   :  { %v407_v4 = vadd.f32 %v380_v0, %v128_v63  ;;  %v408_v7 = vadd.f32 %v400_v2, %v2872_v50 }
 0x318   :  { %2339 = vtanh.f32 %v407_v4  ;;  %v2238_v21 = vmul.f32 -1.442695, %v407_v4  ;;  %v2239_v27 = vmul.f32 -1.442695, %v408_v7 }
 0x319   :  { %2341 = vtanh.f32 %v408_v7 }
 0x31a   :  { %2343 = vpow2.f32 %v2238_v21 }
 0x31e   :  { %v2340_v8 = vpop.eup %2339 }
 0x31f   :  { %v2342_v13 = vpop.eup %2341  ;;  %451 = vrot.lane.b32.xlu2 %v2340_v8, %s2580_s0 }
 0x320   :  { %462 = vrot.lane.b32.xlu0 %v2342_v13, %s2580_s0  ;;  %v2344_v24 = vpop.eup %2343 }
 0x321   :  { %v415_v25 = vadd.f32 1.0, %v2344_v24 }
 0x323   :  { %2345 = vrcp.f32 %v415_v25  ;;  %v428_v36 = vand.u32 2147483648, %v415_v25  ;;  %vm422_vm12 = vweird.f32 %v415_v25  ;;  %v426_v37 = vand.u32 2147483647, %v415_v25 }
 0x324   :  { %2347 = vpow2.f32 %v2239_v27 }
 0x325   :  { %v429_v40 = vor.u32 1.1754944e-38, %v428_v36  ;;  %vm427_vm14 = vcmp.eq.f32.partialorder %v426_v37, 8.507059e+37 }
 0x329   :  { %v2346_v26 = vpop.eup %2345 }
 0x32a   :  { %v418_v28 = vmul.f32 %v2346_v26, %v415_v25  ;;  %v2348_v50 = vpop.eup %2347  ;;  %vm423_vm11 = vweird.f32 %v2346_v26 }
 0x32b   :  { %v416_v31 = vadd.f32 1.0, %v2348_v50  ;;  %vm424_vm13 = vmor %vm422_vm12, %vm423_vm11 }
 0x32c   :  { %v419_v29 = vsub.f32 1.0, %v418_v28 }
 0x32d   :  { %2349 = vrcp.f32 %v416_v31  ;;  %v443_v55 = vand.u32 2147483648, %v416_v31  ;;  %vm437_vm0 = vweird.f32 %v416_v31  ;;  %v441_v56 = vand.u32 2147483647, %v416_v31 }
 0x32e   :  { %v420_v30 = vmul.f32 %v2346_v26, %v419_v29  ;;  %v130_v29 = vpop.f32.mrf.mxu0 }
 0x32f   :  { %v444_v59 = vor.u32 1.1754944e-38, %v443_v55  ;;  %vm442_vm2 = vcmp.eq.f32.partialorder %v441_v56, 8.507059e+37 }
 0x330   :  { %v421_v33 = vadd.f32 %v2346_v26, %v420_v30  ;;  %v131_v30 = vadd.f32 %v130_v29, %v2860_v35 }
 0x332   :  { %v425_v38 = vsel %vm424_vm13, %v2346_v26, %v421_v33 }
 0x333   :  { %v430_v42 = vsel %vm427_vm14, %v429_v40, %v425_v38  ;;  %v2350_v45 = vpop.eup %2349 }
 0x334   :  { %v433_v49 = vmul.f32 %v2350_v45, %v416_v31  ;;  %vm438_vm15 = vweird.f32 %v2350_v45  ;;  %v449_v63 = vmul.f32 %v430_v42, %v2877_v47 }
 0x335   :  { %vm439_vm1 = vmor %vm437_vm0, %vm438_vm15 }
 0x336   :  { %v434_v51 = vsub.f32 1.0, %v433_v49 }
 0x338   :  { %v435_v52 = vmul.f32 %v2350_v45, %v434_v51 }
 0x33a   :  { %v436_v54 = vadd.f32 %v2350_v45, %v435_v52 }
 0x33c   :  { %v440_v57 = vsel %vm439_vm1, %v2350_v45, %v436_v54 }
 0x33d   :  { %v445_v61 = vsel %vm442_vm2, %v444_v59, %v440_v57 }
 0x33e   :  { %v460_v0 = vmul.f32 %v445_v61, %v2881_v53 }
 0x379   :  { %v452_v41 = vpop.permute.xlu2 %451 }
 0x37a   :  { %v454_v44 = vmul.f32 %v452_v41, %v430_v42 }
 0x37c   :  { %456 = vrot.lane.b32.xlu1 %v454_v44, %s2581_s3 }
 0x392   :  { %v463_v60 = vpop.permute.xlu0 %462 }
 0x393   :  { %v465_v62 = vmul.f32 %v463_v60, %v445_v61 }
 0x395   :  { %467 = vrot.lane.b32.xlu2 %v465_v62, %s2581_s3 }
 0x3ee   :  { %v457_v2 = vpop.permute.xlu1 %456 }
 0x3ef   :  { %v468_v4 = vpop.permute.xlu2 %467  ;;  %v2918_v7 = vadd.f32 %v457_v2, %v449_v63 }
 0x3f0   :  { %v2920_v8 = vadd.f32 %v468_v4, %v460_v0 }
 0x3f1   :  { %2351 = vtanh.f32 %v2918_v7 }
 0x3f2   :  { %2353 = vtanh.f32 %v2920_v8 }
 0x3f7   :  { %v2352_v13 = vpop.eup %2351 }
 0x3f8   :  { %v2354_v21 = vpop.eup %2353  ;;  %473 = vrot.lane.b32.xlu0 %v2352_v13, %s2580_s0 }
 0x3f9   :  { %479 = vrot.lane.b32.xlu1 %v2354_v21, %s2580_s0 }
 0x46a   :  { %v474_v24 = vpop.permute.xlu0 %473 }
 0x46b   :  { %v480_v47 = vpop.permute.xlu1 %479  ;;  %v476_v25 = vmul.f32 %v474_v24, %v430_v42 }
 0x46c   :  { %v2926_v53 = vmul.f32 %v480_v47, %v445_v61 }
 0x46d   :  { %484 = vrot.lane.b32.xlu2 %v476_v25, %s2581_s3 }
 0x46e   :  { %495 = vrot.lane.b32.xlu0 %v2926_v53, %s2580_s0 }
 0x4c7   :  { %v485_v26 = vpop.permute.xlu2 %484 }
 0x4c8   :  { %488 = vst.msk [vmem:[#allocation3 + $0x8] sm:$0xff] %vm348_vm9, %v485_v26 }
 0x4e0   :  { %v496_v27 = vpop.permute.xlu0 %495 }
 0x4e1   :  { %v498_v28 = vsel %vm348_vm9, %v485_v26, %v496_v27 }
 0x4e2   :  { %2240 = vmatmul.msk.f32.vlgmr.msra.gmra.mxu2 %vm221_vm10, %v498_v28  ;;  %2241 = vmatmul.msk.f32.vlgmr.msra.gmra.mxu3 %vm221_vm10, %v498_v28 }
 0x4e3   :  { %925 = vmatpush.msra.mxu2 %v2645_v1  ;;  %945 = vmatpush.msra.mxu3 %v2681_v9 }
 0x4e5   :  { %926 = vmatpush.msra.mxu2 %v2654_v3  ;;  %946 = vmatpush.msra.mxu3 %v2692_v11 }
 0x4e7   :  { %927 = vmatpush.msra.mxu2 %v2662_v5  ;;  %947 = vmatpush.msra.mxu3 %v2724_v16 }
 0x4e9   :  { %928 = vmatpush.msra.mxu2 %v2669_v6  ;;  %948 = vmatpush.msra.mxu3 %v2729_v17 }
 0x4eb   :  { %929 = vmatpush.msra.mxu2 %v2686_v10  ;;  %949 = vmatpush.msra.mxu3 %v2737_v18 }
 0x4ed   :  { %930 = vmatpush.msra.mxu2 %v2699_v12  ;;  %950 = vmatpush.msra.mxu3 %v2747_v20 }
 0x4ef   :  { %931 = vmatpush.msra.mxu2 %v2711_v14  ;;  %951 = vmatpush.msra.mxu3 %v2763_v22 }
 0x4f1   :  { %932 = vmatpush.msra.mxu2 %v2719_v15  ;;  %952 = vmatpush.msra.mxu3 %v2768_v23 }
 0x565   :  { %v519_v50 = vpop.f32.mrf.mxu2  ;;  %v539_v31 = vpop.f32.mrf.mxu3 }
 0x566   :  { %v546_v33 = vadd.f32 %v519_v50, %v131_v30  ;;  %v547_v36 = vadd.f32 %v539_v31, %v2870_v48 }
 0x568   :  { %2355 = vtanh.f32 %v546_v33  ;;  %v2243_v40 = vmul.f32 -1.442695, %v547_v36  ;;  %v2242_v45 = vmul.f32 -1.442695, %v546_v33 }
 0x569   :  { %2357 = vtanh.f32 %v547_v36 }
 0x56a   :  { %2359 = vpow2.f32 %v2243_v40 }
 0x56e   :  { %v2356_v37 = vpop.eup %2355 }
 0x56f   :  { %v2358_v38 = vpop.eup %2357  ;;  %590 = vrot.lane.b32.xlu1 %v2356_v37, %s2580_s0 }
 0x570   :  { %601 = vrot.lane.b32.xlu2 %v2358_v38, %s2580_s0  ;;  %v2360_v41 = vpop.eup %2359 }
 0x571   :  { %v555_v42 = vadd.f32 1.0, %v2360_v41 }
 0x573   :  { %2361 = vrcp.f32 %v555_v42  ;;  %v582_v56 = vand.u32 2147483648, %v555_v42  ;;  %vm576_vm4 = vweird.f32 %v555_v42  ;;  %v580_v57 = vand.u32 2147483647, %v555_v42 }
 0x574   :  { %2363 = vpow2.f32 %v2242_v45 }
 0x575   :  { %v583_v60 = vor.u32 1.1754944e-38, %v582_v56  ;;  %vm581_vm6 = vcmp.eq.f32.partialorder %v580_v57, 8.507059e+37 }
 0x579   :  { %v2362_v44 = vpop.eup %2361 }
 0x57a   :  { %v572_v49 = vmul.f32 %v2362_v44, %v555_v42  ;;  %v2364_v52 = vpop.eup %2363  ;;  %vm577_vm3 = vweird.f32 %v2362_v44 }
 0x57b   :  { %v554_v54 = vadd.f32 1.0, %v2364_v52  ;;  %vm578_vm5 = vmor %vm576_vm4, %vm577_vm3 }
 0x57c   :  { %v573_v51 = vsub.f32 1.0, %v572_v49 }
 0x57d   :  { %2365 = vrcp.f32 %v554_v54  ;;  %v567_v24 = vand.u32 2147483648, %v554_v54  ;;  %vm561_vm8 = vweird.f32 %v554_v54  ;;  %v565_v47 = vand.u32 2147483647, %v554_v54 }
 0x57e   :  { %v574_v48 = vmul.f32 %v2362_v44, %v573_v51 }
 0x57f   :  { %v568_v26 = vor.u32 1.1754944e-38, %v567_v24  ;;  %vm566_vm12 = vcmp.eq.f32.partialorder %v565_v47, 8.507059e+37 }
 0x580   :  { %v575_v55 = vadd.f32 %v2362_v44, %v574_v48 }
 0x582   :  { %v579_v59 = vsel %vm578_vm5, %v2362_v44, %v575_v55 }
 0x583   :  { %v584_v62 = vsel %vm581_vm6, %v583_v60, %v579_v59  ;;  %v2366_v63 = vpop.eup %2365 }
 0x584   :  { %v557_v2 = vmul.f32 %v2366_v63, %v554_v54  ;;  %vm562_vm7 = vweird.f32 %v2366_v63  ;;  %v599_v30 = vmul.f32 %v584_v62, %v2920_v8 }
 0x585   :  { %vm563_vm11 = vmor %vm561_vm8, %vm562_vm7 }
 0x586   :  { %v558_v4 = vsub.f32 1.0, %v557_v2 }
 0x588   :  { %v559_v13 = vmul.f32 %v2366_v63, %v558_v4 }
 0x58a   :  { %v560_v21 = vadd.f32 %v2366_v63, %v559_v13 }
 0x58c   :  { %v564_v25 = vsel %vm563_vm11, %v2366_v63, %v560_v21 }
 0x58d   :  { %v569_v28 = vsel %vm566_vm12, %v568_v26, %v564_v25 }
 0x58e   :  { %v588_v36 = vmul.f32 %v569_v28, %v2918_v7 }
 0x5ca   :  { %v602_v61 = vpop.permute.xlu2 %601 }
 0x5cb   :  { %v604_v0 = vmul.f32 %v602_v61, %v584_v62 }
 0x5cd   :  { %606 = vrot.lane.b32.xlu1 %v604_v0, %s2581_s3 }
 0x5e1   :  { %v591_v27 = vpop.permute.xlu1 %590 }
 0x5e2   :  { %v593_v29 = vmul.f32 %v591_v27, %v569_v28 }
 0x5e4   :  { %595 = vrot.lane.b32.xlu0 %v593_v29, %s2581_s3 }
 0x63f   :  { %v607_v50 = vpop.permute.xlu1 %606 }
 0x640   :  { %v2958_v31 = vadd.f32 %v607_v50, %v599_v30 }
 0x642   :  { %2367 = vtanh.f32 %v2958_v31 }
 0x648   :  { %v2368_v33 = vpop.eup %2367 }
 0x649   :  { %618 = vrot.lane.b32.xlu0 %v2368_v33, %s2580_s0 }
 0x656   :  { %v596_v37 = vpop.permute.xlu0 %595 }
 0x657   :  { %v2963_v38 = vadd.f32 %v596_v37, %v588_v36 }
 0x659   :  { %2369 = vtanh.f32 %v2963_v38 }
 0x65f   :  { %v2370_v40 = vpop.eup %2369 }
 0x660   :  { %612 = vrot.lane.b32.xlu2 %v2370_v40, %s2580_s0 }
 0x6ba   :  { %v613_v41 = vpop.permute.xlu2 %612 }
 0x6bb   :  { %v619_v8 = vpop.permute.xlu0 %618  ;;  %v615_v42 = vmul.f32 %v613_v41, %v569_v28 }
 0x6bc   :  { %v2967_v44 = vmul.f32 %v619_v8, %v584_v62 }
 0x6bd   :  { %623 = vrot.lane.b32.xlu1 %v615_v42, %s2581_s3 }
 0x6be   :  { %634 = vrot.lane.b32.xlu2 %v2967_v44, %s2580_s0 }
 0x718   :  { %v635_v45 = vpop.permute.xlu2 %634 }
 0x72f   :  { %v624_v7 = vpop.permute.xlu1 %623 }
 0x730   :  { %627 = vst.msk [vmem:[#allocation3 + $0x10] sm:$0xff] %vm348_vm9, %v624_v7  ;;  %v637_v49 = vsel %vm348_vm9, %v624_v7, %v635_v45 }
 0x731   :  { %2244 = vmatmul.msk.f32.vlgmr.msrb.gmra.mxu2 %vm221_vm10, %v637_v49  ;;  %2245 = vmatmul.msk.f32.vlgmr.msrb.gmra.mxu3 %vm221_vm10, %v637_v49 }
 0x732   :  { %1199 = vmatpush.msrb.mxu2 %v2645_v1  ;;  %1219 = vmatpush.msrb.mxu3 %v2681_v9  ;;  %v133_v1 = vpop.f32.mrf.mxu0 }
 0x734   :  { %1200 = vmatpush.msrb.mxu2 %v2654_v3  ;;  %1220 = vmatpush.msrb.mxu3 %v2692_v11  ;;  %v134_v3 = vadd.f32 %v133_v1, %v2860_v35 }
 0x736   :  { %1201 = vmatpush.msrb.mxu2 %v2662_v5  ;;  %1221 = vmatpush.msrb.mxu3 %v2724_v16 }
 0x738   :  { %1202 = vmatpush.msrb.mxu2 %v2669_v6  ;;  %1222 = vmatpush.msrb.mxu3 %v2729_v17 }
 0x73a   :  { %1203 = vmatpush.msrb.mxu2 %v2686_v10  ;;  %1223 = vmatpush.msrb.mxu3 %v2737_v18  ;;  %v136_v7 = vpop.f32.mrf.mxu0 }
 0x73c   :  { %1204 = vmatpush.msrb.mxu2 %v2699_v12  ;;  %1224 = vmatpush.msrb.mxu3 %v2747_v20 }
 0x73e   :  { %1205 = vmatpush.msrb.mxu2 %v2711_v14  ;;  %1225 = vmatpush.msrb.mxu3 %v2763_v22 }
 0x740   :  { %1206 = vmatpush.msrb.mxu2 %v2719_v15  ;;  %1226 = vmatpush.msrb.mxu3 %v2768_v23 }
 0x742   :  { %v3017_v49 = vpop.f32.mrf.mxu0 }
 0x74a   :  { %v3019_v1 = vpop.f32.mrf.mxu0 }
 0x7b4   :  { %v658_v5 = vpop.f32.mrf.mxu2  ;;  %v678_v6 = vpop.f32.mrf.mxu3 }
 0x7b5   :  { %v685_v9 = vadd.f32 %v658_v5, %v134_v3  ;;  %v686_v10 = vadd.f32 %v678_v6, %v2868_v46  ;;  %v3021_v3 = vpop.f32.mrf.mxu0  ;;  %v137_v5 = vadd.f32 %v136_v7, %v2860_v35 }
 0x7b7   :  { %2371 = vtanh.f32 %v685_v9  ;;  %v2246_v14 = vmul.f32 -1.442695, %v685_v9  ;;  %v2247_v15 = vmul.f32 -1.442695, %v686_v10 }
 0x7b8   :  { %2373 = vtanh.f32 %v686_v10 }
 0x7b9   :  { %2375 = vpow2.f32 %v2246_v14 }
 0x7ba   :  { %2377 = vpow2.f32 %v2247_v15 }
 0x7bd   :  { %v2372_v11 = vpop.eup %2371 }
 0x7be   :  { %v2374_v12 = vpop.eup %2373  ;;  %729 = vrot.lane.b32.xlu0 %v2372_v11, %s2580_s0 }
 0x7bf   :  { %740 = vrot.lane.b32.xlu1 %v2374_v12, %s2580_s0  ;;  %v2376_v16 = vpop.eup %2375 }
 0x7c0   :  { %v2378_v17 = vpop.eup %2377  ;;  %v693_v18 = vadd.f32 1.0, %v2376_v16 }
 0x7c1   :  { %v694_v20 = vadd.f32 1.0, %v2378_v17 }
 0x7c2   :  { %2379 = vrcp.f32 %v693_v18  ;;  %v706_v59 = vand.u32 2147483648, %v693_v18  ;;  %vm700_vm15 = vweird.f32 %v693_v18  ;;  %v704_v61 = vand.u32 2147483647, %v693_v18 }
 0x7c3   :  { %2381 = vrcp.f32 %v694_v20  ;;  %v721_v60 = vand.u32 2147483648, %v694_v20  ;;  %vm715_vm0 = vweird.f32 %v694_v20  ;;  %v719_v62 = vand.u32 2147483647, %v694_v20 }
 0x7c4   :  { %v707_v2 = vor.u32 1.1754944e-38, %v706_v59  ;;  %vm705_vm3 = vcmp.eq.f32.partialorder %v704_v61, 8.507059e+37 }
 0x7c5   :  { %v722_v4 = vor.u32 1.1754944e-38, %v721_v60  ;;  %vm720_vm4 = vcmp.eq.f32.partialorder %v719_v62, 8.507059e+37 }
 0x7c8   :  { %v2380_v22 = vpop.eup %2379 }
 0x7c9   :  { %v2382_v23 = vpop.eup %2381  ;;  %v696_v46 = vmul.f32 %v2380_v22, %v693_v18  ;;  %vm701_vm13 = vweird.f32 %v2380_v22 }
 0x7ca   :  { %v711_v51 = vmul.f32 %v2382_v23, %v694_v20  ;;  %vm716_vm14 = vweird.f32 %v2382_v23  ;;  %vm702_vm1 = vmor %vm700_vm15, %vm701_vm13 }
 0x7cb   :  { %v697_v52 = vsub.f32 1.0, %v696_v46  ;;  %vm717_vm2 = vmor %vm715_vm0, %vm716_vm14 }
 0x7cc   :  { %v712_v48 = vsub.f32 1.0, %v711_v51 }
 0x7cd   :  { %v698_v54 = vmul.f32 %v2380_v22, %v697_v52 }
 0x7ce   :  { %v713_v55 = vmul.f32 %v2382_v23, %v712_v48 }
 0x7cf   :  { %v699_v56 = vadd.f32 %v2380_v22, %v698_v54 }
 0x7d0   :  { %v714_v57 = vadd.f32 %v2382_v23, %v713_v55 }
 0x7d1   :  { %v703_v63 = vsel %vm702_vm1, %v2380_v22, %v699_v56 }
 0x7d2   :  { %v718_v0 = vsel %vm717_vm2, %v2382_v23, %v714_v57  ;;  %v708_v21 = vsel %vm705_vm3, %v707_v2, %v703_v63 }
 0x7d3   :  { %v723_v47 = vsel %vm720_vm4, %v722_v4, %v718_v0  ;;  %v727_v27 = vmul.f32 %v708_v21, %v2963_v38 }
 0x7d4   :  { %v738_v50 = vmul.f32 %v723_v47, %v2958_v31 }
 0x830   :  { %v730_v13 = vpop.permute.xlu0 %729 }
 0x831   :  { %v741_v24 = vpop.permute.xlu1 %740  ;;  %v732_v25 = vmul.f32 %v730_v13, %v708_v21 }
 0x832   :  { %v743_v26 = vmul.f32 %v741_v24, %v723_v47 }
 0x833   :  { %734 = vrot.lane.b32.xlu2 %v732_v25, %s2581_s3 }
 0x834   :  { %745 = vrot.lane.b32.xlu0 %v743_v26, %s2581_s3 }
 0x88d   :  { %v735_v28 = vpop.permute.xlu2 %734 }
 0x88e   :  { %v2999_v29 = vadd.f32 %v735_v28, %v727_v27 }
 0x890   :  { %2383 = vtanh.f32 %v2999_v29 }
 0x896   :  { %v2384_v30 = vpop.eup %2383 }
 0x897   :  { %751 = vrot.lane.b32.xlu1 %v2384_v30, %s2580_s0 }
 0x8a6   :  { %v746_v33 = vpop.permute.xlu0 %745 }
 0x8a7   :  { %v3004_v36 = vadd.f32 %v746_v33, %v738_v50 }
 0x8a9   :  { %2385 = vtanh.f32 %v3004_v36 }
 0x8af   :  { %v2386_v37 = vpop.eup %2385 }
 0x8b0   :  { %757 = vrot.lane.b32.xlu2 %v2386_v37, %s2580_s0 }
 0x909   :  { %v752_v40 = vpop.permute.xlu1 %751 }
 0x90a   :  { %v758_v38 = vpop.permute.xlu2 %757  ;;  %v754_v41 = vmul.f32 %v752_v40, %v708_v21 }
 0x90b   :  { %v3008_v8 = vmul.f32 %v758_v38, %v723_v47 }
 0x90c   :  { %762 = vrot.lane.b32.xlu0 %v754_v41, %s2581_s3 }
 0x90d   :  { %773 = vrot.lane.b32.xlu1 %v3008_v8, %s2580_s0 }
 0x97e   :  { %v763_v42 = vpop.permute.xlu0 %762 }
 0x97f   :  { %766 = vst.msk [vmem:[#allocation3 + $0x18] sm:$0xff] %vm348_vm9, %v763_v42  ;;  %v774_v31 = vpop.permute.xlu1 %773 }
 0x980   :  { %v776_v45 = vsel %vm348_vm9, %v763_v42, %v774_v31 }
 0x981   :  { %2248 = vmatmul.msk.f32.vlgmr.msrb.gmra.mxu0 %vm221_vm10, %v776_v45  ;;  %2249 = vmatmul.msk.f32.vlgmr.msrb.gmra.mxu1 %vm221_vm10, %v776_v45 }
 0x9fe   :  { %v797_v6 = vpop.f32.mrf.mxu0  ;;  %v817_v9 = vpop.f32.mrf.mxu1 }
 0x9ff   :  { %v822_v10 = vadd.f32 %v797_v6, %v137_v5  ;;  %v823_v11 = vadd.f32 %v817_v9, %v2865_v43  ;;  %v140_v5 = vadd.f32 %v3017_v49, %v2860_v35 }
 0xa01   :  { %2387 = vtanh.f32 %v822_v10  ;;  %v2250_v15 = vmul.f32 -1.442695, %v822_v10  ;;  %v2251_v20 = vmul.f32 -1.442695, %v823_v11 }
 0xa02   :  { %2389 = vtanh.f32 %v823_v11 }
 0xa03   :  { %2391 = vpow2.f32 %v2250_v15 }
 0xa07   :  { %v2388_v12 = vpop.eup %2387 }
 0xa08   :  { %v2390_v14 = vpop.eup %2389  ;;  %866 = vrot.lane.b32.xlu2 %v2388_v12, %s2580_s0 }
 0xa09   :  { %877 = vrot.lane.b32.xlu0 %v2390_v14, %s2580_s0  ;;  %v2392_v16 = vpop.eup %2391 }
 0xa0a   :  { %v830_v17 = vadd.f32 1.0, %v2392_v16 }
 0xa0c   :  { %2393 = vrcp.f32 %v830_v17  ;;  %v843_v48 = vand.u32 2147483648, %v830_v17  ;;  %vm837_vm6 = vweird.f32 %v830_v17  ;;  %v841_v54 = vand.u32 2147483647, %v830_v17 }
 0xa0d   :  { %2395 = vpow2.f32 %v2251_v20 }
 0xa0e   :  { %v844_v56 = vor.u32 1.1754944e-38, %v843_v48  ;;  %vm842_vm8 = vcmp.eq.f32.partialorder %v841_v54, 8.507059e+37 }
 0xa12   :  { %v2394_v18 = vpop.eup %2393 }
 0xa13   :  { %v833_v22 = vmul.f32 %v2394_v18, %v830_v17  ;;  %v2396_v43 = vpop.eup %2395  ;;  %vm838_vm5 = vweird.f32 %v2394_v18 }
 0xa14   :  { %v831_v51 = vadd.f32 1.0, %v2396_v43  ;;  %vm839_vm7 = vmor %vm837_vm6, %vm838_vm5 }
 0xa15   :  { %v834_v23 = vsub.f32 1.0, %v833_v22 }
 0xa16   :  { %2397 = vrcp.f32 %v831_v51  ;;  %v858_v4 = vand.u32 2147483648, %v831_v51  ;;  %vm852_vm12 = vweird.f32 %v831_v51  ;;  %v856_v13 = vand.u32 2147483647, %v831_v51 }
 0xa17   :  { %v835_v46 = vmul.f32 %v2394_v18, %v834_v23 }
 0xa18   :  { %v859_v24 = vor.u32 1.1754944e-38, %v858_v4  ;;  %vm857_vm14 = vcmp.eq.f32.partialorder %v856_v13, 8.507059e+37 }
 0xa19   :  { %v836_v52 = vadd.f32 %v2394_v18, %v835_v46 }
 0xa1b   :  { %v840_v55 = vsel %vm839_vm7, %v2394_v18, %v836_v52 }
 0xa1c   :  { %v845_v59 = vsel %vm842_vm8, %v844_v56, %v840_v55  ;;  %v2398_v61 = vpop.eup %2397 }
 0xa1d   :  { %v848_v62 = vmul.f32 %v2398_v61, %v831_v51  ;;  %vm853_vm11 = vweird.f32 %v2398_v61  ;;  %v864_v27 = vmul.f32 %v845_v59, %v2999_v29 }
 0xa1e   :  { %vm854_vm13 = vmor %vm852_vm12, %vm853_vm11 }
 0xa1f   :  { %v849_v63 = vsub.f32 1.0, %v848_v62 }
 0xa21   :  { %v850_v0 = vmul.f32 %v2398_v61, %v849_v63 }
 0xa23   :  { %v851_v2 = vadd.f32 %v2398_v61, %v850_v0 }
 0xa25   :  { %v855_v21 = vsel %vm854_vm13, %v2398_v61, %v851_v2 }
 0xa26   :  { %v860_v25 = vsel %vm857_vm14, %v859_v24, %v855_v21 }
 0xa27   :  { %v875_v28 = vmul.f32 %v860_v25, %v3004_v36 }
 0xa62   :  { %v867_v57 = vpop.permute.xlu2 %866 }
 0xa63   :  { %v869_v60 = vmul.f32 %v867_v57, %v845_v59 }
 0xa65   :  { %871 = vrot.lane.b32.xlu1 %v869_v60, %s2581_s3 }
 0xa7b   :  { %v878_v47 = vpop.permute.xlu0 %877 }
 0xa7c   :  { %v880_v26 = vmul.f32 %v878_v47, %v860_v25 }
 0xa7e   :  { %882 = vrot.lane.b32.xlu2 %v880_v26, %s2581_s3 }
 0xad7   :  { %v872_v30 = vpop.permute.xlu1 %871 }
 0xad8   :  { %v883_v50 = vpop.permute.xlu2 %882  ;;  %v3031_v33 = vadd.f32 %v872_v30, %v864_v27 }
 0xad9   :  { %v3033_v37 = vadd.f32 %v883_v50, %v875_v28 }
 0xada   :  { %2399 = vtanh.f32 %v3031_v33 }
 0xadb   :  { %2401 = vtanh.f32 %v3033_v37 }
 0xae0   :  { %v2400_v40 = vpop.eup %2399 }
 0xae1   :  { %v2402_v38 = vpop.eup %2401  ;;  %888 = vrot.lane.b32.xlu0 %v2400_v40, %s2580_s0 }
 0xae2   :  { %894 = vrot.lane.b32.xlu1 %v2402_v38, %s2580_s0 }
 0xb53   :  { %v889_v41 = vpop.permute.xlu0 %888 }
 0xb54   :  { %v895_v29 = vpop.permute.xlu1 %894  ;;  %v891_v42 = vmul.f32 %v889_v41, %v845_v59 }
 0xb55   :  { %v3039_v36 = vmul.f32 %v895_v29, %v860_v25 }
 0xb56   :  { %899 = vrot.lane.b32.xlu2 %v891_v42, %s2581_s3 }
 0xb57   :  { %910 = vrot.lane.b32.xlu0 %v3039_v36, %s2580_s0 }
 0xbb0   :  { %v900_v31 = vpop.permute.xlu2 %899 }
 0xbb1   :  { %903 = vst.msk [vmem:[#allocation3 + $0x20] sm:$0xff] %vm348_vm9, %v900_v31 }
 0xbc9   :  { %v911_v45 = vpop.permute.xlu0 %910 }
 0xbca   :  { %v913_v7 = vsel %vm348_vm9, %v900_v31, %v911_v45 }
 0xbcb   :  { %2252 = vmatmul.msk.f32.vlgmr.msra.gmra.mxu2 %vm221_vm10, %v913_v7  ;;  %2253 = vmatmul.msk.f32.vlgmr.msra.gmra.mxu3 %vm221_vm10, %v913_v7  ;;  %v143_v7 = vadd.f32 %v3019_v1, %v2860_v35 }
 0xc4e   :  { %v934_v6 = vpop.f32.mrf.mxu2  ;;  %v954_v9 = vpop.f32.mrf.mxu3 }
 0xc4f   :  { %v959_v10 = vadd.f32 %v934_v6, %v140_v5  ;;  %v960_v11 = vadd.f32 %v954_v9, %v2863_v39 }
 0xc51   :  { %2403 = vtanh.f32 %v959_v10  ;;  %v2255_v15 = vmul.f32 -1.442695, %v960_v11  ;;  %v2254_v49 = vmul.f32 -1.442695, %v959_v10 }
 0xc52   :  { %2405 = vtanh.f32 %v960_v11 }
 0xc53   :  { %2407 = vpow2.f32 %v2255_v15 }
 0xc57   :  { %v2404_v12 = vpop.eup %2403 }
 0xc58   :  { %v2406_v14 = vpop.eup %2405  ;;  %1003 = vrot.lane.b32.xlu1 %v2404_v12, %s2580_s0 }
 0xc59   :  { %1014 = vrot.lane.b32.xlu2 %v2406_v14, %s2580_s0  ;;  %v2408_v16 = vpop.eup %2407 }
 0xc5a   :  { %v968_v17 = vadd.f32 1.0, %v2408_v16 }
 0xc5c   :  { %2409 = vrcp.f32 %v968_v17  ;;  %v995_v51 = vand.u32 2147483648, %v968_v17  ;;  %vm989_vm0 = vweird.f32 %v968_v17  ;;  %v993_v52 = vand.u32 2147483647, %v968_v17 }
 0xc5d   :  { %2411 = vpow2.f32 %v2254_v49 }
 0xc5e   :  { %v996_v54 = vor.u32 1.1754944e-38, %v995_v51  ;;  %vm994_vm2 = vcmp.eq.f32.partialorder %v993_v52, 8.507059e+37 }
 0xc62   :  { %v2410_v18 = vpop.eup %2409 }
 0xc63   :  { %v985_v20 = vmul.f32 %v2410_v18, %v968_v17  ;;  %v2412_v23 = vpop.eup %2411  ;;  %vm990_vm15 = vweird.f32 %v2410_v18 }
 0xc64   :  { %v967_v46 = vadd.f32 1.0, %v2412_v23  ;;  %vm991_vm1 = vmor %vm989_vm0, %vm990_vm15 }
 0xc65   :  { %v986_v22 = vsub.f32 1.0, %v985_v20 }
 0xc66   :  { %2413 = vrcp.f32 %v967_v46  ;;  %v980_v0 = vand.u32 2147483648, %v967_v46  ;;  %vm974_vm4 = vweird.f32 %v967_v46  ;;  %v978_v2 = vand.u32 2147483647, %v967_v46 }
 0xc67   :  { %v987_v39 = vmul.f32 %v2410_v18, %v986_v22 }
 0xc68   :  { %v981_v13 = vor.u32 1.1754944e-38, %v980_v0  ;;  %vm979_vm6 = vcmp.eq.f32.partialorder %v978_v2, 8.507059e+37 }
 0xc69   :  { %v988_v43 = vadd.f32 %v2410_v18, %v987_v39 }
 0xc6b   :  { %v992_v48 = vsel %vm991_vm1, %v2410_v18, %v988_v43 }
 0xc6c   :  { %v997_v56 = vsel %vm994_vm2, %v996_v54, %v992_v48  ;;  %v2414_v57 = vpop.eup %2413 }
 0xc6d   :  { %v970_v60 = vmul.f32 %v2414_v57, %v967_v46  ;;  %vm975_vm3 = vweird.f32 %v2414_v57  ;;  %v1012_v25 = vmul.f32 %v997_v56, %v3033_v37 }
 0xc6e   :  { %vm976_vm5 = vmor %vm974_vm4, %vm975_vm3 }
 0xc6f   :  { %v971_v61 = vsub.f32 1.0, %v970_v60 }
 0xc71   :  { %v972_v62 = vmul.f32 %v2414_v57, %v971_v61 }
 0xc73   :  { %v973_v63 = vadd.f32 %v2414_v57, %v972_v62 }
 0xc75   :  { %v977_v4 = vsel %vm976_vm5, %v2414_v57, %v973_v63 }
 0xc76   :  { %v982_v24 = vsel %vm979_vm6, %v981_v13, %v977_v4 }
 0xc77   :  { %v1001_v30 = vmul.f32 %v982_v24, %v3031_v33 }
 0xcb3   :  { %v1015_v55 = vpop.permute.xlu2 %1014 }
 0xcb4   :  { %v1017_v59 = vmul.f32 %v1015_v55, %v997_v56 }
 0xcb6   :  { %1019 = vrot.lane.b32.xlu1 %v1017_v59, %s2581_s3 }
 0xcca   :  { %v1004_v21 = vpop.permute.xlu1 %1003 }
 0xccb   :  { %v1006_v47 = vmul.f32 %v1004_v21, %v982_v24 }
 0xccd   :  { %1008 = vrot.lane.b32.xlu0 %v1006_v47, %s2581_s3 }
 0xd28   :  { %v1020_v26 = vpop.permute.xlu1 %1019 }
 0xd29   :  { %v3056_v27 = vadd.f32 %v1020_v26, %v1012_v25 }
 0xd2b   :  { %2415 = vtanh.f32 %v3056_v27 }
 0xd31   :  { %v2416_v28 = vpop.eup %2415 }
 0xd32   :  { %1031 = vrot.lane.b32.xlu0 %v2416_v28, %s2580_s0 }
 0xd3f   :  { %v1009_v50 = vpop.permute.xlu0 %1008 }
 0xd40   :  { %v3061_v40 = vadd.f32 %v1009_v50, %v1001_v30 }
 0xd42   :  { %2417 = vtanh.f32 %v3061_v40 }
 0xd48   :  { %v2418_v38 = vpop.eup %2417 }
 0xd49   :  { %1025 = vrot.lane.b32.xlu2 %v2418_v38, %s2580_s0 }
 0xda3   :  { %v1026_v41 = vpop.permute.xlu2 %1025 }
 0xda4   :  { %v1032_v37 = vpop.permute.xlu0 %1031  ;;  %v1028_v29 = vmul.f32 %v1026_v41, %v982_v24 }
 0xda5   :  { %v3065_v42 = vmul.f32 %v1032_v37, %v997_v56 }
 0xda6   :  { %1036 = vrot.lane.b32.xlu1 %v1028_v29, %s2581_s3  ;;  %v1326_v29 = vld [vmem:[#allocation5 + $0x30] sm:$0xff] }
 0xda7   :  { %1047 = vrot.lane.b32.xlu2 %v3065_v42, %s2580_s0  ;;  %1494 = vmatpush.msra.mxu2 %v1326_v29  ;;  %v1330_v29 = vld [vmem:[#allocation5 + $0x50] sm:$0xff] }
 0xe01   :  { %v1048_v31 = vpop.permute.xlu2 %1047 }
 0xe18   :  { %v1037_v33 = vpop.permute.xlu1 %1036 }
 0xe19   :  { %1040 = vst.msk [vmem:[#allocation3 + $0x28] sm:$0xff] %vm348_vm9, %v1037_v33  ;;  %v1050_v45 = vsel %vm348_vm9, %v1037_v33, %v1048_v31  ;;  %v1324_v31 = vld [vmem:[#allocation5 + $0x20] sm:$0xff]  ;;  %v1325_v33 = vld [vmem:[#allocation5 + $0x28] sm:$0xff] }
 0xe1a   :  { %2256 = vmatmul.msk.f32.vlgmr.msra.gmra.mxu0 %vm221_vm10, %v1050_v45  ;;  %2257 = vmatmul.msk.f32.vlgmr.msra.gmra.mxu1 %vm221_vm10, %v1050_v45  ;;  %v1322_v45 = vld [vmem:[#allocation5 + $0x10] sm:$0xff] }
 0xe1b   :  { %1495 = vmatpush.msra.mxu2 %v1324_v31  ;;  %v1328_v31 = vld [vmem:[#allocation5 + $0x40] sm:$0xff] }
 0xe1d   :  { %1496 = vmatpush.msra.mxu2 %v1322_v45 }
 0xe97   :  { %v1071_v5 = vpop.f32.mrf.mxu0  ;;  %v1091_v6 = vpop.f32.mrf.mxu1 }
 0xe98   :  { %v1096_v9 = vadd.f32 %v1071_v5, %v143_v7  ;;  %v1097_v10 = vadd.f32 %v1091_v6, %v2858_v34  ;;  %v1323_v7 = vld [vmem:[#allocation5 + $0x18] sm:$0xff]  ;;  %v1320_v5 = vld [vmem:[#allocation5] sm:$0xff]  ;;  %v1321_v6 = vld [vmem:[#allocation5 + $0x8] sm:$0xff] }
 0xe99   :  { %1497 = vmatpush.msra.mxu2 %v1320_v5 }
 0xe9a   :  { %2419 = vtanh.f32 %v1096_v9  ;;  %v2258_v14 = vmul.f32 -1.442695, %v1096_v9  ;;  %v2259_v15 = vmul.f32 -1.442695, %v1097_v10 }
 0xe9b   :  { %2421 = vtanh.f32 %v1097_v10 }
 0xe9c   :  { %2423 = vpow2.f32 %v2258_v14  ;;  %v1337_v14 = vld [vmem:[#allocation3 + $0x8] sm:$0xff] }
 0xe9d   :  { %2425 = vpow2.f32 %v2259_v15  ;;  %v1338_v15 = vld [vmem:[#allocation3 + $0x10] sm:$0xff] }
 0xea0   :  { %v2420_v11 = vpop.eup %2419 }
 0xea1   :  { %v2422_v12 = vpop.eup %2421  ;;  %1140 = vrot.lane.b32.xlu0 %v2420_v11, %s2580_s0 }
 0xea2   :  { %1151 = vrot.lane.b32.xlu1 %v2422_v12, %s2580_s0  ;;  %v2424_v16 = vpop.eup %2423  ;;  %v1336_v12 = vld [vmem:[#allocation3] sm:$0xff] }
 0xea3   :  { %v2426_v17 = vpop.eup %2425  ;;  %v1104_v1 = vadd.f32 1.0, %v2424_v16  ;;  %v1339_v16 = vld [vmem:[#allocation3 + $0x18] sm:$0xff] }
 0xea4   :  { %v1105_v18 = vadd.f32 1.0, %v2426_v17  ;;  %v1340_v17 = vld [vmem:[#allocation3 + $0x20] sm:$0xff] }
 0xea5   :  { %2427 = vrcp.f32 %v1104_v1  ;;  %v1117_v48 = vand.u32 2147483648, %v1104_v1  ;;  %vm1111_vm11 = vweird.f32 %v1104_v1  ;;  %v1115_v55 = vand.u32 2147483647, %v1104_v1 }
 0xea6   :  { %2429 = vrcp.f32 %v1105_v18  ;;  %v1132_v54 = vand.u32 2147483648, %v1105_v18  ;;  %vm1126_vm12 = vweird.f32 %v1105_v18  ;;  %v1130_v56 = vand.u32 2147483647, %v1105_v18 }
 0xea7   :  { %v1118_v60 = vor.u32 1.1754944e-38, %v1117_v48  ;;  %vm1116_vm15 = vcmp.eq.f32.partialorder %v1115_v55, 8.507059e+37 }
 0xea8   :  { %v1133_v61 = vor.u32 1.1754944e-38, %v1132_v54  ;;  %vm1131_vm0 = vcmp.eq.f32.partialorder %v1130_v56, 8.507059e+37 }
 0xeab   :  { %v2428_v49 = vpop.eup %2427 }
 0xeac   :  { %v2430_v34 = vpop.eup %2429  ;;  %v1107_v20 = vmul.f32 %v2428_v49, %v1104_v1  ;;  %vm1112_vm7 = vweird.f32 %v2428_v49  ;;  %v1341_v1 = vld [vmem:[#allocation3 + $0x28] sm:$0xff] }
 0xead   :  { %v1122_v22 = vmul.f32 %v2430_v34, %v1105_v18  ;;  %vm1127_vm8 = vweird.f32 %v2430_v34  ;;  %vm1113_vm13 = vmor %vm1111_vm11, %vm1112_vm7 }
 0xeae   :  { %v1108_v23 = vsub.f32 1.0, %v1107_v20  ;;  %vm1128_vm14 = vmor %vm1126_vm12, %vm1127_vm8 }
 0xeaf   :  { %v1123_v39 = vsub.f32 1.0, %v1122_v22 }
 0xeb0   :  { %v1109_v46 = vmul.f32 %v2428_v49, %v1108_v23 }
 0xeb1   :  { %v1124_v43 = vmul.f32 %v2430_v34, %v1123_v39 }
 0xeb2   :  { %v1110_v51 = vadd.f32 %v2428_v49, %v1109_v46 }
 0xeb3   :  { %v1125_v52 = vadd.f32 %v2430_v34, %v1124_v43 }
 0xeb4   :  { %v1114_v57 = vsel %vm1113_vm13, %v2428_v49, %v1110_v51 }
 0xeb5   :  { %v1129_v59 = vsel %vm1128_vm14, %v2430_v34, %v1125_v52  ;;  %v1119_v63 = vsel %vm1116_vm15, %v1118_v60, %v1114_v57 }
 0xeb6   :  { %v1134_v2 = vsel %vm1131_vm0, %v1133_v61, %v1129_v59  ;;  %v1138_v21 = vmul.f32 %v1119_v63, %v3061_v40 }
 0xeb7   :  { %v1149_v26 = vmul.f32 %v1134_v2, %v3056_v27  ;;  %v1327_v27 = vld [vmem:[#allocation5 + $0x38] sm:$0xff] }
 0xeb8   :  { %1535 = vmatpush.msra.mxu3 %v1327_v27  ;;  %v1331_v27 = vld [vmem:[#allocation5 + $0x58] sm:$0xff] }
 0xeba   :  { %1536 = vmatpush.msra.mxu3 %v1325_v33  ;;  %v1329_v33 = vld [vmem:[#allocation5 + $0x48] sm:$0xff] }
 0xebc   :  { %1537 = vmatpush.msra.mxu3 %v1323_v7 }
 0xebe   :  { %1538 = vmatpush.msra.mxu3 %v1321_v6  ;;  %v3155_v6 = vld [vmem:[#allocation7 + $0x10] sm:$0xff] }
 0xf13   :  { %v1141_v62 = vpop.permute.xlu0 %1140 }
 0xf14   :  { %v1152_v0 = vpop.permute.xlu1 %1151  ;;  %v1143_v4 = vmul.f32 %v1141_v62, %v1119_v63 }
 0xf15   :  { %v1154_v13 = vmul.f32 %v1152_v0, %v1134_v2 }
 0xf16   :  { %1145 = vrot.lane.b32.xlu2 %v1143_v4, %s2581_s3 }
 0xf17   :  { %1156 = vrot.lane.b32.xlu0 %v1154_v13, %s2581_s3 }
 0xf70   :  { %v1146_v24 = vpop.permute.xlu2 %1145 }
 0xf71   :  { %v3082_v47 = vadd.f32 %v1146_v24, %v1138_v21 }
 0xf73   :  { %2431 = vtanh.f32 %v3082_v47 }
 0xf79   :  { %v2432_v25 = vpop.eup %2431 }
 0xf7a   :  { %1162 = vrot.lane.b32.xlu1 %v2432_v25, %s2580_s0 }
 0xf89   :  { %v1157_v28 = vpop.permute.xlu0 %1156 }
 0xf8a   :  { %v3087_v30 = vadd.f32 %v1157_v28, %v1149_v26 }
 0xf8c   :  { %2433 = vtanh.f32 %v3087_v30 }
 0xf92   :  { %v2434_v50 = vpop.eup %2433 }
 0xf93   :  { %1168 = vrot.lane.b32.xlu2 %v2434_v50, %s2580_s0 }
 0xfec   :  { %v1163_v38 = vpop.permute.xlu1 %1162 }
 0xfed   :  { %v1169_v40 = vpop.permute.xlu2 %1168  ;;  %v1165_v41 = vmul.f32 %v1163_v38, %v1119_v63 }
 0xfee   :  { %v3091_v37 = vmul.f32 %v1169_v40, %v1134_v2 }
 0xfef   :  { %1173 = vrot.lane.b32.xlu0 %v1165_v41, %s2581_s3  ;;  %v1335_v41 = vld [vmem:[#allocation5 + $0x78] sm:$0xff] }
 0xff0   :  { %1184 = vrot.lane.b32.xlu1 %v3091_v37, %s2580_s0  ;;  %1429 = vmatpush.msrb.mxu1 %v1335_v41 }
0x1061   :  { %v1174_v9 = vpop.permute.xlu0 %1173 }
0x1062   :  { %1177 = vst.msk [vmem:[#allocation3 + $0x30] sm:$0xff] %vm348_vm9, %v1174_v9  ;;  %v1185_v10 = vpop.permute.xlu1 %1184 }
0x1063   :  { %v1187_v11 = vsel %vm348_vm9, %v1174_v9, %v1185_v10 }
0x1064   :  { %2260 = vmatmul.msk.f32.vlgmr.msrb.gmra.mxu2 %vm221_vm10, %v1187_v11  ;;  %2261 = vmatmul.msk.f32.vlgmr.msrb.gmra.mxu3 %vm221_vm10, %v1187_v11 }
0x1069   :  { %v1342_v18 = vld [vmem:[#allocation3 + $0x30] sm:$0xff] }
0x106c   :  { %2280 = vmatmul.msk.f32.vlgmr.msra.gmra.mxu2 %vm348_vm9, %v1336_v12  ;;  %2288 = vmatmul.msk.f32.vlgmr.msra.gmra.mxu3 %vm348_vm9, %v1336_v12  ;;  %v3166_v12 = vld [vmem:[#allocation7] sm:$0xff] }
0x1074   :  { %2281 = vmatmul.msk.f32.gmra.mxu2 %vm348_vm9, %v1337_v14  ;;  %2289 = vmatmul.msk.f32.gmra.mxu3 %vm348_vm9, %v1337_v14 }
0x107c   :  { %2282 = vmatmul.msk.f32.gmra.mxu2 %vm348_vm9, %v1338_v15  ;;  %2290 = vmatmul.msk.f32.gmra.mxu3 %vm348_vm9, %v1338_v15 }
0x1084   :  { %2283 = vmatmul.msk.f32.gmra.mxu2 %vm348_vm9, %v1339_v16  ;;  %2291 = vmatmul.msk.f32.gmra.mxu3 %vm348_vm9, %v1339_v16 }
0x108c   :  { %2284 = vmatmul.msk.f32.gmra.mxu2 %vm348_vm9, %v1340_v17  ;;  %2292 = vmatmul.msk.f32.gmra.mxu3 %vm348_vm9, %v1340_v17 }
0x1094   :  { %2285 = vmatmul.msk.f32.gmra.mxu2 %vm348_vm9, %v1341_v1  ;;  %2293 = vmatmul.msk.f32.gmra.mxu3 %vm348_vm9, %v1341_v1 }
0x109c   :  { %2286 = vmatmul.msk.f32.gmra.mxu2 %vm348_vm9, %v1342_v18  ;;  %2294 = vmatmul.msk.f32.gmra.mxu3 %vm348_vm9, %v1342_v18 }
0x10e7   :  { %v1228_v49 = vpop.f32.mrf.mxu3 }
0x10e8   :  { %v1234_v34 = vadd.f32 %v1228_v49, %v2856_v32 }
0x10ea   :  { %2435 = vtanh.f32 %v1234_v34  ;;  %v2263_v52 = vmul.f32 -1.442695, %v1234_v34 }
0x10ec   :  { %2437 = vpow2.f32 %v2263_v52 }
0x10ef   :  { %v1540_v20 = vpop.f32.mrf.mxu3 }
0x10f0   :  { %v2436_v22 = vpop.eup %2435 }
0x10f1   :  { %1288 = vrot.lane.b32.xlu2 %v2436_v22, %s2580_s0 }
0x10f2   :  { %v2438_v54 = vpop.eup %2437 }
0x10f3   :  { %v1242_v55 = vadd.f32 1.0, %v2438_v54 }
0x10f5   :  { %2439 = vrcp.f32 %v1242_v55  ;;  %v1269_v61 = vand.u32 2147483648, %v1242_v55  ;;  %vm1263_vm1 = vweird.f32 %v1242_v55  ;;  %v1267_v62 = vand.u32 2147483647, %v1242_v55 }
0x10f7   :  { %v1543_v23 = vpop.f32.mrf.mxu3  ;;  %v1270_v0 = vor.u32 1.1754944e-38, %v1269_v61  ;;  %vm1268_vm3 = vcmp.eq.f32.partialorder %v1267_v62, 8.507059e+37 }
0x10fb   :  { %v2440_v56 = vpop.eup %2439 }
0x10fc   :  { %v1259_v57 = vmul.f32 %v2440_v56, %v1242_v55  ;;  %vm1264_vm10 = vweird.f32 %v2440_v56 }
0x10fd   :  { %vm1265_vm2 = vmor %vm1263_vm1, %vm1264_vm10 }
0x10fe   :  { %v1260_v59 = vsub.f32 1.0, %v1259_v57  ;;  %v3214_v57 = vld [vmem:[%s3349_s6] sm:$0x3]  ;;  %s2582_s6 = smov 96  }
0x10ff   :  { %v1546_v39 = vpop.f32.mrf.mxu3 }
0x1100   :  { %v1261_v32 = vmul.f32 %v2440_v56, %v1260_v59 }
0x1102   :  { %v1262_v60 = vadd.f32 %v2440_v56, %v1261_v32 }
0x1104   :  { %v1266_v63 = vsel %vm1265_vm2, %v2440_v56, %v1262_v60  ;;  %v3217_v60 = vperm.slane %v3214_v57, 0 }
0x1105   :  { %v1271_v4 = vsel %vm1268_vm3, %v1270_v0, %v1266_v63 }
0x1106   :  { %v1286_v21 = vmul.f32 %v1271_v4, %v3087_v30 }
0x1107   :  { %v1549_v46 = vpop.f32.mrf.mxu3 }
0x110f   :  { %v1552_v43 = vpop.f32.mrf.mxu3 }
0x1117   :  { %v1555_v51 = vpop.f32.mrf.mxu3 }
0x111f   :  { %v1558_v48 = vpop.f32.mrf.mxu3 }
0x1120   :  { %v3205_v48 = vpop.f32.mrf.mxu2 }
0x1128   :  { %v1499_v59 = vpop.f32.mrf.mxu2 }
0x114b   :  { %v1289_v2 = vpop.permute.xlu2 %1288 }
0x114c   :  { %v1291_v13 = vmul.f32 %v1289_v2, %v1271_v4 }
0x114e   :  { %1293 = vrot.lane.b32.xlu0 %v1291_v13, %s2581_s3 }
0x1156   :  { %1179 = vrot.lane.b32.xlu0 %v3091_v37, %s2581_s3  ;;  %v1332_v37 = vld [vmem:[#allocation5 + $0x60] sm:$0xff] }
0x115e   :  { %768 = vrot.lane.b32.xlu0 %v3008_v8, %s2581_s3 }
0x1166   :  { %351 = vrot.lane.b32.xlu0 %v2886_v58, %s2581_s3 }
0x11c0   :  { %v1294_v24 = vpop.permute.xlu0 %1293 }
0x11c1   :  { %v1296_v25 = vadd.f32 %v1294_v24, %v1286_v21 }
0x11c3   :  { %2441 = vtanh.f32 %v1296_v25 }
0x11c8   :  { %v1180_v26 = vpop.permute.xlu0 %1179 }
0x11c9   :  { %v2442_v28 = vpop.eup %2441  ;;  %1183 = vst.msk [vmem:[#allocation4 + $0x8] sm:$0xff] %vm348_vm9, %v1180_v26 }
0x11ca   :  { %1305 = vrot.lane.b32.xlu1 %v2442_v28, %s2580_s0 }
0x11d0   :  { %v769_v50 = vpop.permute.xlu0 %768  ;;  %v1345_v10 = vld [vmem:[#allocation4 + $0x8] sm:$0xff] }
0x11d1   :  { %772 = vst.msk [vmem:[#allocation4 + $0x20] sm:$0xff] %vm348_vm9, %v769_v50 }
0x11d2   :  { %1042 = vrot.lane.b32.xlu1 %v3065_v42, %s2581_s3  ;;  %v1334_v42 = vld [vmem:[#allocation5 + $0x70] sm:$0xff] }
0x11d3   :  { %1388 = vmatpush.msrb.mxu0 %v1334_v42 }
0x11d5   :  { %1389 = vmatpush.msrb.mxu0 %v1332_v37 }
0x11d7   :  { %1390 = vmatpush.msrb.mxu0 %v1330_v29 }
0x11d8   :  { %v352_v8 = vpop.permute.xlu0 %351  ;;  %v1348_v15 = vld [vmem:[#allocation4 + $0x20] sm:$0xff] }
0x11d9   :  { %355 = vst.msk [vmem:[#allocation4 + $0x38] sm:$0xff] %vm348_vm9, %v352_v8  ;;  %1391 = vmatpush.msrb.mxu0 %v1328_v31 }
0x11da   :  { %629 = vrot.lane.b32.xlu1 %v2967_v44, %s2581_s3  ;;  %v1333_v44 = vld [vmem:[#allocation5 + $0x68] sm:$0xff] }
0x11db   :  { %1430 = vmatpush.msrb.mxu1 %v1333_v44 }
0x11dd   :  { %1431 = vmatpush.msrb.mxu1 %v1331_v27 }
0x11df   :  { %1432 = vmatpush.msrb.mxu1 %v1329_v33 }
0x11e0   :  { %v1351_v1 = vld [vmem:[#allocation4 + $0x38] sm:$0xff] }
0x123c   :  { %v1306_v58 = vpop.permute.xlu1 %1305 }
0x123d   :  { %v1308_v30 = vmul.f32 %v1306_v58, %v1271_v4 }
0x123f   :  { %1316 = vrot.lane.b32.xlu2 %v1308_v30, %s2581_s3 }
0x1244   :  { %v1043_v38 = vpop.permute.xlu1 %1042 }
0x1245   :  { %1046 = vst.msk [vmem:[#allocation4 + $0x10] sm:$0xff] %vm348_vm9, %v1043_v38 }
0x1247   :  { %905 = vrot.lane.b32.xlu2 %v3039_v36, %s2581_s3  ;;  %v3139_v36 = vld [vmem:[#allocation7 + $0x30] sm:$0xff] }
0x1248   :  { %1621 = vmatpush.msra.mxu0 %v3139_v36  ;;  %1685 = vmatpush.msra.mxu1 %v3139_v36 }
0x1249   :  { %1877 = vmatpush.msrb.mxu2 %v3139_v36  ;;  %1941 = vmatpush.msrb.mxu3 %v3139_v36 }
0x124c   :  { %v630_v40 = vpop.permute.xlu1 %629  ;;  %v1346_v11 = vld [vmem:[#allocation4 + $0x10] sm:$0xff] }
0x124d   :  { %633 = vst.msk [vmem:[#allocation4 + $0x28] sm:$0xff] %vm348_vm9, %v630_v40 }
0x124f   :  { %490 = vrot.lane.b32.xlu2 %v2926_v53, %s2581_s3  ;;  %v3145_v53 = vld [vmem:[#allocation7 + $0x20] sm:$0xff] }
0x1250   :  { %1622 = vmatpush.msra.mxu0 %v3145_v53  ;;  %1686 = vmatpush.msra.mxu1 %v3145_v53 }
0x1251   :  { %1878 = vmatpush.msrb.mxu2 %v3145_v53  ;;  %1942 = vmatpush.msrb.mxu3 %v3145_v53 }
0x1252   :  { %1623 = vmatpush.msra.mxu0 %v3155_v6  ;;  %1687 = vmatpush.msra.mxu1 %v3155_v6 }
0x1253   :  { %1879 = vmatpush.msrb.mxu2 %v3155_v6  ;;  %1943 = vmatpush.msrb.mxu3 %v3155_v6 }
0x1254   :  { %1624 = vmatpush.msra.mxu0 %v3166_v12  ;;  %1688 = vmatpush.msra.mxu1 %v3166_v12  ;;  %v1349_v16 = vld [vmem:[#allocation4 + $0x28] sm:$0xff] }
0x1255   :  { %1880 = vmatpush.msrb.mxu2 %v3166_v12  ;;  %1944 = vmatpush.msrb.mxu3 %v3166_v12 }
0x1299   :  { %v1317_v45 = vpop.permute.xlu2 %1316 }
0x129a   :  { %1319 = vst.msk [vmem:[#allocation4] sm:$0xff] %vm348_vm9, %v1317_v45 }
0x12a1   :  { %v906_v7 = vpop.permute.xlu2 %905  ;;  %v1344_v5 = vld [vmem:[#allocation4] sm:$0xff] }
0x12a2   :  { %909 = vst.msk [vmem:[#allocation4 + $0x18] sm:$0xff] %vm348_vm9, %v906_v7  ;;  %2264 = vmatmul.msk.f32.vlgmr.msrb.gmra.mxu0 %vm348_vm9, %v1344_v5  ;;  %2272 = vmatmul.msk.f32.vlgmr.msrb.gmra.mxu1 %vm348_vm9, %v1344_v5  ;;  %v1502_v7 = vpop.f32.mrf.mxu2 }
0x12a3   :  { %1749 = vmatpush.msrb.mxu0 %v3139_v36  ;;  %1813 = vmatpush.msrb.mxu1 %v3139_v36 }
0x12a5   :  { %1750 = vmatpush.msrb.mxu0 %v3145_v53  ;;  %1814 = vmatpush.msrb.mxu1 %v3145_v53 }
0x12a7   :  { %1751 = vmatpush.msrb.mxu0 %v3155_v6  ;;  %1815 = vmatpush.msrb.mxu1 %v3155_v6 }
0x12a9   :  { %v491_v9 = vpop.permute.xlu2 %490  ;;  %v1347_v14 = vld [vmem:[#allocation4 + $0x18] sm:$0xff]  ;;  %1752 = vmatpush.msrb.mxu0 %v3166_v12  ;;  %1816 = vmatpush.msrb.mxu1 %v3166_v12 }
0x12aa   :  { %494 = vst.msk [vmem:[#allocation4 + $0x30] sm:$0xff] %vm348_vm9, %v491_v9  ;;  %2265 = vmatmul.msk.f32.gmra.mxu0 %vm348_vm9, %v1345_v10  ;;  %2273 = vmatmul.msk.f32.gmra.mxu1 %vm348_vm9, %v1345_v10 }
0x12b1   :  { %v1350_v17 = vld [vmem:[#allocation4 + $0x30] sm:$0xff] }
0x12b2   :  { %2266 = vmatmul.msk.f32.gmra.mxu0 %vm348_vm9, %v1346_v11  ;;  %2274 = vmatmul.msk.f32.gmra.mxu1 %vm348_vm9, %v1346_v11 }
0x12ba   :  { %2267 = vmatmul.msk.f32.gmra.mxu0 %vm348_vm9, %v1347_v14  ;;  %2275 = vmatmul.msk.f32.gmra.mxu1 %vm348_vm9, %v1347_v14 }
0x12c2   :  { %2268 = vmatmul.msk.f32.gmra.mxu0 %vm348_vm9, %v1348_v15  ;;  %2276 = vmatmul.msk.f32.gmra.mxu1 %vm348_vm9, %v1348_v15 }
0x12ca   :  { %2269 = vmatmul.msk.f32.gmra.mxu0 %vm348_vm9, %v1349_v16  ;;  %2277 = vmatmul.msk.f32.gmra.mxu1 %vm348_vm9, %v1349_v16 }
0x12d2   :  { %2270 = vmatmul.msk.f32.gmra.mxu0 %vm348_vm9, %v1350_v17  ;;  %2278 = vmatmul.msk.f32.gmra.mxu1 %vm348_vm9, %v1350_v17 }
0x12da   :  { %2271 = vmatmul.msk.f32.gmra.mxu0 %vm348_vm9, %v1351_v1  ;;  %2279 = vmatmul.msk.f32.gmra.mxu1 %vm348_vm9, %v1351_v1 }
0x12e2   :  { %1625 = vmatmul.f32.vlgmr.msra.gmra.mxu0 %v2579_v19 }
0x12e3   :  { %2005 = vmatpush.msra.mxu0 %v3139_v36 }
0x12e5   :  { %2006 = vmatpush.msra.mxu0 %v3145_v53 }
0x12e7   :  { %2007 = vmatpush.msra.mxu0 %v3155_v6 }
0x12e9   :  { %2008 = vmatpush.msra.mxu0 %v3166_v12 }
0x131f   :  { %v1393_v18 = vpop.f32.mrf.mxu0  ;;  %v1434_v49 = vpop.f32.mrf.mxu1 }
0x1320   :  { %v1500_v32 = vadd.f32 %v1499_v59, %v1393_v18 }
0x1322   :  { %v1570_v61 = vadd.f32 %v3217_v60, %v1500_v32 }
0x1327   :  { %v3195_v34 = vpop.f32.mrf.mxu0  ;;  %v1437_v20 = vpop.f32.mrf.mxu1 }
0x1328   :  { %v1503_v5 = vadd.f32 %v1502_v7, %v3195_v34 }
0x132a   :  { %v1572_v9 = vadd.f32 %v3217_v60, %v1503_v5 }
0x132f   :  { %v3197_v22 = vpop.f32.mrf.mxu0  ;;  %v1440_v23 = vpop.f32.mrf.mxu1 }
0x1337   :  { %v3199_v39 = vpop.f32.mrf.mxu0  ;;  %v1443_v46 = vpop.f32.mrf.mxu1 }
0x133f   :  { %v3201_v19 = vpop.f32.mrf.mxu0  ;;  %v1446_v43 = vpop.f32.mrf.mxu1 }
0x1347   :  { %v3203_v51 = vpop.f32.mrf.mxu0  ;;  %v1449_v52 = vpop.f32.mrf.mxu1 }
0x134f   :  { %v3207_v54 = vpop.f32.mrf.mxu0  ;;  %v1452_v55 = vpop.f32.mrf.mxu1 }
0x1357   :  { %v3209_v56 = vpop.f32.mrf.mxu0  ;;  %v3229_v45 = vpop.f32.mrf.mxu1 }
0x135f   :  { %v1626_v62 = vpop.f32.mrf.mxu0 }
0x1360   :  { %v1629_v63 = vadd.f32 %v1626_v62, %v1570_v61 }
0x1362   :  { %2443 = vtanh.f32 %v1629_v63  ;;  %v2296_v2 = vmul.f32 -1.442695, %v1629_v63 }
0x1364   :  { %2445 = vpow2.f32 %v2296_v2 }
0x1368   :  { %v2444_v0 = vpop.eup %2443 }
0x1369   :  { %1652 = vrot.lane.b32.xlu1 %v2444_v0, %s2580_s0  ;;  %v1505_v0 = vpop.f32.mrf.mxu2 }
0x136a   :  { %v2446_v4 = vpop.eup %2445  ;;  %v1506_v2 = vadd.f32 %v1505_v0, %v3197_v22 }
0x136b   :  { %v1633_v13 = vadd.f32 1.0, %v2446_v4 }
0x136c   :  { %v1574_v4 = vadd.f32 %v3217_v60, %v1506_v2 }
0x136d   :  { %2447 = vrcp.f32 %v1633_v13  ;;  %v1645_v50 = vand.u32 2147483648, %v1633_v13  ;;  %vm1639_vm5 = vweird.f32 %v1633_v13  ;;  %v1643_v8 = vand.u32 2147483647, %v1633_v13 }
0x136f   :  { %v1646_v30 = vor.u32 1.1754944e-38, %v1645_v50  ;;  %vm1644_vm7 = vcmp.eq.f32.partialorder %v1643_v8, 8.507059e+37 }
0x1373   :  { %v2448_v21 = vpop.eup %2447 }
0x1374   :  { %v1635_v24 = vmul.f32 %v2448_v21, %v1633_v13  ;;  %vm1640_vm4 = vweird.f32 %v2448_v21 }
0x1375   :  { %vm1641_vm6 = vmor %vm1639_vm5, %vm1640_vm4 }
0x1376   :  { %v1636_v25 = vsub.f32 1.0, %v1635_v24 }
0x1378   :  { %v1637_v26 = vmul.f32 %v2448_v21, %v1636_v25 }
0x137a   :  { %v1638_v28 = vadd.f32 %v2448_v21, %v1637_v26 }
0x137c   :  { %v1642_v58 = vsel %vm1641_vm6, %v2448_v21, %v1638_v28 }
0x137d   :  { %v1647_v40 = vsel %vm1644_vm7, %v1646_v30, %v1642_v58 }
0x137e   :  { %v1650_v41 = vmul.f32 0.0, %v1647_v40 }
0x13db   :  { %v1653_v38 = vpop.permute.xlu1 %1652 }
0x13dc   :  { %v1655_v42 = vmul.f32 %v1653_v38, %v1647_v40 }
0x13de   :  { %1657 = vrot.lane.b32.xlu2 %v1655_v42, %s2581_s3 }
0x1438   :  { %v1658_v37 = vpop.permute.xlu2 %1657 }
0x1439   :  { %v1660_v44 = vadd.f32 %v1658_v37, %v1650_v41  ;;  %v146_v41 = vadd.f32 %v3021_v3, %v2860_v35 }
0x143b   :  { %2449 = vtanh.f32 %v1660_v44 }
0x1441   :  { %v2450_v29 = vpop.eup %2449 }
0x1442   :  { %1663 = vrot.lane.b32.xlu0 %v2450_v29, %s2580_s0 }
0x14b4   :  { %v1664_v27 = vpop.permute.xlu0 %1663 }
0x14b5   :  { %v1666_v31 = vmul.f32 %v1664_v27, %v1647_v40 }
0x14b7   :  { %1669 = vrot.lane.b32.xlu1 %v1666_v31, %s2581_s3 }
0x1529   :  { %v1670_v33 = vpop.permute.xlu1 %1669 }
0x152a   :  { %2297 = vmatmul.msk.f32.vlgmr.msra.gmra.mxu1 %vm348_vm9, %v1670_v33 }
0x152b   :  { %2069 = vmatpush.msra.mxu1 %v3139_v36 }
0x152d   :  { %2070 = vmatpush.msra.mxu1 %v3145_v53 }
0x152f   :  { %2071 = vmatpush.msra.mxu1 %v3155_v6 }
0x1531   :  { %2072 = vmatpush.msra.mxu1 %v3166_v12 }
0x15a7   :  { %v1690_v10 = vpop.f32.mrf.mxu1 }
0x15a8   :  { %v1693_v11 = vadd.f32 %v1690_v10, %v1572_v9 }
0x15aa   :  { %2451 = vtanh.f32 %v1693_v11  ;;  %v2298_v36 = vmul.f32 -1.442695, %v1693_v11 }
0x15ac   :  { %2453 = vpow2.f32 %v2298_v36 }
0x15b0   :  { %v2452_v14 = vpop.eup %2451 }
0x15b1   :  { %1716 = vrot.lane.b32.xlu2 %v2452_v14, %s2580_s0 }
0x15b2   :  { %v2454_v53 = vpop.eup %2453 }
0x15b3   :  { %v1697_v15 = vadd.f32 1.0, %v2454_v53 }
0x15b5   :  { %2455 = vrcp.f32 %v1697_v15  ;;  %v1709_v18 = vand.u32 2147483648, %v1697_v15  ;;  %vm1703_vm11 = vweird.f32 %v1697_v15  ;;  %v1707_v49 = vand.u32 2147483647, %v1697_v15 }
0x15b7   :  { %v1710_v20 = vor.u32 1.1754944e-38, %v1709_v18  ;;  %vm1708_vm13 = vcmp.eq.f32.partialorder %v1707_v49, 8.507059e+37 }
0x15bb   :  { %v2456_v6 = vpop.eup %2455 }
0x15bc   :  { %v1699_v12 = vmul.f32 %v2456_v6, %v1697_v15  ;;  %vm1704_vm8 = vweird.f32 %v2456_v6 }
0x15bd   :  { %vm1705_vm12 = vmor %vm1703_vm11, %vm1704_vm8 }
0x15be   :  { %v1700_v16 = vsub.f32 1.0, %v1699_v12 }
0x15c0   :  { %v1701_v17 = vmul.f32 %v2456_v6, %v1700_v16 }
0x15c2   :  { %v1702_v1 = vadd.f32 %v2456_v6, %v1701_v17 }
0x15c4   :  { %v1706_v34 = vsel %vm1705_vm12, %v2456_v6, %v1702_v1 }
0x15c5   :  { %v1711_v46 = vsel %vm1708_vm13, %v1710_v20, %v1706_v34 }
0x15c6   :  { %v1714_v52 = vmul.f32 %v1711_v46, %v1660_v44  ;;  %v1233_v44 = vadd.f32 %v3205_v48, %v146_v41 }
0x15c8   :  { %v2262_v3 = vmul.f32 -1.442695, %v1233_v44 }
0x160b   :  { %v1717_v23 = vpop.permute.xlu2 %1716 }
0x160c   :  { %v1719_v43 = vmul.f32 %v1717_v23, %v1711_v46 }
0x160e   :  { %1721 = vrot.lane.b32.xlu0 %v1719_v43, %s2581_s3 }
0x1680   :  { %v1722_v55 = vpop.permute.xlu0 %1721 }
0x1681   :  { %v1724_v59 = vadd.f32 %v1722_v55, %v1714_v52 }
0x1683   :  { %2457 = vtanh.f32 %v1724_v59 }
0x1689   :  { %v2458_v32 = vpop.eup %2457 }
0x168a   :  { %1727 = vrot.lane.b32.xlu1 %v2458_v32, %s2580_s0 }
0x16fc   :  { %v1728_v61 = vpop.permute.xlu1 %1727 }
0x16fd   :  { %v1730_v62 = vmul.f32 %v1728_v61, %v1711_v46  ;;  %v1508_v46 = vpop.f32.mrf.mxu2 }
0x16fe   :  { %v1509_v43 = vadd.f32 %v1508_v46, %v3199_v39 }
0x16ff   :  { %1733 = vrot.lane.b32.xlu2 %v1730_v62, %s2581_s3 }
0x1700   :  { %v1576_v52 = vadd.f32 %v3217_v60, %v1509_v43 }
0x1759   :  { %v1734_v63 = vpop.permute.xlu2 %1733 }
0x175a   :  { %2299 = vmatmul.msk.f32.vlgmr.msrb.gmra.mxu0 %vm348_vm9, %v1734_v63 }
0x17d7   :  { %v1754_v13 = vpop.f32.mrf.mxu0 }
0x17d8   :  { %v1757_v21 = vadd.f32 %v1754_v13, %v1574_v4 }
0x17da   :  { %2459 = vtanh.f32 %v1757_v21  ;;  %v2300_v25 = vmul.f32 -1.442695, %v1757_v21 }
0x17dc   :  { %2461 = vpow2.f32 %v2300_v25 }
0x17e0   :  { %v2460_v24 = vpop.eup %2459 }
0x17e1   :  { %1780 = vrot.lane.b32.xlu0 %v2460_v24, %s2580_s0 }
0x17e2   :  { %v2462_v26 = vpop.eup %2461 }
0x17e3   :  { %v1761_v28 = vadd.f32 1.0, %v2462_v26 }
0x17e5   :  { %2463 = vrcp.f32 %v1761_v28  ;;  %v1773_v22 = vand.u32 2147483648, %v1761_v28  ;;  %vm1767_vm15 = vweird.f32 %v1761_v28  ;;  %v1771_v40 = vand.u32 2147483647, %v1761_v28 }
0x17e6   :  { %2465 = vtanh.f32 %v1233_v44 }
0x17e7   :  { %v1774_v37 = vor.u32 1.1754944e-38, %v1773_v22  ;;  %vm1772_vm10 = vcmp.eq.f32.partialorder %v1771_v40, 8.507059e+37 }
0x17eb   :  { %v2464_v50 = vpop.eup %2463 }
0x17ec   :  { %v1763_v8 = vmul.f32 %v2464_v50, %v1761_v28  ;;  %vm1768_vm14 = vweird.f32 %v2464_v50  ;;  %v2466_v33 = vpop.eup %2465 }
0x17ed   :  { %vm1769_vm0 = vmor %vm1767_vm15, %vm1768_vm14 }
0x17ee   :  { %v1764_v58 = vsub.f32 1.0, %v1763_v8 }
0x17f0   :  { %v1765_v30 = vmul.f32 %v2464_v50, %v1764_v58 }
0x17f2   :  { %v1766_v38 = vadd.f32 %v2464_v50, %v1765_v30 }
0x17f4   :  { %v1770_v42 = vsel %vm1769_vm0, %v2464_v50, %v1766_v38 }
0x17f5   :  { %v1775_v27 = vsel %vm1772_vm10, %v1774_v37, %v1770_v42 }
0x17f6   :  { %v1778_v7 = vmul.f32 %v1775_v27, %v1724_v59 }
0x1853   :  { %v1781_v29 = vpop.permute.xlu0 %1780 }
0x1854   :  { %v1783_v31 = vmul.f32 %v1781_v29, %v1775_v27 }
0x1856   :  { %1785 = vrot.lane.b32.xlu1 %v1783_v31, %s2581_s3 }
0x185e   :  { %1277 = vrot.lane.b32.xlu1 %v2466_v33, %s2580_s0 }
0x18c8   :  { %v1786_v5 = vpop.permute.xlu1 %1785 }
0x18c9   :  { %v3246_v9 = vadd.f32 %v1786_v5, %v1778_v7  ;;  %v1511_v5 = vpop.f32.mrf.mxu2 }
0x18cb   :  { %2467 = vtanh.f32 %v3246_v9 }
0x18cc   :  { %2469 = vpow2.f32 %v2262_v3 }
0x18d0   :  { %v1278_v18 = vpop.permute.xlu1 %1277 }
0x18d1   :  { %v2468_v35 = vpop.eup %2467 }
0x18d2   :  { %1791 = vrot.lane.b32.xlu2 %v2468_v35, %s2580_s0  ;;  %v2470_v48 = vpop.eup %2469 }
0x18d3   :  { %v1241_v10 = vadd.f32 1.0, %v2470_v48  ;;  %v1512_v48 = vadd.f32 %v1511_v5, %v3201_v19 }
0x18d5   :  { %2471 = vrcp.f32 %v1241_v10  ;;  %v1254_v16 = vand.u32 2147483648, %v1241_v10  ;;  %vm1248_vm2 = vweird.f32 %v1241_v10  ;;  %v1252_v17 = vand.u32 2147483647, %v1241_v10 }
0x18d7   :  { %v1255_v49 = vor.u32 1.1754944e-38, %v1254_v16  ;;  %vm1253_vm4 = vcmp.eq.f32.partialorder %v1252_v17, 8.507059e+37 }
0x18db   :  { %v2472_v11 = vpop.eup %2471 }
0x18dc   :  { %v1244_v14 = vmul.f32 %v2472_v11, %v1241_v10  ;;  %vm1249_vm1 = vweird.f32 %v2472_v11  ;;  %v1578_v10 = vadd.f32 %v3217_v60, %v1512_v48 }
0x18dd   :  { %vm1250_vm3 = vmor %vm1248_vm2, %vm1249_vm1 }
0x18de   :  { %v1245_v36 = vsub.f32 1.0, %v1244_v14 }
0x18e0   :  { %v1246_v53 = vmul.f32 %v2472_v11, %v1245_v36 }
0x18e2   :  { %v1247_v6 = vadd.f32 %v2472_v11, %v1246_v53 }
0x18e4   :  { %v1251_v1 = vsel %vm1250_vm3, %v2472_v11, %v1247_v6 }
0x18e5   :  { %v1256_v34 = vsel %vm1253_vm4, %v1255_v49, %v1251_v1 }
0x18e6   :  { %v1280_v20 = vmul.f32 %v1278_v18, %v1256_v34  ;;  %v1275_v61 = vmul.f32 %v1256_v34, %v3082_v47 }
0x192c   :  { %v1792_v15 = vpop.permute.xlu2 %1791 }
0x192d   :  { %v1794_v12 = vmul.f32 %v1792_v15, %v1775_v27 }
0x192f   :  { %1797 = vrot.lane.b32.xlu0 %v1794_v12, %s2581_s3 }
0x1937   :  { %1282 = vrot.lane.b32.xlu0 %v1280_v20, %s2581_s3 }
0x19a1   :  { %v1798_v23 = vpop.permute.xlu0 %1797 }
0x19a2   :  { %2301 = vmatmul.msk.f32.vlgmr.msrb.gmra.mxu1 %vm348_vm9, %v1798_v23 }
0x19a9   :  { %v1283_v32 = vpop.permute.xlu0 %1282 }
0x19aa   :  { %v1285_v62 = vadd.f32 %v1283_v32, %v1275_v61 }
0x1a1f   :  { %v1818_v55 = vpop.f32.mrf.mxu1 }
0x1a20   :  { %v1821_v59 = vadd.f32 %v1818_v55, %v1576_v52 }
0x1a22   :  { %2473 = vtanh.f32 %v1821_v59  ;;  %v2302_v2 = vmul.f32 -1.442695, %v1821_v59 }
0x1a23   :  { %2475 = vtanh.f32 %v1285_v62 }
0x1a24   :  { %2477 = vpow2.f32 %v2302_v2 }
0x1a28   :  { %v2474_v63 = vpop.eup %2473 }
0x1a29   :  { %1844 = vrot.lane.b32.xlu2 %v2474_v63, %s2580_s0  ;;  %v2476_v0 = vpop.eup %2475 }
0x1a2a   :  { %v2478_v4 = vpop.eup %2477 }
0x1a2b   :  { %v1825_v39 = vadd.f32 1.0, %v2478_v4 }
0x1a2d   :  { %2479 = vrcp.f32 %v1825_v39  ;;  %v1837_v47 = vand.u32 2147483648, %v1825_v39  ;;  %vm1831_vm6 = vweird.f32 %v1825_v39  ;;  %v1835_v28 = vand.u32 2147483647, %v1825_v39 }
0x1a2f   :  { %v1838_v8 = vor.u32 1.1754944e-38, %v1837_v47  ;;  %vm1836_vm8 = vcmp.eq.f32.partialorder %v1835_v28, 8.507059e+37 }
0x1a31   :  { %1299 = vrot.lane.b32.xlu2 %v2476_v0, %s2580_s0 }
0x1a33   :  { %v2480_v13 = vpop.eup %2479 }
0x1a34   :  { %v1827_v21 = vmul.f32 %v2480_v13, %v1825_v39  ;;  %vm1832_vm5 = vweird.f32 %v2480_v13 }
0x1a35   :  { %vm1833_vm7 = vmor %vm1831_vm6, %vm1832_vm5 }
0x1a36   :  { %v1828_v24 = vsub.f32 1.0, %v1827_v21 }
0x1a38   :  { %v1829_v25 = vmul.f32 %v2480_v13, %v1828_v24 }
0x1a3a   :  { %v1830_v26 = vadd.f32 %v2480_v13, %v1829_v25 }
0x1a3c   :  { %v1834_v50 = vsel %vm1833_vm7, %v2480_v13, %v1830_v26 }
0x1a3d   :  { %v1839_v30 = vsel %vm1836_vm8, %v1838_v8, %v1834_v50 }
0x1a3e   :  { %v1842_v42 = vmul.f32 %v1839_v30, %v3246_v9  ;;  %v1514_v9 = vpop.f32.mrf.mxu2 }
0x1a3f   :  { %v1515_v2 = vadd.f32 %v1514_v9, %v3203_v51 }
0x1a41   :  { %v1580_v4 = vadd.f32 %v3217_v60, %v1515_v2 }
0x1a46   :  { %v3267_v35 = vpop.f32.mrf.mxu2 }
0x1a47   :  { %v1518_v5 = vadd.f32 %v3267_v35, %v3207_v54 }
0x1a49   :  { %v1582_v9 = vadd.f32 %v3217_v60, %v1518_v5 }
0x1a83   :  { %v1845_v58 = vpop.permute.xlu2 %1844 }
0x1a84   :  { %v1847_v38 = vmul.f32 %v1845_v58, %v1839_v30 }
0x1a86   :  { %1849 = vrot.lane.b32.xlu1 %v1847_v38, %s2581_s3 }
0x1a8b   :  { %v1300_v22 = vpop.permute.xlu2 %1299 }
0x1a8c   :  { %v1302_v40 = vmul.f32 %v1300_v22, %v1256_v34 }
0x1a8e   :  { %1310 = vrot.lane.b32.xlu1 %v1302_v40, %s2581_s3 }
0x1af8   :  { %v1850_v41 = vpop.permute.xlu1 %1849 }
0x1af9   :  { %v1852_v37 = vadd.f32 %v1850_v41, %v1842_v42 }
0x1afb   :  { %2481 = vtanh.f32 %v1852_v37 }
0x1b00   :  { %v1311_v44 = vpop.permute.xlu1 %1310 }
0x1b01   :  { %v2482_v29 = vpop.eup %2481  ;;  %1314 = vst.msk [vmem:[#allocation3 + $0x38] sm:$0xff] %vm348_vm9, %v1311_v44 }
0x1b02   :  { %1855 = vrot.lane.b32.xlu0 %v2482_v29, %s2580_s0 }
0x1b08   :  { %v1343_v27 = vld [vmem:[#allocation3 + $0x38] sm:$0xff] }
0x1b09   :  { %2287 = vmatmul.msk.f32.gmra.mxu2 %vm348_vm9, %v1343_v27  ;;  %2295 = vmatmul.msk.f32.gmra.mxu3 %vm348_vm9, %v1343_v27 }
0x1b74   :  { %v1856_v31 = vpop.permute.xlu0 %1855 }
0x1b75   :  { %v1858_v33 = vmul.f32 %v1856_v31, %v1839_v30 }
0x1b77   :  { %1861 = vrot.lane.b32.xlu2 %v1858_v33, %s2581_s3 }
0x1b8c   :  { %v3269_v3 = vpop.f32.mrf.mxu2  ;;  %v3278_v0 = vpop.f32.mrf.mxu3 }
0x1b8d   :  { %v1521_v2 = vadd.f32 %v3269_v3, %v3209_v56 }
0x1bd1   :  { %v1862_v7 = vpop.permute.xlu2 %1861 }
0x1bd2   :  { %2303 = vmatmul.msk.f32.vlgmr.msrb.gmra.mxu2 %vm348_vm9, %v1862_v7 }
0x1c55   :  { %v1882_v11 = vpop.f32.mrf.mxu2 }
0x1c56   :  { %v1885_v14 = vadd.f32 %v1882_v11, %v1578_v10 }
0x1c58   :  { %2483 = vtanh.f32 %v1885_v14  ;;  %v2304_v53 = vmul.f32 -1.442695, %v1885_v14 }
0x1c5a   :  { %2485 = vpow2.f32 %v2304_v53 }
0x1c5e   :  { %v2484_v36 = vpop.eup %2483 }
0x1c5f   :  { %1908 = vrot.lane.b32.xlu0 %v2484_v36, %s2580_s0 }
0x1c60   :  { %v2486_v15 = vpop.eup %2485 }
0x1c61   :  { %v1889_v6 = vadd.f32 1.0, %v2486_v15 }
0x1c63   :  { %2487 = vrcp.f32 %v1889_v6  ;;  %v1901_v19 = vand.u32 2147483648, %v1889_v6  ;;  %vm1895_vm12 = vweird.f32 %v1889_v6  ;;  %v1899_v49 = vand.u32 2147483647, %v1889_v6 }
0x1c65   :  { %v1902_v20 = vor.u32 1.1754944e-38, %v1901_v19  ;;  %vm1900_vm14 = vcmp.eq.f32.partialorder %v1899_v49, 8.507059e+37 }
0x1c69   :  { %v2488_v12 = vpop.eup %2487 }
0x1c6a   :  { %v1891_v16 = vmul.f32 %v2488_v12, %v1889_v6  ;;  %vm1896_vm11 = vweird.f32 %v2488_v12 }
0x1c6b   :  { %vm1897_vm13 = vmor %vm1895_vm12, %vm1896_vm11 }
0x1c6c   :  { %v1892_v17 = vsub.f32 1.0, %v1891_v16 }
0x1c6e   :  { %v1893_v1 = vmul.f32 %v2488_v12, %v1892_v17 }
0x1c70   :  { %v1894_v18 = vadd.f32 %v2488_v12, %v1893_v1 }
0x1c72   :  { %v1898_v34 = vsel %vm1897_vm13, %v2488_v12, %v1894_v18 }
0x1c73   :  { %v1903_v46 = vsel %vm1900_vm14, %v1902_v20, %v1898_v34 }
0x1c74   :  { %v1906_v52 = vmul.f32 %v1903_v46, %v1852_v37 }
0x1cd1   :  { %v1909_v23 = vpop.permute.xlu0 %1908 }
0x1cd2   :  { %v1911_v43 = vmul.f32 %v1909_v23, %v1903_v46 }
0x1cd4   :  { %1913 = vrot.lane.b32.xlu1 %v1911_v43, %s2581_s3 }
0x1d46   :  { %v1914_v55 = vpop.permute.xlu1 %1913 }
0x1d47   :  { %v1916_v59 = vadd.f32 %v1914_v55, %v1906_v52  ;;  %v1562_v52 = vadd.f32 %v3278_v0, %v3229_v45  ;;  %v1567_v55 = vperm.slane %v3214_v57, 1 }
0x1d49   :  { %2489 = vtanh.f32 %v1916_v59 }
0x1d4f   :  { %v2490_v32 = vpop.eup %2489 }
0x1d50   :  { %1919 = vrot.lane.b32.xlu2 %v2490_v32, %s2580_s0 }
0x1daa   :  { %v1920_v61 = vpop.permute.xlu2 %1919 }
0x1dab   :  { %v1922_v62 = vmul.f32 %v1920_v61, %v1903_v46 }
0x1dad   :  { %1925 = vrot.lane.b32.xlu0 %v1922_v62, %s2581_s3 }
0x1e1f   :  { %v1926_v63 = vpop.permute.xlu0 %1925 }
0x1e20   :  { %2305 = vmatmul.msk.f32.vlgmr.msrb.gmra.mxu3 %vm348_vm9, %v1926_v63 }
0x1ea3   :  { %v1946_v39 = vpop.f32.mrf.mxu3 }
0x1ea4   :  { %v1949_v13 = vadd.f32 %v1946_v39, %v1580_v4  ;;  %v1584_v4 = vadd.f32 %v3217_v60, %v1521_v2 }
0x1ea6   :  { %2491 = vtanh.f32 %v1949_v13  ;;  %v2306_v24 = vmul.f32 -1.442695, %v1949_v13 }
0x1ea8   :  { %2493 = vpow2.f32 %v2306_v24 }
0x1eac   :  { %v2492_v21 = vpop.eup %2491 }
0x1ead   :  { %1972 = vrot.lane.b32.xlu1 %v2492_v21, %s2580_s0 }
0x1eae   :  { %v2494_v25 = vpop.eup %2493 }
0x1eaf   :  { %v1953_v26 = vadd.f32 1.0, %v2494_v25 }
0x1eb1   :  { %2495 = vrcp.f32 %v1953_v26  ;;  %v1965_v51 = vand.u32 2147483648, %v1953_v26  ;;  %vm1959_vm0 = vweird.f32 %v1953_v26  ;;  %v1963_v30 = vand.u32 2147483647, %v1953_v26 }
0x1eb3   :  { %v1966_v22 = vor.u32 1.1754944e-38, %v1965_v51  ;;  %vm1964_vm1 = vcmp.eq.f32.partialorder %v1963_v30, 8.507059e+37 }
0x1eb7   :  { %v2496_v47 = vpop.eup %2495 }
0x1eb8   :  { %v1955_v28 = vmul.f32 %v2496_v47, %v1953_v26  ;;  %vm1960_vm15 = vweird.f32 %v2496_v47 }
0x1eb9   :  { %vm1961_vm10 = vmor %vm1959_vm0, %vm1960_vm15  ;;  %vm2210_vm0 = vcmask 31744  }
0x1eba   :  { %v1956_v50 = vsub.f32 1.0, %v1955_v28 }
0x1ebc   :  { %v1957_v8 = vmul.f32 %v2496_v47, %v1956_v50 }
0x1ebe   :  { %v1958_v58 = vadd.f32 %v2496_v47, %v1957_v8 }
0x1ec0   :  { %v1962_v38 = vsel %vm1961_vm10, %v2496_v47, %v1958_v58 }
0x1ec1   :  { %v1967_v42 = vsel %vm1964_vm1, %v1966_v22, %v1962_v38 }
0x1ec2   :  { %v1970_v37 = vmul.f32 %v1967_v42, %v1916_v59  ;;  %v1585_v59 = vadd.f32 %v1567_v55, %v1562_v52 }
0x1ec4   :  { %v2311_v39 = vmul.f32 -1.442695, %v1585_v59 }
0x1f1f   :  { %v1973_v40 = vpop.permute.xlu1 %1972 }
0x1f20   :  { %v1975_v41 = vmul.f32 %v1973_v40, %v1967_v42 }
0x1f22   :  { %1977 = vrot.lane.b32.xlu2 %v1975_v41, %s2581_s3 }
0x1f7c   :  { %v1978_v44 = vpop.permute.xlu2 %1977 }
0x1f7d   :  { %v1980_v29 = vadd.f32 %v1978_v44, %v1970_v37 }
0x1f7f   :  { %2497 = vtanh.f32 %v1980_v29 }
0x1f85   :  { %v2498_v27 = vpop.eup %2497 }
0x1f86   :  { %1983 = vrot.lane.b32.xlu0 %v2498_v27, %s2580_s0 }
0x1ff8   :  { %v1984_v31 = vpop.permute.xlu0 %1983 }
0x1ff9   :  { %v1986_v33 = vmul.f32 %v1984_v31, %v1967_v42 }
0x1ffb   :  { %1989 = vrot.lane.b32.xlu1 %v1986_v33, %s2581_s3 }
0x206d   :  { %v1990_v7 = vpop.permute.xlu1 %1989 }
0x206e   :  { %2307 = vmatmul.msk.f32.vlgmr.msra.gmra.mxu0 %vm348_vm9, %v1990_v7 }
0x20eb   :  { %v2010_v48 = vpop.f32.mrf.mxu0 }
0x20ec   :  { %v2013_v10 = vadd.f32 %v2010_v48, %v1582_v9 }
0x20ee   :  { %2499 = vtanh.f32 %v2013_v10  ;;  %v2308_v14 = vmul.f32 -1.442695, %v2013_v10  ;;  %v2154_v10 = vld [vmem:[%s3350_s7 + $0x38] sm:$0xff] }
0x20ef   :  { %2172 = vmatpush.msra.mxu2 %v2154_v10 }
0x20f0   :  { %2501 = vpow2.f32 %v2308_v14  ;;  %v2152_v14 = vld [vmem:[%s3350_s7 + $0x28] sm:$0xff] }
0x20f4   :  { %v2500_v11 = vpop.eup %2499 }
0x20f5   :  { %2036 = vrot.lane.b32.xlu2 %v2500_v11, %s2580_s0  ;;  %v2153_v11 = vld [vmem:[%s3350_s7 + $0x30] sm:$0xff] }
0x20f6   :  { %v2502_v36 = vpop.eup %2501  ;;  %2173 = vmatpush.msra.mxu2 %v2153_v11 }
0x20f7   :  { %v2017_v53 = vadd.f32 1.0, %v2502_v36  ;;  %v2151_v36 = vld [vmem:[%s3350_s7 + $0x20] sm:$0xff] }
0x20f8   :  { %2174 = vmatpush.msra.mxu2 %v2152_v14 }
0x20f9   :  { %2503 = vrcp.f32 %v2017_v53  ;;  %v2029_v54 = vand.u32 2147483648, %v2017_v53  ;;  %vm2023_vm3 = vweird.f32 %v2017_v53  ;;  %v2027_v35 = vand.u32 2147483647, %v2017_v53 }
0x20fa   :  { %2175 = vmatpush.msra.mxu2 %v2151_v36 }
0x20fb   :  { %v2030_v18 = vor.u32 1.1754944e-38, %v2029_v54  ;;  %vm2028_vm5 = vcmp.eq.f32.partialorder %v2027_v35, 8.507059e+37 }
0x20ff   :  { %v2504_v15 = vpop.eup %2503 }
0x2100   :  { %v2019_v6 = vmul.f32 %v2504_v15, %v2017_v53  ;;  %vm2024_vm2 = vweird.f32 %v2504_v15 }
0x2101   :  { %vm2025_vm4 = vmor %vm2023_vm3, %vm2024_vm2 }
0x2102   :  { %v2020_v12 = vsub.f32 1.0, %v2019_v6 }
0x2104   :  { %v2021_v16 = vmul.f32 %v2504_v15, %v2020_v12 }
0x2106   :  { %v2022_v17 = vadd.f32 %v2504_v15, %v2021_v16 }
0x2108   :  { %v2026_v1 = vsel %vm2025_vm4, %v2504_v15, %v2022_v17 }
0x2109   :  { %v2031_v49 = vsel %vm2028_vm5, %v2030_v18, %v2026_v1  ;;  %v2150_v18 = vld [vmem:[%s3350_s7 + $0x18] sm:$0xff] }
0x210a   :  { %v2034_v20 = vmul.f32 %v2031_v49, %v1980_v29  ;;  %2197 = vmatpush.msra.mxu3 %v2150_v18 }
0x214f   :  { %v2037_v19 = vpop.permute.xlu2 %2036 }
0x2150   :  { %v2039_v34 = vmul.f32 %v2037_v19, %v2031_v49  ;;  %v2149_v19 = vld [vmem:[%s3350_s7 + $0x10] sm:$0xff] }
0x2151   :  { %2198 = vmatpush.msra.mxu3 %v2149_v19 }
0x2152   :  { %2041 = vrot.lane.b32.xlu0 %v2039_v34, %s2581_s3  ;;  %v2147_v34 = vld [vmem:[%s3350_s7] sm:$0xff] }
0x21c4   :  { %v2042_v23 = vpop.permute.xlu0 %2041 }
0x21c5   :  { %v3292_v46 = vadd.f32 %v2042_v23, %v2034_v20  ;;  %v2322_v23 = vld [vmem:[%s3351_s8] ss:$0 sm:$0xff] }
0x21c7   :  { %2505 = vtanh.f32 %v3292_v46 }
0x21c8   :  { %2507 = vtanh.f32 %v1585_v59 }
0x21cd   :  { %v2506_v43 = vpop.eup %2505 }
0x21ce   :  { %2047 = vrot.lane.b32.xlu1 %v2506_v43, %s2580_s0  ;;  %v2508_v62 = vpop.eup %2507 }
0x2240   :  { %v2048_v32 = vpop.permute.xlu1 %2047 }
0x2241   :  { %v2050_v61 = vmul.f32 %v2048_v32, %v2031_v49  ;;  %v2148_v49 = vld [vmem:[%s3350_s7 + $0x8] sm:$0xff] }
0x2242   :  { %2199 = vmatpush.msra.mxu3 %v2148_v49 }
0x2243   :  { %2053 = vrot.lane.b32.xlu2 %v2050_v61, %s2581_s3 }
0x2244   :  { %2200 = vmatpush.msra.mxu3 %v2147_v34 }
0x224b   :  { %2137 = vrot.lane.b32.xlu2 %v2508_v62, %s2580_s0 }
0x229d   :  { %v2054_v63 = vpop.permute.xlu2 %2053 }
0x229e   :  { %2309 = vmatmul.msk.f32.vlgmr.msra.gmra.mxu1 %vm348_vm9, %v2054_v63 }
0x22a5   :  { %v2138_v44 = vpop.permute.xlu2 %2137 }
0x231b   :  { %v2074_v45 = vpop.f32.mrf.mxu1 }
0x231c   :  { %v2077_v0 = vadd.f32 %v2074_v45, %v1584_v4 }
0x231e   :  { %2509 = vtanh.f32 %v2077_v0  ;;  %v2310_v13 = vmul.f32 -1.442695, %v2077_v0 }
0x231f   :  { %2511 = vpow2.f32 %v2311_v39 }
0x2320   :  { %2513 = vpow2.f32 %v2310_v13 }
0x2324   :  { %v2510_v57 = vpop.eup %2509 }
0x2325   :  { %2100 = vrot.lane.b32.xlu0 %v2510_v57, %s2580_s0  ;;  %v2512_v21 = vpop.eup %2511 }
0x2326   :  { %v2514_v24 = vpop.eup %2513  ;;  %v2119_v25 = vadd.f32 1.0, %v2512_v21 }
0x2327   :  { %v2081_v26 = vadd.f32 1.0, %v2514_v24 }
0x2328   :  { %2515 = vrcp.f32 %v2119_v25  ;;  %v2131_v30 = vand.u32 2147483648, %v2119_v25  ;;  %vm2125_vm8 = vweird.f32 %v2119_v25  ;;  %v2129_v22 = vand.u32 2147483647, %v2119_v25 }
0x2329   :  { %2517 = vrcp.f32 %v2081_v26  ;;  %v2093_v40 = vand.u32 2147483648, %v2081_v26  ;;  %vm2087_vm12 = vweird.f32 %v2081_v26  ;;  %v2091_v42 = vand.u32 2147483647, %v2081_v26 }
0x232a   :  { %v2132_v37 = vor.u32 1.1754944e-38, %v2131_v30  ;;  %vm2130_vm14 = vcmp.eq.f32.partialorder %v2129_v22, 8.507059e+37 }
0x232b   :  { %v2094_v27 = vor.u32 1.1754944e-38, %v2093_v40  ;;  %vm2092_vm15 = vcmp.eq.f32.partialorder %v2091_v42, 8.507059e+37 }
0x232e   :  { %v2516_v47 = vpop.eup %2515 }
0x232f   :  { %v2518_v56 = vpop.eup %2517  ;;  %v2121_v3 = vmul.f32 %v2516_v47, %v2119_v25  ;;  %vm2126_vm6 = vweird.f32 %v2516_v47 }
0x2330   :  { %v2083_v60 = vmul.f32 %v2518_v56, %v2081_v26  ;;  %vm2088_vm7 = vweird.f32 %v2518_v56  ;;  %vm2127_vm11 = vmor %vm2125_vm8, %vm2126_vm6 }
0x2331   :  { %v2122_v28 = vsub.f32 1.0, %v2121_v3  ;;  %vm2089_vm13 = vmor %vm2087_vm12, %vm2088_vm7 }
0x2332   :  { %v2084_v50 = vsub.f32 1.0, %v2083_v60 }
0x2333   :  { %v2123_v8 = vmul.f32 %v2516_v47, %v2122_v28 }
0x2334   :  { %v2085_v58 = vmul.f32 %v2518_v56, %v2084_v50 }
0x2335   :  { %v2124_v51 = vadd.f32 %v2516_v47, %v2123_v8 }
0x2336   :  { %v2086_v38 = vadd.f32 %v2518_v56, %v2085_v58 }
0x2337   :  { %v2128_v41 = vsel %vm2127_vm11, %v2516_v47, %v2124_v51 }
0x2338   :  { %v2090_v29 = vsel %vm2089_vm13, %v2518_v56, %v2086_v38  ;;  %v2133_v31 = vsel %vm2130_vm14, %v2132_v37, %v2128_v41 }
0x2339   :  { %v2140_v33 = vmul.f32 %v2138_v44, %v2133_v31  ;;  %v2095_v5 = vsel %vm2092_vm15, %v2094_v27, %v2090_v29 }
0x233a   :  { %v2098_v53 = vmul.f32 %v2095_v5, %v3292_v46 }
0x233b   :  { %2519 = vtanh.f32 %v2140_v33 }
0x2341   :  { %v2520_v48 = vpop.eup %2519 }
0x2397   :  { %v2101_v7 = vpop.permute.xlu0 %2100 }
0x2398   :  { %v2103_v9 = vmul.f32 %v2101_v7, %v2095_v5 }
0x239a   :  { %2105 = vrot.lane.b32.xlu1 %v2103_v9, %s2581_s3 }
0x23a2   :  { %2143 = vrot.lane.b32.xlu1 %v2520_v48, %s2582_s6 }
0x240c   :  { %v2106_v15 = vpop.permute.xlu1 %2105 }
0x240d   :  { %v2108_v6 = vadd.f32 %v2106_v15, %v2098_v53 }
0x240f   :  { %2521 = vtanh.f32 %v2108_v6 }
0x2414   :  { %v2144_v12 = vpop.permute.xlu1 %2143 }
0x2415   :  { %v2522_v16 = vpop.eup %2521  ;;  %v2146_v17 = vmul.f32 %v2144_v12, %v2133_v31 }
0x2416   :  { %2111 = vrot.lane.b32.xlu0 %v2522_v16, %s2580_s0 }
0x2417   :  { %2156 = vrot.lane.b32.xlu2 %v2146_v17, %s2581_s3 }
0x2471   :  { %v2157_v54 = vpop.permute.xlu2 %2156 }
0x2472   :  { %2312 = vmatmul.msk.f32.vlgmr.msra.gmra.mxu2 %vm348_vm9, %v2157_v54 }
0x2488   :  { %v2112_v35 = vpop.permute.xlu0 %2111 }
0x2489   :  { %v2114_v1 = vmul.f32 %v2112_v35, %v2095_v5 }
0x248b   :  { %2181 = vrot.lane.b32.xlu0 %v2114_v1, %s2581_s3 }
0x24f5   :  { %v2177_v46 = vpop.f32.mrf.mxu2 }
0x24fd   :  { %v2182_v20 = vpop.permute.xlu0 %2181 }
0x24fe   :  { %2313 = vmatmul.msk.f32.vlgmr.msra.gmra.mxu3 %vm348_vm9, %v2182_v20 }
0x2581   :  { %v2202_v43 = vpop.f32.mrf.mxu3 }
0x2582   :  { %v2203_v52 = vadd.f32 %v2202_v43, %v2177_v46 }
0x2584   :  { %v2209_v55 = vadd.f32 %v2322_v23, %v2203_v52 }
0x2586   :  { %2211 = vst.msk [vmem:[%s3352_s9] sm:$0xff] %vm2210_vm0, %v2209_v55 }
0x2587   :  { %2216 = vsyncpa [#allocation6], 1 }
0x2588   :  { %2217 = vsyncpa [#allocation8], 1 }

</bundles_post_ra>
